<compile_context>
chip_gen: v5e
topology: v5e:2x2
jax: 0.10.0
libtpu: 0.0.40
codegen_flags: <defaults>
</compile_context>

<pallas_src>
import functools
import math

import numpy as np
import jax
import jax.numpy as jnp
from jax.experimental import pallas as pl
from jax.experimental.pallas import tpu as pltpu


# ----------------------------- helpers --------------------------------------

def _round_up(x, m):
    return ((x + m - 1) // m) * m


def _pick_seq_block(s, target=256):
    """Largest seq-tile <= target that divides s and is a multiple of 8 (else full s)."""
    if s <= target:
        return s
    for t in range(target, 7, -8):
        if s % t == 0:
            return t
    return s


def _pick_k_block(k, target=512):
    """Largest dff-tile <= target that divides k and is a multiple of 128 (else full k)."""
    if k <= target:
        return k
    for t in range(target, 127, -128):
        if k % t == 0:
            return t
    return k


def _vmem_budget(block_shapes, dtype, scratch_f32_shapes=(), margin=4 << 20):
    """Explicit VMEM budget: double-buffered I/O blocks + f32 scratch + headroom."""
    itemsize = np.dtype(dtype).itemsize
    total = sum(2 * math.prod(s) * itemsize for s in block_shapes)
    total += sum(math.prod(s) * 4 for s in scratch_f32_shapes)
    return int(min(2 * total + margin, 128 * 1024 * 1024))


def _layernorm_f32(y, g, b, eps):
    mean = jnp.mean(y, axis=-1, keepdims=True)
    var = jnp.mean(jnp.square(y - mean), axis=-1, keepdims=True)
    norm = (y - mean) * jax.lax.rsqrt(var + eps)
    return norm * g.astype(jnp.float32) + b.astype(jnp.float32)


def _mha_core(q_ref, kv_ref, attn_ref, n_head, scale, d_model):
    """Per-head attention. q_ref: [tq, D] (f32 scratch); kv_ref: [Sk, 2D] (ref);
    writes head-concatenated f32 result into attn_ref [tq, D] (lane-dense)."""
    dh = d_model // n_head
    for h in range(n_head):                                   # static unroll
        lo, hi = h * dh, (h + 1) * dh
        qh = q_ref[:, lo:hi].astype(jnp.float32) * scale      # scale folded into q
        kh = kv_ref[:, lo:hi].astype(jnp.float32)
        vh = kv_ref[:, d_model + lo:d_model + hi].astype(jnp.float32)
        # contract the dh axes directly (no k.T materialization)
        s = jax.lax.dot_general(qh, kh, (((1,), (1,)), ((), ())),
                                preferred_element_type=jnp.float32)
        p = jnp.exp(s - jnp.max(s, axis=-1, keepdims=True))
        inv = pl.reciprocal(jnp.sum(p, axis=-1, keepdims=True), approx=True)
        pv = jnp.dot(p, vh, preferred_element_type=jnp.float32)
        attn_ref[:, lo:hi] = pv * inv                         # flush head immediately


def _finish_mha(attn_f32, res, wo_ref, bo_ref, g_ref, b_ref, o_ref, eps):
    """out projection + residual + LayerNorm, fused in the same kernel."""
    y = jnp.dot(attn_f32.astype(wo_ref.dtype), wo_ref[...],
                preferred_element_type=jnp.float32)
    y = y + bo_ref[...].astype(jnp.float32) + res.astype(jnp.float32)
    o_ref[...] = _layernorm_f32(y, g_ref[...], b_ref[...], eps).astype(o_ref.dtype)


# ----------------------------- Pallas kernels --------------------------------

def _linear_kernel(x_ref, wt_ref, b_ref, o_ref):
    # o = x @ wt + b   (wt pre-transposed to [din, dout]); f32 accumulation on MXU
    acc = jnp.dot(x_ref[...], wt_ref[...], preferred_element_type=jnp.float32)
    o_ref[...] = (acc + b_ref[...].astype(jnp.float32)).astype(o_ref.dtype)


def _self_mha_kernel(x_q_ref, x_kv_ref, wqkv_ref, bqkv_ref, wo_ref, bo_ref,
                     g_ref, bln_ref, o_ref, q_sc, kv_sc, attn_sc, *,
                     n_head, scale, eps, d_model):
    D = d_model
    # K/V projection of the FULL sequence: computed once per batch (query-tile
    # axis is 'arbitrary' so qi iterates in order) and reused from scratch.
    @pl.when(pl.program_id(1) == 0)
    def _():
        kv_sc[...] = (jnp.dot(x_kv_ref[...], wqkv_ref[:, D:],
                              preferred_element_type=jnp.float32)
                      + bqkv_ref[:, D:].astype(jnp.float32))

    x_q = x_q_ref[...]
    q_sc[...] = (jnp.dot(x_q, wqkv_ref[:, :D], preferred_element_type=jnp.float32)
                 + bqkv_ref[:, :D].astype(jnp.float32))
    _mha_core(q_sc, kv_sc, attn_sc, n_head, scale, D)
    _finish_mha(attn_sc[...], x_q, wo_ref, bo_ref, g_ref, bln_ref, o_ref, eps)


def _cross_mha_kernel(x_q_ref, kv_ref, wq_ref, bq_ref, wo_ref, bo_ref,
                      g_ref, bln_ref, o_ref, q_sc, attn_sc, *,
                      n_head, scale, eps, d_model):
    x_q = x_q_ref[...]
    q_sc[...] = (jnp.dot(x_q, wq_ref[...], preferred_element_type=jnp.float32)
                 + bq_ref[...].astype(jnp.float32))
    _mha_core(q_sc, kv_ref, attn_sc, n_head, scale, d_model)
    _finish_mha(attn_sc[...], x_q, wo_ref, bo_ref, g_ref, bln_ref, o_ref, eps)


def _ffn_add_ln_kernel(x_ref, w1t_ref, b1_ref, w2t_ref, b2_ref, g_ref, bln_ref,
                       o_ref, acc_ref, *, eps):
    # o = LayerNorm(relu(x @ w1t + b1) @ w2t + b2 + x), dff reduction tiled over k.
    k = pl.program_id(1)

    @pl.when(k == 0)
    def _():
        acc_ref[...] = jnp.zeros_like(acc_ref)

    x = x_ref[...]
    h = jnp.dot(x, w1t_ref[...], preferred_element_type=jnp.float32)
    h = jnp.maximum(h + b1_ref[...].astype(jnp.float32), 0.0)
    acc_ref[...] += jnp.dot(h.astype(w2t_ref.dtype), w2t_ref[...],
                            preferred_element_type=jnp.float32)

    @pl.when(k == pl.num_programs(1) - 1)
    def _():
        y = acc_ref[...] + b2_ref[...].astype(jnp.float32) + x.astype(jnp.float32)
        o_ref[...] = _layernorm_f32(y, g_ref[...], bln_ref[...], eps).astype(o_ref.dtype)


# ----------------------------- pallas_call wrappers ---------------------------

def linear(x2d, wt, b, *, block_rows=512):
    """x2d: [N, din] @ wt: [din, dout] (pre-transposed) + b: [1, dout] -> [N, dout].
    Row-tiled over N (padded to a tile multiple); weight block constant-index."""
    n, din = x2d.shape
    dout = wt.shape[1]
    bn = min(block_rows, _round_up(n, 8))
    n_pad = _round_up(n, bn)
    x_p = jnp.pad(x2d, ((0, n_pad - n), (0, 0))) if n_pad != n else x2d
    vmem = _vmem_budget([(bn, din), (din, dout), (1, dout), (bn, dout)], x2d.dtype)
    out = pl.pallas_call(
        _linear_kernel,
        out_shape=jax.ShapeDtypeStruct((n_pad, dout), x2d.dtype),
        grid=(n_pad // bn,),
        in_specs=[
            pl.BlockSpec((bn, din), lambda i: (i, 0)),
            pl.BlockSpec((din, dout), lambda i: (0, 0)),
            pl.BlockSpec((1, dout), lambda i: (0, 0)),
        ],
        out_specs=pl.BlockSpec((bn, dout), lambda i: (i, 0)),
        compiler_params=pltpu.CompilerParams(
            dimension_semantics=("parallel",), vmem_limit_bytes=vmem),
    )(x_p, wt, b)
    return out[:n] if n_pad != n else out


def self_mha_add_ln(tgt, wqkv_t, bqkv, wo_t, bo, gamma, beta, n_head, eps=1e-5):
    """Fused QKV proj + MHA + out_proj + residual + LN1. tgt: [B, S, D]."""
    B, S, D = tgt.shape
    tq = _pick_seq_block(S)
    dh = D // n_head
    kern = functools.partial(_self_mha_kernel, n_head=n_head,
                             scale=1.0 / float(dh) ** 0.5, eps=eps, d_model=D)
    vmem = _vmem_budget(
        [(tq, D), (S, D), (D, 3 * D), (1, 3 * D), (D, D), (1, D), (1, D), (1, D), (tq, D)],
        tgt.dtype, scratch_f32_shapes=[(tq, D), (S, 2 * D), (tq, D), (tq, S)])
    return pl.pallas_call(
        kern,
        out_shape=jax.ShapeDtypeStruct((B, S, D), tgt.dtype),
        grid=(B, S // tq),
        in_specs=[
            pl.BlockSpec((None, tq, D), lambda b, q: (b, q, 0)),   # query rows + residual
            pl.BlockSpec((None, S, D), lambda b, q: (b, 0, 0)),    # full seq for K/V proj
            pl.BlockSpec((D, 3 * D), lambda b, q: (0, 0)),
            pl.BlockSpec((1, 3 * D), lambda b, q: (0, 0)),
            pl.BlockSpec((D, D), lambda b, q: (0, 0)),
            pl.BlockSpec((1, D), lambda b, q: (0, 0)),
            pl.BlockSpec((1, D), lambda b, q: (0, 0)),
            pl.BlockSpec((1, D), lambda b, q: (0, 0)),
        ],
        out_specs=pl.BlockSpec((None, tq, D), lambda b, q: (b, q, 0)),
        scratch_shapes=[pltpu.VMEM((tq, D), jnp.float32),          # q
                        pltpu.VMEM((S, 2 * D), jnp.float32),       # k|v (per batch)
                        pltpu.VMEM((tq, D), jnp.float32)],         # head-concat attn
        compiler_params=pltpu.CompilerParams(
            dimension_semantics=("parallel", "arbitrary"), vmem_limit_bytes=vmem),
    )(tgt, tgt, wqkv_t, bqkv, wo_t, bo, gamma, beta)


def cross_mha_add_ln(x1, kv, wq_t, bq, wo_t, bo, gamma, beta, n_head, eps=1e-5):
    """Fused Q proj + MHA + out_proj + residual + LN2.
    x1: [B, Sq, D] (query & residual); kv: [B, Sk, 2D] (pre-projected memory K|V)."""
    B, S, D = x1.shape
    Sk = kv.shape[1]
    tq = _pick_seq_block(S)
    dh = D // n_head
    kern = functools.partial(_cross_mha_kernel, n_head=n_head,
                             scale=1.0 / float(dh) ** 0.5, eps=eps, d_model=D)
    vmem = _vmem_budget(
        [(tq, D), (Sk, 2 * D), (D, D), (1, D), (D, D), (1, D), (1, D), (1, D), (tq, D)],
        x1.dtype, scratch_f32_shapes=[(tq, D), (tq, D), (tq, Sk)])
    return pl.pallas_call(
        kern,
        out_shape=jax.ShapeDtypeStruct((B, S, D), x1.dtype),
        grid=(B, S // tq),
        in_specs=[
            pl.BlockSpec((None, tq, D), lambda b, q: (b, q, 0)),
            pl.BlockSpec((None, Sk, 2 * D), lambda b, q: (b, 0, 0)),
            pl.BlockSpec((D, D), lambda b, q: (0, 0)),
            pl.BlockSpec((1, D), lambda b, q: (0, 0)),
            pl.BlockSpec((D, D), lambda b, q: (0, 0)),
            pl.BlockSpec((1, D), lambda b, q: (0, 0)),
            pl.BlockSpec((1, D), lambda b, q: (0, 0)),
            pl.BlockSpec((1, D), lambda b, q: (0, 0)),
        ],
        out_specs=pl.BlockSpec((None, tq, D), lambda b, q: (b, q, 0)),
        scratch_shapes=[pltpu.VMEM((tq, D), jnp.float32),          # q
                        pltpu.VMEM((tq, D), jnp.float32)],         # head-concat attn
        compiler_params=pltpu.CompilerParams(
            dimension_semantics=("parallel", "parallel"), vmem_limit_bytes=vmem),
    )(x1, kv, wq_t, bq, wo_t, bo, gamma, beta)


def ffn_add_ln(x2d, w1_t, b1, w2_t, b2, gamma, beta, eps=1e-5, *, block_rows=512):
    """LayerNorm(relu(x @ w1_t + b1) @ w2_t + b2 + x), row-tiled over N and
    dff-tiled over the reduction with an f32 accumulator."""
    n, d = x2d.shape
    dff = w1_t.shape[1]
    bn = min(block_rows, _round_up(n, 8))
    n_pad = _round_up(n, bn)
    x_p = jnp.pad(x2d, ((0, n_pad - n), (0, 0))) if n_pad != n else x2d
    tk = _pick_k_block(dff)
    vmem = _vmem_budget(
        [(bn, d), (d, tk), (1, tk), (tk, d), (1, d), (1, d), (1, d), (bn, d)],
        x2d.dtype, scratch_f32_shapes=[(bn, d), (bn, tk)])
    out = pl.pallas_call(
        functools.partial(_ffn_add_ln_kernel, eps=eps),
        out_shape=jax.ShapeDtypeStruct((n_pad, d), x2d.dtype),
        grid=(n_pad // bn, dff // tk),
        in_specs=[
            pl.BlockSpec((bn, d), lambda i, k: (i, 0)),
            pl.BlockSpec((d, tk), lambda i, k: (0, k)),
            pl.BlockSpec((1, tk), lambda i, k: (0, k)),
            pl.BlockSpec((tk, d), lambda i, k: (k, 0)),
            pl.BlockSpec((1, d), lambda i, k: (0, 0)),
            pl.BlockSpec((1, d), lambda i, k: (0, 0)),
            pl.BlockSpec((1, d), lambda i, k: (0, 0)),
        ],
        out_specs=pl.BlockSpec((bn, d), lambda i, k: (i, 0)),
        scratch_shapes=[pltpu.VMEM((bn, d), jnp.float32)],
        compiler_params=pltpu.CompilerParams(
            dimension_semantics=("parallel", "arbitrary"), vmem_limit_bytes=vmem),
    )(x_p, w1_t, b1, w2_t, b2, gamma, beta)
    return out[:n] if n_pad != n else out


# ----------------------------- module glue -----------------------------------

def prepare_params(params):
    """Pre-transpose torch-layout weights ONCE (outside the per-step layer call)."""
    sa, ca = params["self_attn"], params["cross_attn"]
    D = sa["out_proj_weight"].shape[0]
    r = lambda v: v.reshape(1, -1)
    return {
        "wqkv_t": jnp.transpose(sa["in_proj_weight"]),        # [D, 3D]
        "bqkv": r(sa["in_proj_bias"]),
        "wo1_t": jnp.transpose(sa["out_proj_weight"]),        # [D, D]
        "bo1": r(sa["out_proj_bias"]),
        "wq_t": jnp.transpose(ca["in_proj_weight"][:D]),      # [D, D]
        "bq": r(ca["in_proj_bias"][:D]),
        "wkv_t": jnp.transpose(ca["in_proj_weight"][D:]),     # [D, 2D]
        "bkv": r(ca["in_proj_bias"][D:]),
        "wo2_t": jnp.transpose(ca["out_proj_weight"]),
        "bo2": r(ca["out_proj_bias"]),
        "ln1_g": r(params["ln1_g"]), "ln1_b": r(params["ln1_b"]),
        "ln2_g": r(params["ln2_g"]), "ln2_b": r(params["ln2_b"]),
        "ln3_g": r(params["ln3_g"]), "ln3_b": r(params["ln3_b"]),
        "w1_t": jnp.transpose(params["ffn_w1"]),              # [D, dff]
        "b1": r(params["ffn_b1"]),
        "w2_t": jnp.transpose(params["ffn_w2"]),              # [dff, D]
        "b2": r(params["ffn_b2"]),
    }


def decoder_layer_forward(tgt, memory, prep, n_head, eps=1e-5):
    B, S, D = tgt.shape
    Bm, Sm, _ = memory.shape

    # self-attn block: fused QKV proj + attn + out_proj + add + LN1
    x1 = self_mha_add_ln(tgt, prep["wqkv_t"], prep["bqkv"], prep["wo1_t"],
                         prep["bo1"], prep["ln1_g"], prep["ln1_b"], n_head, eps)

    # cross-attn: memory K/V projection (shared across query tiles), then fused
    # Q proj + attn + out_proj + add + LN2
    kv = linear(memory.reshape(Bm * Sm, D), prep["wkv_t"],
                prep["bkv"]).reshape(Bm, Sm, 2 * D)
    x2 = cross_mha_add_ln(x1, kv, prep["wq_t"], prep["bq"], prep["wo2_t"],
                          prep["bo2"], prep["ln2_g"], prep["ln2_b"], n_head, eps)

    # FFN (dff-tiled) + residual + LN3, single fused kernel
    x3 = ffn_add_ln(x2.reshape(B * S, D), prep["w1_t"], prep["b1"], prep["w2_t"],
                    prep["b2"], prep["ln3_g"], prep["ln3_b"], eps).reshape(B, S, D)
    return x3


# ------------------------- pure-JAX reference ---------------------------------

def _mha_ref(query, key, value, p, n_head):
    B, Sq, D = query.shape
    Sk = key.shape[1]
    dh = D // n_head
    w_q, w_k, w_v = jnp.split(p["in_proj_weight"], 3, axis=0)
    b_q, b_k, b_v = jnp.split(p["in_proj_bias"], 3, axis=0)
    q = (query @ w_q.T + b_q).reshape(B, Sq, n_head, dh).transpose(0, 2, 1, 3)
    k = (key @ w_k.T + b_k).reshape(B, Sk, n_head, dh).transpose(0, 2, 1, 3)
    v = (value @ w_v.T + b_v).reshape(B, Sk, n_head, dh).transpose(0, 2, 1, 3)
    s = jnp.einsum("bhqd,bhkd->bhqk", q, k) / jnp.sqrt(float(dh))
    a = jax.nn.softmax(s, axis=-1)
    o = jnp.einsum("bhqk,bhkd->bhqd", a, v).transpose(0, 2, 1, 3).reshape(B, Sq, D)
    return o @ p["out_proj_weight"].T + p["out_proj_bias"]


def _ln_ref(x, g, b, eps=1e-5):
    m = jnp.mean(x, axis=-1, keepdims=True)
    v = jnp.mean((x - m) ** 2, axis=-1, keepdims=True)
    return (x - m) * jax.lax.rsqrt(v + eps) * g + b


def decoder_layer_ref(tgt, memory, params, n_head):
    x1 = _ln_ref(_mha_ref(tgt, tgt, tgt, params["self_attn"], n_head) + tgt,
                 params["ln1_g"], params["ln1_b"])
    x2 = _ln_ref(_mha_ref(x1, memory, memory, params["cross_attn"], n_head) + x1,
                 params["ln2_g"], params["ln2_b"])
    h = jnp.maximum(x2 @ params["ffn_w1"].T + params["ffn_b1"], 0.0)
    f = h @ params["ffn_w2"].T + params["ffn_b2"]
    return _ln_ref(f + x2, params["ln3_g"], params["ln3_b"])


# ------------------------------- params ---------------------------------------

def init_params(key, d_model, n_head, dim_ff):
    ks = jax.random.split(key, 4)
    scale = 0.02

    def mha_params(k):
        k1, k2 = jax.random.split(k)
        return {
            "in_proj_weight": scale * jax.random.normal(k1, (3 * d_model, d_model), jnp.float32),
            "in_proj_bias": jnp.zeros((3 * d_model,), jnp.float32),
            "out_proj_weight": scale * jax.random.normal(k2, (d_model, d_model), jnp.float32),
            "out_proj_bias": jnp.zeros((d_model,), jnp.float32),
        }

    return {
        "self_attn": mha_params(ks[0]),
        "cross_attn": mha_params(ks[1]),
        "ln1_g": jnp.ones((d_model,), jnp.float32), "ln1_b": jnp.zeros((d_model,), jnp.float32),
        "ln2_g": jnp.ones((d_model,), jnp.float32), "ln2_b": jnp.zeros((d_model,), jnp.float32),
        "ln3_g": jnp.ones((d_model,), jnp.float32), "ln3_b": jnp.zeros((d_model,), jnp.float32),
        "ffn_w1": scale * jax.random.normal(ks[2], (dim_ff, d_model), jnp.float32),
        "ffn_b1": jnp.zeros((dim_ff,), jnp.float32),
        "ffn_w2": scale * jax.random.normal(ks[3], (d_model, dim_ff), jnp.float32),
        "ffn_b2": jnp.zeros((d_model,), jnp.float32),
    }


# -------------------------------- main ----------------------------------------

if __name__ == "__main__":
    # Small but representative: D = 128 (one lane tile), 4 heads (dh=32),
    # dff = 1024 so the FFN exercises the tiled-dff accumulator (2 k-steps),
    # and S_mem != S_tgt to exercise the cross-attention path.
    d_model, n_head, dim_ff = 128, 4, 1024
    B, S_tgt, S_mem = 2, 8, 16

    key = jax.random.PRNGKey(0)
    k_tgt, k_mem, k_par = jax.random.split(key, 3)
    tgt = jax.random.normal(k_tgt, (B, S_tgt, d_model), jnp.float32)
    memory = jax.random.normal(k_mem, (B, S_mem, d_model), jnp.float32)
    params = init_params(k_par, d_model, n_head, dim_ff)
    prep = prepare_params(params)   # pre-transpose weights once, not per call

    fwd = jax.jit(decoder_layer_forward, static_argnums=(3,))
    out = jax.block_until_ready(fwd(tgt, memory, prep, n_head))

    ref = decoder_layer_ref(tgt, memory, params, n_head)
    assert out.shape == (B, S_tgt, d_model)
    assert jnp.allclose(out, ref, atol=1e-2, rtol=1e-2), "mismatch vs. reference"

    print("KERNEL_OK")
</pallas_src>

<mosaic_0001>
module attributes {stable_mosaic.version = 11 : i64} {
  func.func @_self_mha_kernel(%arg0: i32, %arg1: i32, %arg2: memref<1x8x128xf32, #tpu.memory_space<vmem>>, %arg3: memref<1x8x128xf32, #tpu.memory_space<vmem>>, %arg4: memref<128x384xf32, #tpu.memory_space<vmem>>, %arg5: memref<1x384xf32, #tpu.memory_space<vmem>>, %arg6: memref<128x128xf32, #tpu.memory_space<vmem>>, %arg7: memref<1x128xf32, #tpu.memory_space<vmem>>, %arg8: memref<1x128xf32, #tpu.memory_space<vmem>>, %arg9: memref<1x128xf32, #tpu.memory_space<vmem>>, %arg10: memref<1x8x128xf32, #tpu.memory_space<vmem>>, %arg11: memref<8x128xf32, #tpu.memory_space<vmem>>, %arg12: memref<8x256xf32, #tpu.memory_space<vmem>>, %arg13: memref<8x128xf32, #tpu.memory_space<vmem>>) attributes {dimension_semantics = [#tpu.dimension_semantics<parallel>, #tpu.dimension_semantics<arbitrary>], iteration_bounds = array<i64: 2, 1>, scalar_prefetch = 0 : i64, scratch_operands = 3 : i64, tpu.core_type = #tpu.core_type<tc>, window_params = [{transform_indices = @transform_0, window_bounds = array<i64: 1, 8, 128>}, {transform_indices = @transform_1, window_bounds = array<i64: 1, 8, 128>}, {pipeline_mode = #tpu.pipeline_mode<synchronous>, transform_indices = @transform_2, window_bounds = array<i64: 128, 384>}, {pipeline_mode = #tpu.pipeline_mode<synchronous>, transform_indices = @transform_3, window_bounds = array<i64: 1, 384>}, {pipeline_mode = #tpu.pipeline_mode<synchronous>, transform_indices = @transform_4, window_bounds = array<i64: 128, 128>}, {pipeline_mode = #tpu.pipeline_mode<synchronous>, transform_indices = @transform_5, window_bounds = array<i64: 1, 128>}, {pipeline_mode = #tpu.pipeline_mode<synchronous>, transform_indices = @transform_6, window_bounds = array<i64: 1, 128>}, {pipeline_mode = #tpu.pipeline_mode<synchronous>, transform_indices = @transform_7, window_bounds = array<i64: 1, 128>}, {transform_indices = @transform_8, window_bounds = array<i64: 1, 8, 128>}]} {
    %c0_i32 = arith.constant 0 : i32
    %0 = arith.cmpi eq, %arg1, %c0_i32 : i32
    %1 = arith.extui %0 : i1 to i32
    %c0_i32_0 = arith.constant 0 : i32
    %2 = arith.cmpi ne, %1, %c0_i32_0 : i32
    scf.if %2 {
      %c0_73 = arith.constant 0 : index
      %c0_74 = arith.constant 0 : index
      %c0_75 = arith.constant 0 : index
      %117 = vector.load %arg3[%c0_73, %c0_74, %c0_75] : memref<1x8x128xf32, #tpu.memory_space<vmem>>, vector<1x8x128xf32>
      %118 = vector.shape_cast %117 : vector<1x8x128xf32> to vector<8x128xf32>
      %c0_76 = arith.constant 0 : index
      %c128_77 = arith.constant 128 : index
      %119 = vector.load %arg4[%c0_76, %c128_77] : memref<128x384xf32, #tpu.memory_space<vmem>>, vector<128x256xf32>
      %cst_78 = arith.constant dense<0.000000e+00> : vector<8x256xf32>
      %120 = tpu.matmul %118, %119, %cst_78 {dimension_numbers = #tpu.dot_dimension_numbers<[1], [0], [0], [1], [0, 0, 1, 1], [], []>} : vector<8x128xf32>, vector<128x256xf32>, vector<8x256xf32> -> vector<8x256xf32>
      %c0_79 = arith.constant 0 : index
      %c128_80 = arith.constant 128 : index
      %121 = vector.load %arg5[%c0_79, %c128_80] : memref<1x384xf32, #tpu.memory_space<vmem>>, vector<1x256xf32>
      %122 = vector.broadcast %121 : vector<1x256xf32> to vector<8x256xf32>
      %123 = arith.addf %120, %122 : vector<8x256xf32>
      %c0_81 = arith.constant 0 : index
      %c0_82 = arith.constant 0 : index
      %124 = vector.load %arg12[%c0_81, %c0_82] : memref<8x256xf32, #tpu.memory_space<vmem>>, vector<8x256xf32>
      tpu.vector_store %arg12[%c0_81, %c0_82], %123 {strides = array<i32>} : memref<8x256xf32, #tpu.memory_space<vmem>>, vector<8x256xf32>,
    } else {
    }
    %c0 = arith.constant 0 : index
    %c0_1 = arith.constant 0 : index
    %c0_2 = arith.constant 0 : index
    %3 = vector.load %arg2[%c0, %c0_1, %c0_2] : memref<1x8x128xf32, #tpu.memory_space<vmem>>, vector<1x8x128xf32>
    %4 = vector.shape_cast %3 : vector<1x8x128xf32> to vector<8x128xf32>
    %c0_3 = arith.constant 0 : index
    %c0_4 = arith.constant 0 : index
    %5 = vector.load %arg4[%c0_3, %c0_4] : memref<128x384xf32, #tpu.memory_space<vmem>>, vector<128x128xf32>
    %cst = arith.constant dense<0.000000e+00> : vector<8x128xf32>
    %6 = tpu.matmul %4, %5, %cst {dimension_numbers = #tpu.dot_dimension_numbers<[1], [0], [0], [1], [0, 0, 1, 1], [], []>} : vector<8x128xf32>, vector<128x128xf32>, vector<8x128xf32> -> vector<8x128xf32>
    %c0_5 = arith.constant 0 : index
    %c0_6 = arith.constant 0 : index
    %7 = vector.load %arg5[%c0_5, %c0_6] : memref<1x384xf32, #tpu.memory_space<vmem>>, vector<1x128xf32>
    %8 = vector.broadcast %7 : vector<1x128xf32> to vector<8x128xf32>
    %9 = arith.addf %6, %8 : vector<8x128xf32>
    %c0_7 = arith.constant 0 : index
    %c0_8 = arith.constant 0 : index
    %10 = vector.load %arg11[%c0_7, %c0_8] : memref<8x128xf32, #tpu.memory_space<vmem>>, vector<8x128xf32>
    tpu.vector_store %arg11[%c0_7, %c0_8], %9 {strides = array<i32>} : memref<8x128xf32, #tpu.memory_space<vmem>>, vector<8x128xf32>,
    %c0_9 = arith.constant 0 : index
    %c0_10 = arith.constant 0 : index
    %11 = vector.load %arg11[%c0_9, %c0_10] : memref<8x128xf32, #tpu.memory_space<vmem>>, vector<8x32xf32>
    %cst_11 = arith.constant 0.176776692 : f32
    %12 = vector.broadcast %cst_11 : f32 to vector<8x32xf32>
    %13 = arith.mulf %11, %12 : vector<8x32xf32>
    %c0_12 = arith.constant 0 : index
    %c0_13 = arith.constant 0 : index
    %14 = vector.load %arg12[%c0_12, %c0_13] : memref<8x256xf32, #tpu.memory_space<vmem>>, vector<8x32xf32>
    %c0_14 = arith.constant 0 : index
    %c128 = arith.constant 128 : index
    %15 = vector.load %arg12[%c0_14, %c128] : memref<8x256xf32, #tpu.memory_space<vmem>>, vector<8x32xf32>
    %cst_15 = arith.constant dense<0.000000e+00> : vector<8x8xf32>
    %16 = tpu.matmul %13, %14, %cst_15 {dimension_numbers = #tpu.dot_dimension_numbers<[1], [1], [0], [0], [0, 0, 1, 0], [], []>} : vector<8x32xf32>, vector<8x32xf32>, vector<8x8xf32> -> vector<8x8xf32>
    %cst_16 = arith.constant dense<0xFF800000> : vector<8xf32>
    %17 = vector.multi_reduction <maximumf>, %16, %cst_16 [1] : vector<8x8xf32> to vector<8xf32>
    %18 = vector.shape_cast %17 : vector<8xf32> to vector<8x1xf32>
    %19 = vector.broadcast %18 : vector<8x1xf32> to vector<8x8xf32>
    %20 = arith.subf %16, %19 : vector<8x8xf32>
    %21 = math.exp %20 : vector<8x8xf32>
    %cst_17 = arith.constant dense<0.000000e+00> : vector<8xf32>
    %22 = vector.multi_reduction <add>, %21, %cst_17 [1] : vector<8x8xf32> to vector<8xf32>
    %23 = vector.shape_cast %22 : vector<8xf32> to vector<8x1xf32>
    %24 = tpu.reciprocal %23 {approx = true} : vector<8x1xf32> -> vector<8x1xf32>
    %cst_18 = arith.constant dense<0.000000e+00> : vector<8x32xf32>
    %25 = tpu.matmul %21, %15, %cst_18 {dimension_numbers = #tpu.dot_dimension_numbers<[1], [0], [0], [1], [0, 0, 1, 1], [], []>} : vector<8x8xf32>, vector<8x32xf32>, vector<8x32xf32> -> vector<8x32xf32>
    %26 = vector.broadcast %24 : vector<8x1xf32> to vector<8x32xf32>
    %27 = arith.mulf %25, %26 : vector<8x32xf32>
    %c0_19 = arith.constant 0 : index
    %c0_20 = arith.constant 0 : index
    %28 = vector.load %arg13[%c0_19, %c0_20] : memref<8x128xf32, #tpu.memory_space<vmem>>, vector<8x32xf32>
    tpu.vector_store %arg13[%c0_19, %c0_20], %27 {strides = array<i32>} : memref<8x128xf32, #tpu.memory_space<vmem>>, vector<8x32xf32>,
    %c0_21 = arith.constant 0 : index
    %c32 = arith.constant 32 : index
    %29 = vector.load %arg11[%c0_21, %c32] : memref<8x128xf32, #tpu.memory_space<vmem>>, vector<8x32xf32>
    %cst_22 = arith.constant 0.176776692 : f32
    %30 = vector.broadcast %cst_22 : f32 to vector<8x32xf32>
    %31 = arith.mulf %29, %30 : vector<8x32xf32>
    %c0_23 = arith.constant 0 : index
    %c32_24 = arith.constant 32 : index
    %32 = vector.load %arg12[%c0_23, %c32_24] : memref<8x256xf32, #tpu.memory_space<vmem>>, vector<8x32xf32>
    %c0_25 = arith.constant 0 : index
    %c160 = arith.constant 160 : index
    %33 = vector.load %arg12[%c0_25, %c160] : memref<8x256xf32, #tpu.memory_space<vmem>>, vector<8x32xf32>
    %cst_26 = arith.constant dense<0.000000e+00> : vector<8x8xf32>
    %34 = tpu.matmul %31, %32, %cst_26 {dimension_numbers = #tpu.dot_dimension_numbers<[1], [1], [0], [0], [0, 0, 1, 0], [], []>} : vector<8x32xf32>, vector<8x32xf32>, vector<8x8xf32> -> vector<8x8xf32>
    %cst_27 = arith.constant dense<0xFF800000> : vector<8xf32>
    %35 = vector.multi_reduction <maximumf>, %34, %cst_27 [1] : vector<8x8xf32> to vector<8xf32>
    %36 = vector.shape_cast %35 : vector<8xf32> to vector<8x1xf32>
    %37 = vector.broadcast %36 : vector<8x1xf32> to vector<8x8xf32>
    %38 = arith.subf %34, %37 : vector<8x8xf32>
    %39 = math.exp %38 : vector<8x8xf32>
    %cst_28 = arith.constant dense<0.000000e+00> : vector<8xf32>
    %40 = vector.multi_reduction <add>, %39, %cst_28 [1] : vector<8x8xf32> to vector<8xf32>
    %41 = vector.shape_cast %40 : vector<8xf32> to vector<8x1xf32>
    %42 = tpu.reciprocal %41 {approx = true} : vector<8x1xf32> -> vector<8x1xf32>
    %cst_29 = arith.constant dense<0.000000e+00> : vector<8x32xf32>
    %43 = tpu.matmul %39, %33, %cst_29 {dimension_numbers = #tpu.dot_dimension_numbers<[1], [0], [0], [1], [0, 0, 1, 1], [], []>} : vector<8x8xf32>, vector<8x32xf32>, vector<8x32xf32> -> vector<8x32xf32>
    %44 = vector.broadcast %42 : vector<8x1xf32> to vector<8x32xf32>
    %45 = arith.mulf %43, %44 : vector<8x32xf32>
    %c0_30 = arith.constant 0 : index
    %c32_31 = arith.constant 32 : index
    %46 = vector.load %arg13[%c0_30, %c32_31] : memref<8x128xf32, #tpu.memory_space<vmem>>, vector<8x32xf32>
    tpu.vector_store %arg13[%c0_30, %c32_31], %45 {strides = array<i32>} : memref<8x128xf32, #tpu.memory_space<vmem>>, vector<8x32xf32>,
    %c0_32 = arith.constant 0 : index
    %c64 = arith.constant 64 : index
    %47 = vector.load %arg11[%c0_32, %c64] : memref<8x128xf32, #tpu.memory_space<vmem>>, vector<8x32xf32>
    %cst_33 = arith.constant 0.176776692 : f32
    %48 = vector.broadcast %cst_33 : f32 to vector<8x32xf32>
    %49 = arith.mulf %47, %48 : vector<8x32xf32>
    %c0_34 = arith.constant 0 : index
    %c64_35 = arith.constant 64 : index
    %50 = vector.load %arg12[%c0_34, %c64_35] : memref<8x256xf32, #tpu.memory_space<vmem>>, vector<8x32xf32>
    %c0_36 = arith.constant 0 : index
    %c192 = arith.constant 192 : index
    %51 = vector.load %arg12[%c0_36, %c192] : memref<8x256xf32, #tpu.memory_space<vmem>>, vector<8x32xf32>
    %cst_37 = arith.constant dense<0.000000e+00> : vector<8x8xf32>
    %52 = tpu.matmul %49, %50, %cst_37 {dimension_numbers = #tpu.dot_dimension_numbers<[1], [1], [0], [0], [0, 0, 1, 0], [], []>} : vector<8x32xf32>, vector<8x32xf32>, vector<8x8xf32> -> vector<8x8xf32>
    %cst_38 = arith.constant dense<0xFF800000> : vector<8xf32>
    %53 = vector.multi_reduction <maximumf>, %52, %cst_38 [1] : vector<8x8xf32> to vector<8xf32>
    %54 = vector.shape_cast %53 : vector<8xf32> to vector<8x1xf32>
    %55 = vector.broadcast %54 : vector<8x1xf32> to vector<8x8xf32>
    %56 = arith.subf %52, %55 : vector<8x8xf32>
    %57 = math.exp %56 : vector<8x8xf32>
    %cst_39 = arith.constant dense<0.000000e+00> : vector<8xf32>
    %58 = vector.multi_reduction <add>, %57, %cst_39 [1] : vector<8x8xf32> to vector<8xf32>
    %59 = vector.shape_cast %58 : vector<8xf32> to vector<8x1xf32>
    %60 = tpu.reciprocal %59 {approx = true} : vector<8x1xf32> -> vector<8x1xf32>
    %cst_40 = arith.constant dense<0.000000e+00> : vector<8x32xf32>
    %61 = tpu.matmul %57, %51, %cst_40 {dimension_numbers = #tpu.dot_dimension_numbers<[1], [0], [0], [1], [0, 0, 1, 1], [], []>} : vector<8x8xf32>, vector<8x32xf32>, vector<8x32xf32> -> vector<8x32xf32>
    %62 = vector.broadcast %60 : vector<8x1xf32> to vector<8x32xf32>
    %63 = arith.mulf %61, %62 : vector<8x32xf32>
    %c0_41 = arith.constant 0 : index
    %c64_42 = arith.constant 64 : index
    %64 = vector.load %arg13[%c0_41, %c64_42] : memref<8x128xf32, #tpu.memory_space<vmem>>, vector<8x32xf32>
    tpu.vector_store %arg13[%c0_41, %c64_42], %63 {strides = array<i32>} : memref<8x128xf32, #tpu.memory_space<vmem>>, vector<8x32xf32>,
    %c0_43 = arith.constant 0 : index
    %c96 = arith.constant 96 : index
    %65 = vector.load %arg11[%c0_43, %c96] : memref<8x128xf32, #tpu.memory_space<vmem>>, vector<8x32xf32>
    %cst_44 = arith.constant 0.176776692 : f32
    %66 = vector.broadcast %cst_44 : f32 to vector<8x32xf32>
    %67 = arith.mulf %65, %66 : vector<8x32xf32>
    %c0_45 = arith.constant 0 : index
    %c96_46 = arith.constant 96 : index
    %68 = vector.load %arg12[%c0_45, %c96_46] : memref<8x256xf32, #tpu.memory_space<vmem>>, vector<8x32xf32>
    %c0_47 = arith.constant 0 : index
    %c224 = arith.constant 224 : index
    %69 = vector.load %arg12[%c0_47, %c224] : memref<8x256xf32, #tpu.memory_space<vmem>>, vector<8x32xf32>
    %cst_48 = arith.constant dense<0.000000e+00> : vector<8x8xf32>
    %70 = tpu.matmul %67, %68, %cst_48 {dimension_numbers = #tpu.dot_dimension_numbers<[1], [1], [0], [0], [0, 0, 1, 0], [], []>} : vector<8x32xf32>, vector<8x32xf32>, vector<8x8xf32> -> vector<8x8xf32>
    %cst_49 = arith.constant dense<0xFF800000> : vector<8xf32>
    %71 = vector.multi_reduction <maximumf>, %70, %cst_49 [1] : vector<8x8xf32> to vector<8xf32>
    %72 = vector.shape_cast %71 : vector<8xf32> to vector<8x1xf32>
    %73 = vector.broadcast %72 : vector<8x1xf32> to vector<8x8xf32>
    %74 = arith.subf %70, %73 : vector<8x8xf32>
    %75 = math.exp %74 : vector<8x8xf32>
    %cst_50 = arith.constant dense<0.000000e+00> : vector<8xf32>
    %76 = vector.multi_reduction <add>, %75, %cst_50 [1] : vector<8x8xf32> to vector<8xf32>
    %77 = vector.shape_cast %76 : vector<8xf32> to vector<8x1xf32>
    %78 = tpu.reciprocal %77 {approx = true} : vector<8x1xf32> -> vector<8x1xf32>
    %cst_51 = arith.constant dense<0.000000e+00> : vector<8x32xf32>
    %79 = tpu.matmul %75, %69, %cst_51 {dimension_numbers = #tpu.dot_dimension_numbers<[1], [0], [0], [1], [0, 0, 1, 1], [], []>} : vector<8x8xf32>, vector<8x32xf32>, vector<8x32xf32> -> vector<8x32xf32>
    %80 = vector.broadcast %78 : vector<8x1xf32> to vector<8x32xf32>
    %81 = arith.mulf %79, %80 : vector<8x32xf32>
    %c0_52 = arith.constant 0 : index
    %c96_53 = arith.constant 96 : index
    %82 = vector.load %arg13[%c0_52, %c96_53] : memref<8x128xf32, #tpu.memory_space<vmem>>, vector<8x32xf32>
    tpu.vector_store %arg13[%c0_52, %c96_53], %81 {strides = array<i32>} : memref<8x128xf32, #tpu.memory_space<vmem>>, vector<8x32xf32>,
    %c0_54 = arith.constant 0 : index
    %c0_55 = arith.constant 0 : index
    %83 = vector.load %arg13[%c0_54, %c0_55] : memref<8x128xf32, #tpu.memory_space<vmem>>, vector<8x128xf32>
    %c0_56 = arith.constant 0 : index
    %c0_57 = arith.constant 0 : index
    %84 = vector.load %arg6[%c0_56, %c0_57] : memref<128x128xf32, #tpu.memory_space<vmem>>, vector<128x128xf32>
    %cst_58 = arith.constant dense<0.000000e+00> : vector<8x128xf32>
    %85 = tpu.matmul %83, %84, %cst_58 {dimension_numbers = #tpu.dot_dimension_numbers<[1], [0], [0], [1], [0, 0, 1, 1], [], []>} : vector<8x128xf32>, vector<128x128xf32>, vector<8x128xf32> -> vector<8x128xf32>
    %c0_59 = arith.constant 0 : index
    %c0_60 = arith.constant 0 : index
    %86 = vector.load %arg7[%c0_59, %c0_60] : memref<1x128xf32, #tpu.memory_space<vmem>>, vector<1x128xf32>
    %87 = vector.broadcast %86 : vector<1x128xf32> to vector<8x128xf32>
    %88 = arith.addf %85, %87 : vector<8x128xf32>
    %89 = arith.addf %88, %4 : vector<8x128xf32>
    %c0_61 = arith.constant 0 : index
    %c0_62 = arith.constant 0 : index
    %90 = vector.load %arg8[%c0_61, %c0_62] : memref<1x128xf32, #tpu.memory_space<vmem>>, vector<1x128xf32>
    %c0_63 = arith.constant 0 : index
    %c0_64 = arith.constant 0 : index
    %91 = vector.load %arg9[%c0_63, %c0_64] : memref<1x128xf32, #tpu.memory_space<vmem>>, vector<1x128xf32>
    %cst_65 = arith.constant dense<0.000000e+00> : vector<8xf32>
    %92 = vector.multi_reduction <add>, %89, %cst_65 [1] : vector<8x128xf32> to vector<8xf32>
    %93 = vector.shape_cast %92 : vector<8xf32> to vector<8x1xf32>
    %cst_66 = arith.constant 1.280000e+02 : f32
    %94 = vector.broadcast %cst_66 : f32 to vector<8x1xf32>
    %95 = arith.divf %93, %94 : vector<8x1xf32>
    %96 = vector.broadcast %95 : vector<8x1xf32> to vector<8x128xf32>
    %97 = arith.subf %89, %96 : vector<8x128xf32>
    %98 = arith.mulf %97, %97 : vector<8x128xf32>
    %cst_67 = arith.constant dense<0.000000e+00> : vector<8xf32>
    %99 = vector.multi_reduction <add>, %98, %cst_67 [1] : vector<8x128xf32> to vector<8xf32>
    %100 = vector.shape_cast %99 : vector<8xf32> to vector<8x1xf32>
    %cst_68 = arith.constant 1.280000e+02 : f32
    %101 = vector.broadcast %cst_68 : f32 to vector<8x1xf32>
    %102 = arith.divf %100, %101 : vector<8x1xf32>
    %103 = vector.broadcast %95 : vector<8x1xf32> to vector<8x128xf32>
    %104 = arith.subf %89, %103 : vector<8x128xf32>
    %cst_69 = arith.constant 9.99999974E-6 : f32
    %105 = vector.broadcast %cst_69 : f32 to vector<8x1xf32>
    %106 = arith.addf %102, %105 : vector<8x1xf32>
    %107 = math.rsqrt %106 : vector<8x1xf32>
    %108 = vector.broadcast %107 : vector<8x1xf32> to vector<8x128xf32>
    %109 = arith.mulf %104, %108 : vector<8x128xf32>
    %110 = vector.broadcast %90 : vector<1x128xf32> to vector<8x128xf32>
    %111 = arith.mulf %109, %110 : vector<8x128xf32>
    %112 = vector.broadcast %91 : vector<1x128xf32> to vector<8x128xf32>
    %113 = arith.addf %111, %112 : vector<8x128xf32>
    %c0_70 = arith.constant 0 : index
    %c0_71 = arith.constant 0 : index
    %c0_72 = arith.constant 0 : index
    %114 = vector.load %arg10[%c0_70, %c0_71, %c0_72] : memref<1x8x128xf32, #tpu.memory_space<vmem>>, vector<1x8x128xf32>
    %115 = vector.shape_cast %114 : vector<1x8x128xf32> to vector<8x128xf32>
    %116 = vector.shape_cast %113 : vector<8x128xf32> to vector<1x8x128xf32>
    tpu.vector_store %arg10[%c0_70, %c0_71, %c0_72], %116 {strides = array<i32>} : memref<1x8x128xf32, #tpu.memory_space<vmem>>, vector<1x8x128xf32>,
    return
  }
  func.func @transform_0(%arg0: i32, %arg1: i32) -> (i32, i32, i32) {
    %c0_i32 = arith.constant 0 : i32
    %c0_i32_0 = arith.constant 0 : i32
    return %arg0, %arg1, %c0_i32 : i32, i32, i32
  }
  func.func @transform_1(%arg0: i32, %arg1: i32) -> (i32, i32, i32) {
    %c0_i32 = arith.constant 0 : i32
    %c0_i32_0 = arith.constant 0 : i32
    %c0_i32_1 = arith.constant 0 : i32
    return %arg0, %c0_i32, %c0_i32_0 : i32, i32, i32
  }
  func.func @transform_2(%arg0: i32, %arg1: i32) -> (i32, i32) {
    %c0_i32 = arith.constant 0 : i32
    %c0_i32_0 = arith.constant 0 : i32
    %c0_i32_1 = arith.constant 0 : i32
    return %c0_i32, %c0_i32_0 : i32, i32
  }
  func.func @transform_3(%arg0: i32, %arg1: i32) -> (i32, i32) {
    %c0_i32 = arith.constant 0 : i32
    %c0_i32_0 = arith.constant 0 : i32
    %c0_i32_1 = arith.constant 0 : i32
    return %c0_i32, %c0_i32_0 : i32, i32
  }
  func.func @transform_4(%arg0: i32, %arg1: i32) -> (i32, i32) {
    %c0_i32 = arith.constant 0 : i32
    %c0_i32_0 = arith.constant 0 : i32
    %c0_i32_1 = arith.constant 0 : i32
    return %c0_i32, %c0_i32_0 : i32, i32
  }
  func.func @transform_5(%arg0: i32, %arg1: i32) -> (i32, i32) {
    %c0_i32 = arith.constant 0 : i32
    %c0_i32_0 = arith.constant 0 : i32
    %c0_i32_1 = arith.constant 0 : i32
    return %c0_i32, %c0_i32_0 : i32, i32
  }
  func.func @transform_6(%arg0: i32, %arg1: i32) -> (i32, i32) {
    %c0_i32 = arith.constant 0 : i32
    %c0_i32_0 = arith.constant 0 : i32
    %c0_i32_1 = arith.constant 0 : i32
    return %c0_i32, %c0_i32_0 : i32, i32
  }
  func.func @transform_7(%arg0: i32, %arg1: i32) -> (i32, i32) {
    %c0_i32 = arith.constant 0 : i32
    %c0_i32_0 = arith.constant 0 : i32
    %c0_i32_1 = arith.constant 0 : i32
    return %c0_i32, %c0_i32_0 : i32, i32
  }
  func.func @transform_8(%arg0: i32, %arg1: i32) -> (i32, i32, i32) {
    %c0_i32 = arith.constant 0 : i32
    %c0_i32_0 = arith.constant 0 : i32
    return %arg0, %arg1, %c0_i32 : i32, i32, i32
  }
}

module attributes {stable_mosaic.version = 11 : i64} {
  func.func @_linear_kernel(%arg0: i32, %arg1: memref<32x128xf32, #tpu.memory_space<vmem>>, %arg2: memref<128x256xf32, #tpu.memory_space<vmem>>, %arg3: memref<1x256xf32, #tpu.memory_space<vmem>>, %arg4: memref<32x256xf32, #tpu.memory_space<vmem>>) attributes {dimension_semantics = [#tpu.dimension_semantics<parallel>], iteration_bounds = array<i64: 1>, scalar_prefetch = 0 : i64, scratch_operands = 0 : i64, tpu.core_type = #tpu.core_type<tc>, window_params = [{transform_indices = @transform_0, window_bounds = array<i64: 32, 128>}, {pipeline_mode = #tpu.pipeline_mode<synchronous>, transform_indices = @transform_1, window_bounds = array<i64: 128, 256>}, {pipeline_mode = #tpu.pipeline_mode<synchronous>, transform_indices = @transform_2, window_bounds = array<i64: 1, 256>}, {transform_indices = @transform_3, window_bounds = array<i64: 32, 256>}]} {
    %c0 = arith.constant 0 : index
    %c0_0 = arith.constant 0 : index
    %0 = vector.load %arg1[%c0, %c0_0] : memref<32x128xf32, #tpu.memory_space<vmem>>, vector<32x128xf32>
    %c0_1 = arith.constant 0 : index
    %c0_2 = arith.constant 0 : index
    %1 = vector.load %arg2[%c0_1, %c0_2] : memref<128x256xf32, #tpu.memory_space<vmem>>, vector<128x256xf32>
    %cst = arith.constant dense<0.000000e+00> : vector<32x256xf32>
    %2 = tpu.matmul %0, %1, %cst {dimension_numbers = #tpu.dot_dimension_numbers<[1], [0], [0], [1], [0, 0, 1, 1], [], []>} : vector<32x128xf32>, vector<128x256xf32>, vector<32x256xf32> -> vector<32x256xf32>
    %c0_3 = arith.constant 0 : index
    %c0_4 = arith.constant 0 : index
    %3 = vector.load %arg3[%c0_3, %c0_4] : memref<1x256xf32, #tpu.memory_space<vmem>>, vector<1x256xf32>
    %4 = vector.broadcast %3 : vector<1x256xf32> to vector<32x256xf32>
    %5 = arith.addf %2, %4 : vector<32x256xf32>
    %c0_5 = arith.constant 0 : index
    %c0_6 = arith.constant 0 : index
    %6 = vector.load %arg4[%c0_5, %c0_6] : memref<32x256xf32, #tpu.memory_space<vmem>>, vector<32x256xf32>
    tpu.vector_store %arg4[%c0_5, %c0_6], %5 {strides = array<i32>} : memref<32x256xf32, #tpu.memory_space<vmem>>, vector<32x256xf32>,
    return
  }
  func.func @transform_0(%arg0: i32) -> (i32, i32) {
    %c0_i32 = arith.constant 0 : i32
    %c0_i32_0 = arith.constant 0 : i32
    return %arg0, %c0_i32 : i32, i32
  }
  func.func @transform_1(%arg0: i32) -> (i32, i32) {
    %c0_i32 = arith.constant 0 : i32
    %c0_i32_0 = arith.constant 0 : i32
    %c0_i32_1 = arith.constant 0 : i32
    return %c0_i32, %c0_i32_0 : i32, i32
  }
  func.func @transform_2(%arg0: i32) -> (i32, i32) {
    %c0_i32 = arith.constant 0 : i32
    %c0_i32_0 = arith.constant 0 : i32
    %c0_i32_1 = arith.constant 0 : i32
    return %c0_i32, %c0_i32_0 : i32, i32
  }
  func.func @transform_3(%arg0: i32) -> (i32, i32) {
    %c0_i32 = arith.constant 0 : i32
    %c0_i32_0 = arith.constant 0 : i32
    return %arg0, %c0_i32 : i32, i32
  }
}

module attributes {stable_mosaic.version = 11 : i64} {
  func.func @_ffn_add_ln_kernel(%arg0: i32, %arg1: i32, %arg2: memref<16x128xf32, #tpu.memory_space<vmem>>, %arg3: memref<128x512xf32, #tpu.memory_space<vmem>>, %arg4: memref<1x512xf32, #tpu.memory_space<vmem>>, %arg5: memref<512x128xf32, #tpu.memory_space<vmem>>, %arg6: memref<1x128xf32, #tpu.memory_space<vmem>>, %arg7: memref<1x128xf32, #tpu.memory_space<vmem>>, %arg8: memref<1x128xf32, #tpu.memory_space<vmem>>, %arg9: memref<16x128xf32, #tpu.memory_space<vmem>>, %arg10: memref<16x128xf32, #tpu.memory_space<vmem>>) attributes {dimension_semantics = [#tpu.dimension_semantics<parallel>, #tpu.dimension_semantics<arbitrary>], iteration_bounds = array<i64: 1, 2>, scalar_prefetch = 0 : i64, scratch_operands = 1 : i64, tpu.core_type = #tpu.core_type<tc>, window_params = [{transform_indices = @transform_0, window_bounds = array<i64: 16, 128>}, {transform_indices = @transform_1, window_bounds = array<i64: 128, 512>}, {transform_indices = @transform_2, window_bounds = array<i64: 1, 512>}, {transform_indices = @transform_3, window_bounds = array<i64: 512, 128>}, {pipeline_mode = #tpu.pipeline_mode<synchronous>, transform_indices = @transform_4, window_bounds = array<i64: 1, 128>}, {pipeline_mode = #tpu.pipeline_mode<synchronous>, transform_indices = @transform_5, window_bounds = array<i64: 1, 128>}, {pipeline_mode = #tpu.pipeline_mode<synchronous>, transform_indices = @transform_6, window_bounds = array<i64: 1, 128>}, {transform_indices = @transform_7, window_bounds = array<i64: 16, 128>}]} {
    %c0_i32 = arith.constant 0 : i32
    %0 = arith.cmpi eq, %arg1, %c0_i32 : i32
    %1 = arith.extui %0 : i1 to i32
    %c0_i32_0 = arith.constant 0 : i32
    %2 = arith.cmpi ne, %1, %c0_i32_0 : i32
    scf.if %2 {
      %cst_15 = arith.constant 0.000000e+00 : f32
      %19 = vector.broadcast %cst_15 : f32 to vector<16x128xf32>
      %c0_16 = arith.constant 0 : index
      %c0_17 = arith.constant 0 : index
      %20 = vector.load %arg10[%c0_16, %c0_17] : memref<16x128xf32, #tpu.memory_space<vmem>>, vector<16x128xf32>
      tpu.vector_store %arg10[%c0_16, %c0_17], %19 {strides = array<i32>} : memref<16x128xf32, #tpu.memory_space<vmem>>, vector<16x128xf32>,
    } else {
    }
    %c0 = arith.constant 0 : index
    %c0_1 = arith.constant 0 : index
    %3 = vector.load %arg2[%c0, %c0_1] : memref<16x128xf32, #tpu.memory_space<vmem>>, vector<16x128xf32>
    %c0_2 = arith.constant 0 : index
    %c0_3 = arith.constant 0 : index
    %4 = vector.load %arg3[%c0_2, %c0_3] : memref<128x512xf32, #tpu.memory_space<vmem>>, vector<128x512xf32>
    %cst = arith.constant dense<0.000000e+00> : vector<16x512xf32>
    %5 = tpu.matmul %3, %4, %cst {dimension_numbers = #tpu.dot_dimension_numbers<[1], [0], [0], [1], [0, 0, 1, 1], [], []>} : vector<16x128xf32>, vector<128x512xf32>, vector<16x512xf32> -> vector<16x512xf32>
    %c0_4 = arith.constant 0 : index
    %c0_5 = arith.constant 0 : index
    %6 = vector.load %arg4[%c0_4, %c0_5] : memref<1x512xf32, #tpu.memory_space<vmem>>, vector<1x512xf32>
    %7 = vector.broadcast %6 : vector<1x512xf32> to vector<16x512xf32>
    %8 = arith.addf %5, %7 : vector<16x512xf32>
    %cst_6 = arith.constant 0.000000e+00 : f32
    %9 = vector.broadcast %cst_6 : f32 to vector<16x512xf32>
    %10 = arith.maximumf %8, %9 : vector<16x512xf32>
    %c0_7 = arith.constant 0 : index
    %c0_8 = arith.constant 0 : index
    %11 = vector.load %arg10[%c0_7, %c0_8] : memref<16x128xf32, #tpu.memory_space<vmem>>, vector<16x128xf32>
    %c0_9 = arith.constant 0 : index
    %c0_10 = arith.constant 0 : index
    %12 = vector.load %arg5[%c0_9, %c0_10] : memref<512x128xf32, #tpu.memory_space<vmem>>, vector<512x128xf32>
    %cst_11 = arith.constant dense<0.000000e+00> : vector<16x128xf32>
    %13 = tpu.matmul %10, %12, %cst_11 {dimension_numbers = #tpu.dot_dimension_numbers<[1], [0], [0], [1], [0, 0, 1, 1], [], []>} : vector<16x512xf32>, vector<512x128xf32>, vector<16x128xf32> -> vector<16x128xf32>
    %14 = arith.addf %11, %13 : vector<16x128xf32>
    %c0_12 = arith.constant 0 : index
    %c0_13 = arith.constant 0 : index
    %15 = vector.load %arg10[%c0_12, %c0_13] : memref<16x128xf32, #tpu.memory_space<vmem>>, vector<16x128xf32>
    tpu.vector_store %arg10[%c0_12, %c0_13], %14 {strides = array<i32>} : memref<16x128xf32, #tpu.memory_space<vmem>>, vector<16x128xf32>,
    %c1_i32 = arith.constant 1 : i32
    %16 = arith.cmpi eq, %arg1, %c1_i32 : i32
    %17 = arith.extui %16 : i1 to i32
    %c0_i32_14 = arith.constant 0 : i32
    %18 = arith.cmpi ne, %17, %c0_i32_14 : i32
    scf.if %18 {
      %c0_15 = arith.constant 0 : index
      %c0_16 = arith.constant 0 : index
      %19 = vector.load %arg10[%c0_15, %c0_16] : memref<16x128xf32, #tpu.memory_space<vmem>>, vector<16x128xf32>
      %c0_17 = arith.constant 0 : index
      %c0_18 = arith.constant 0 : index
      %20 = vector.load %arg6[%c0_17, %c0_18] : memref<1x128xf32, #tpu.memory_space<vmem>>, vector<1x128xf32>
      %21 = vector.broadcast %20 : vector<1x128xf32> to vector<16x128xf32>
      %22 = arith.addf %19, %21 : vector<16x128xf32>
      %23 = arith.addf %22, %3 : vector<16x128xf32>
      %c0_19 = arith.constant 0 : index
      %c0_20 = arith.constant 0 : index
      %24 = vector.load %arg7[%c0_19, %c0_20] : memref<1x128xf32, #tpu.memory_space<vmem>>, vector<1x128xf32>
      %c0_21 = arith.constant 0 : index
      %c0_22 = arith.constant 0 : index
      %25 = vector.load %arg8[%c0_21, %c0_22] : memref<1x128xf32, #tpu.memory_space<vmem>>, vector<1x128xf32>
      %cst_23 = arith.constant dense<0.000000e+00> : vector<16xf32>
      %26 = vector.multi_reduction <add>, %23, %cst_23 [1] : vector<16x128xf32> to vector<16xf32>
      %27 = vector.shape_cast %26 : vector<16xf32> to vector<16x1xf32>
      %cst_24 = arith.constant 1.280000e+02 : f32
      %28 = vector.broadcast %cst_24 : f32 to vector<16x1xf32>
      %29 = arith.divf %27, %28 : vector<16x1xf32>
      %30 = vector.broadcast %29 : vector<16x1xf32> to vector<16x128xf32>
      %31 = arith.subf %23, %30 : vector<16x128xf32>
      %32 = arith.mulf %31, %31 : vector<16x128xf32>
      %cst_25 = arith.constant dense<0.000000e+00> : vector<16xf32>
      %33 = vector.multi_reduction <add>, %32, %cst_25 [1] : vector<16x128xf32> to vector<16xf32>
      %34 = vector.shape_cast %33 : vector<16xf32> to vector<16x1xf32>
      %cst_26 = arith.constant 1.280000e+02 : f32
      %35 = vector.broadcast %cst_26 : f32 to vector<16x1xf32>
      %36 = arith.divf %34, %35 : vector<16x1xf32>
      %37 = vector.broadcast %29 : vector<16x1xf32> to vector<16x128xf32>
      %38 = arith.subf %23, %37 : vector<16x128xf32>
      %cst_27 = arith.constant 9.99999974E-6 : f32
      %39 = vector.broadcast %cst_27 : f32 to vector<16x1xf32>
      %40 = arith.addf %36, %39 : vector<16x1xf32>
      %41 = math.rsqrt %40 : vector<16x1xf32>
      %42 = vector.broadcast %41 : vector<16x1xf32> to vector<16x128xf32>
      %43 = arith.mulf %38, %42 : vector<16x128xf32>
      %44 = vector.broadcast %24 : vector<1x128xf32> to vector<16x128xf32>
      %45 = arith.mulf %43, %44 : vector<16x128xf32>
      %46 = vector.broadcast %25 : vector<1x128xf32> to vector<16x128xf32>
      %47 = arith.addf %45, %46 : vector<16x128xf32>
      %c0_28 = arith.constant 0 : index
      %c0_29 = arith.constant 0 : index
      %48 = vector.load %arg9[%c0_28, %c0_29] : memref<16x128xf32, #tpu.memory_space<vmem>>, vector<16x128xf32>
      tpu.vector_store %arg9[%c0_28, %c0_29], %47 {strides = array<i32>} : memref<16x128xf32, #tpu.memory_space<vmem>>, vector<16x128xf32>,
    } else {
    }
    return
  }
  func.func @transform_0(%arg0: i32, %arg1: i32) -> (i32, i32) {
    %c0_i32 = arith.constant 0 : i32
    %c0_i32_0 = arith.constant 0 : i32
    return %arg0, %c0_i32 : i32, i32
  }
  func.func @transform_1(%arg0: i32, %arg1: i32) -> (i32, i32) {
    %c0_i32 = arith.constant 0 : i32
    %c0_i32_0 = arith.constant 0 : i32
    return %c0_i32, %arg1 : i32, i32
  }
  func.func @transform_2(%arg0: i32, %arg1: i32) -> (i32, i32) {
    %c0_i32 = arith.constant 0 : i32
    %c0_i32_0 = arith.constant 0 : i32
    return %c0_i32, %arg1 : i32, i32
  }
  func.func @transform_3(%arg0: i32, %arg1: i32) -> (i32, i32) {
    %c0_i32 = arith.constant 0 : i32
    %c0_i32_0 = arith.constant 0 : i32
    return %arg1, %c0_i32 : i32, i32
  }
  func.func @transform_4(%arg0: i32, %arg1: i32) -> (i32, i32) {
    %c0_i32 = arith.constant 0 : i32
    %c0_i32_0 = arith.constant 0 : i32
    %c0_i32_1 = arith.constant 0 : i32
    return %c0_i32, %c0_i32_0 : i32, i32
  }
  func.func @transform_5(%arg0: i32, %arg1: i32) -> (i32, i32) {
    %c0_i32 = arith.constant 0 : i32
    %c0_i32_0 = arith.constant 0 : i32
    %c0_i32_1 = arith.constant 0 : i32
    return %c0_i32, %c0_i32_0 : i32, i32
  }
  func.func @transform_6(%arg0: i32, %arg1: i32) -> (i32, i32) {
    %c0_i32 = arith.constant 0 : i32
    %c0_i32_0 = arith.constant 0 : i32
    %c0_i32_1 = arith.constant 0 : i32
    return %c0_i32, %c0_i32_0 : i32, i32
  }
  func.func @transform_7(%arg0: i32, %arg1: i32) -> (i32, i32) {
    %c0_i32 = arith.constant 0 : i32
    %c0_i32_0 = arith.constant 0 : i32
    return %arg0, %c0_i32 : i32, i32
  }
}

module attributes {stable_mosaic.version = 11 : i64} {
  func.func @_cross_mha_kernel(%arg0: i32, %arg1: i32, %arg2: memref<1x8x128xf32, #tpu.memory_space<vmem>>, %arg3: memref<1x16x256xf32, #tpu.memory_space<vmem>>, %arg4: memref<128x128xf32, #tpu.memory_space<vmem>>, %arg5: memref<1x128xf32, #tpu.memory_space<vmem>>, %arg6: memref<128x128xf32, #tpu.memory_space<vmem>>, %arg7: memref<1x128xf32, #tpu.memory_space<vmem>>, %arg8: memref<1x128xf32, #tpu.memory_space<vmem>>, %arg9: memref<1x128xf32, #tpu.memory_space<vmem>>, %arg10: memref<1x8x128xf32, #tpu.memory_space<vmem>>, %arg11: memref<8x128xf32, #tpu.memory_space<vmem>>, %arg12: memref<8x128xf32, #tpu.memory_space<vmem>>) attributes {dimension_semantics = [#tpu.dimension_semantics<parallel>, #tpu.dimension_semantics<parallel>], iteration_bounds = array<i64: 2, 1>, scalar_prefetch = 0 : i64, scratch_operands = 2 : i64, tpu.core_type = #tpu.core_type<tc>, window_params = [{transform_indices = @transform_0, window_bounds = array<i64: 1, 8, 128>}, {transform_indices = @transform_1, window_bounds = array<i64: 1, 16, 256>}, {pipeline_mode = #tpu.pipeline_mode<synchronous>, transform_indices = @transform_2, window_bounds = array<i64: 128, 128>}, {pipeline_mode = #tpu.pipeline_mode<synchronous>, transform_indices = @transform_3, window_bounds = array<i64: 1, 128>}, {pipeline_mode = #tpu.pipeline_mode<synchronous>, transform_indices = @transform_4, window_bounds = array<i64: 128, 128>}, {pipeline_mode = #tpu.pipeline_mode<synchronous>, transform_indices = @transform_5, window_bounds = array<i64: 1, 128>}, {pipeline_mode = #tpu.pipeline_mode<synchronous>, transform_indices = @transform_6, window_bounds = array<i64: 1, 128>}, {pipeline_mode = #tpu.pipeline_mode<synchronous>, transform_indices = @transform_7, window_bounds = array<i64: 1, 128>}, {transform_indices = @transform_8, window_bounds = array<i64: 1, 8, 128>}]} {
    %c0 = arith.constant 0 : index
    %c0_0 = arith.constant 0 : index
    %c0_1 = arith.constant 0 : index
    %0 = vector.load %arg2[%c0, %c0_0, %c0_1] : memref<1x8x128xf32, #tpu.memory_space<vmem>>, vector<1x8x128xf32>
    %1 = vector.shape_cast %0 : vector<1x8x128xf32> to vector<8x128xf32>
    %c0_2 = arith.constant 0 : index
    %c0_3 = arith.constant 0 : index
    %2 = vector.load %arg4[%c0_2, %c0_3] : memref<128x128xf32, #tpu.memory_space<vmem>>, vector<128x128xf32>
    %cst = arith.constant dense<0.000000e+00> : vector<8x128xf32>
    %3 = tpu.matmul %1, %2, %cst {dimension_numbers = #tpu.dot_dimension_numbers<[1], [0], [0], [1], [0, 0, 1, 1], [], []>} : vector<8x128xf32>, vector<128x128xf32>, vector<8x128xf32> -> vector<8x128xf32>
    %c0_4 = arith.constant 0 : index
    %c0_5 = arith.constant 0 : index
    %4 = vector.load %arg5[%c0_4, %c0_5] : memref<1x128xf32, #tpu.memory_space<vmem>>, vector<1x128xf32>
    %5 = vector.broadcast %4 : vector<1x128xf32> to vector<8x128xf32>
    %6 = arith.addf %3, %5 : vector<8x128xf32>
    %c0_6 = arith.constant 0 : index
    %c0_7 = arith.constant 0 : index
    %7 = vector.load %arg11[%c0_6, %c0_7] : memref<8x128xf32, #tpu.memory_space<vmem>>, vector<8x128xf32>
    tpu.vector_store %arg11[%c0_6, %c0_7], %6 {strides = array<i32>} : memref<8x128xf32, #tpu.memory_space<vmem>>, vector<8x128xf32>,
    %c0_8 = arith.constant 0 : index
    %c0_9 = arith.constant 0 : index
    %8 = vector.load %arg11[%c0_8, %c0_9] : memref<8x128xf32, #tpu.memory_space<vmem>>, vector<8x32xf32>
    %cst_10 = arith.constant 0.176776692 : f32
    %9 = vector.broadcast %cst_10 : f32 to vector<8x32xf32>
    %10 = arith.mulf %8, %9 : vector<8x32xf32>
    %c0_11 = arith.constant 0 : index
    %c0_12 = arith.constant 0 : index
    %c0_13 = arith.constant 0 : index
    %11 = vector.load %arg3[%c0_11, %c0_12, %c0_13] : memref<1x16x256xf32, #tpu.memory_space<vmem>>, vector<1x16x32xf32>
    %12 = vector.shape_cast %11 : vector<1x16x32xf32> to vector<16x32xf32>
    %c0_14 = arith.constant 0 : index
    %c0_15 = arith.constant 0 : index
    %c128 = arith.constant 128 : index
    %13 = vector.load %arg3[%c0_14, %c0_15, %c128] : memref<1x16x256xf32, #tpu.memory_space<vmem>>, vector<1x16x32xf32>
    %14 = vector.shape_cast %13 : vector<1x16x32xf32> to vector<16x32xf32>
    %cst_16 = arith.constant dense<0.000000e+00> : vector<8x16xf32>
    %15 = tpu.matmul %10, %12, %cst_16 {dimension_numbers = #tpu.dot_dimension_numbers<[1], [1], [0], [0], [0, 0, 1, 0], [], []>} : vector<8x32xf32>, vector<16x32xf32>, vector<8x16xf32> -> vector<8x16xf32>
    %cst_17 = arith.constant dense<0xFF800000> : vector<8xf32>
    %16 = vector.multi_reduction <maximumf>, %15, %cst_17 [1] : vector<8x16xf32> to vector<8xf32>
    %17 = vector.shape_cast %16 : vector<8xf32> to vector<8x1xf32>
    %18 = vector.broadcast %17 : vector<8x1xf32> to vector<8x16xf32>
    %19 = arith.subf %15, %18 : vector<8x16xf32>
    %20 = math.exp %19 : vector<8x16xf32>
    %cst_18 = arith.constant dense<0.000000e+00> : vector<8xf32>
    %21 = vector.multi_reduction <add>, %20, %cst_18 [1] : vector<8x16xf32> to vector<8xf32>
    %22 = vector.shape_cast %21 : vector<8xf32> to vector<8x1xf32>
    %23 = tpu.reciprocal %22 {approx = true} : vector<8x1xf32> -> vector<8x1xf32>
    %cst_19 = arith.constant dense<0.000000e+00> : vector<8x32xf32>
    %24 = tpu.matmul %20, %14, %cst_19 {dimension_numbers = #tpu.dot_dimension_numbers<[1], [0], [0], [1], [0, 0, 1, 1], [], []>} : vector<8x16xf32>, vector<16x32xf32>, vector<8x32xf32> -> vector<8x32xf32>
    %25 = vector.broadcast %23 : vector<8x1xf32> to vector<8x32xf32>
    %26 = arith.mulf %24, %25 : vector<8x32xf32>
    %c0_20 = arith.constant 0 : index
    %c0_21 = arith.constant 0 : index
    %27 = vector.load %arg12[%c0_20, %c0_21] : memref<8x128xf32, #tpu.memory_space<vmem>>, vector<8x32xf32>
    tpu.vector_store %arg12[%c0_20, %c0_21], %26 {strides = array<i32>} : memref<8x128xf32, #tpu.memory_space<vmem>>, vector<8x32xf32>,
    %c0_22 = arith.constant 0 : index
    %c32 = arith.constant 32 : index
    %28 = vector.load %arg11[%c0_22, %c32] : memref<8x128xf32, #tpu.memory_space<vmem>>, vector<8x32xf32>
    %cst_23 = arith.constant 0.176776692 : f32
    %29 = vector.broadcast %cst_23 : f32 to vector<8x32xf32>
    %30 = arith.mulf %28, %29 : vector<8x32xf32>
    %c0_24 = arith.constant 0 : index
    %c0_25 = arith.constant 0 : index
    %c32_26 = arith.constant 32 : index
    %31 = vector.load %arg3[%c0_24, %c0_25, %c32_26] : memref<1x16x256xf32, #tpu.memory_space<vmem>>, vector<1x16x32xf32>
    %32 = vector.shape_cast %31 : vector<1x16x32xf32> to vector<16x32xf32>
    %c0_27 = arith.constant 0 : index
    %c0_28 = arith.constant 0 : index
    %c160 = arith.constant 160 : index
    %33 = vector.load %arg3[%c0_27, %c0_28, %c160] : memref<1x16x256xf32, #tpu.memory_space<vmem>>, vector<1x16x32xf32>
    %34 = vector.shape_cast %33 : vector<1x16x32xf32> to vector<16x32xf32>
    %cst_29 = arith.constant dense<0.000000e+00> : vector<8x16xf32>
    %35 = tpu.matmul %30, %32, %cst_29 {dimension_numbers = #tpu.dot_dimension_numbers<[1], [1], [0], [0], [0, 0, 1, 0], [], []>} : vector<8x32xf32>, vector<16x32xf32>, vector<8x16xf32> -> vector<8x16xf32>
    %cst_30 = arith.constant dense<0xFF800000> : vector<8xf32>
    %36 = vector.multi_reduction <maximumf>, %35, %cst_30 [1] : vector<8x16xf32> to vector<8xf32>
    %37 = vector.shape_cast %36 : vector<8xf32> to vector<8x1xf32>
    %38 = vector.broadcast %37 : vector<8x1xf32> to vector<8x16xf32>
    %39 = arith.subf %35, %38 : vector<8x16xf32>
    %40 = math.exp %39 : vector<8x16xf32>
    %cst_31 = arith.constant dense<0.000000e+00> : vector<8xf32>
    %41 = vector.multi_reduction <add>, %40, %cst_31 [1] : vector<8x16xf32> to vector<8xf32>
    %42 = vector.shape_cast %41 : vector<8xf32> to vector<8x1xf32>
    %43 = tpu.reciprocal %42 {approx = true} : vector<8x1xf32> -> vector<8x1xf32>
    %cst_32 = arith.constant dense<0.000000e+00> : vector<8x32xf32>
    %44 = tpu.matmul %40, %34, %cst_32 {dimension_numbers = #tpu.dot_dimension_numbers<[1], [0], [0], [1], [0, 0, 1, 1], [], []>} : vector<8x16xf32>, vector<16x32xf32>, vector<8x32xf32> -> vector<8x32xf32>
    %45 = vector.broadcast %43 : vector<8x1xf32> to vector<8x32xf32>
    %46 = arith.mulf %44, %45 : vector<8x32xf32>
    %c0_33 = arith.constant 0 : index
    %c32_34 = arith.constant 32 : index
    %47 = vector.load %arg12[%c0_33, %c32_34] : memref<8x128xf32, #tpu.memory_space<vmem>>, vector<8x32xf32>
    tpu.vector_store %arg12[%c0_33, %c32_34], %46 {strides = array<i32>} : memref<8x128xf32, #tpu.memory_space<vmem>>, vector<8x32xf32>,
    %c0_35 = arith.constant 0 : index
    %c64 = arith.constant 64 : index
    %48 = vector.load %arg11[%c0_35, %c64] : memref<8x128xf32, #tpu.memory_space<vmem>>, vector<8x32xf32>
    %cst_36 = arith.constant 0.176776692 : f32
    %49 = vector.broadcast %cst_36 : f32 to vector<8x32xf32>
    %50 = arith.mulf %48, %49 : vector<8x32xf32>
    %c0_37 = arith.constant 0 : index
    %c0_38 = arith.constant 0 : index
    %c64_39 = arith.constant 64 : index
    %51 = vector.load %arg3[%c0_37, %c0_38, %c64_39] : memref<1x16x256xf32, #tpu.memory_space<vmem>>, vector<1x16x32xf32>
    %52 = vector.shape_cast %51 : vector<1x16x32xf32> to vector<16x32xf32>
    %c0_40 = arith.constant 0 : index
    %c0_41 = arith.constant 0 : index
    %c192 = arith.constant 192 : index
    %53 = vector.load %arg3[%c0_40, %c0_41, %c192] : memref<1x16x256xf32, #tpu.memory_space<vmem>>, vector<1x16x32xf32>
    %54 = vector.shape_cast %53 : vector<1x16x32xf32> to vector<16x32xf32>
    %cst_42 = arith.constant dense<0.000000e+00> : vector<8x16xf32>
    %55 = tpu.matmul %50, %52, %cst_42 {dimension_numbers = #tpu.dot_dimension_numbers<[1], [1], [0], [0], [0, 0, 1, 0], [], []>} : vector<8x32xf32>, vector<16x32xf32>, vector<8x16xf32> -> vector<8x16xf32>
    %cst_43 = arith.constant dense<0xFF800000> : vector<8xf32>
    %56 = vector.multi_reduction <maximumf>, %55, %cst_43 [1] : vector<8x16xf32> to vector<8xf32>
    %57 = vector.shape_cast %56 : vector<8xf32> to vector<8x1xf32>
    %58 = vector.broadcast %57 : vector<8x1xf32> to vector<8x16xf32>
    %59 = arith.subf %55, %58 : vector<8x16xf32>
    %60 = math.exp %59 : vector<8x16xf32>
    %cst_44 = arith.constant dense<0.000000e+00> : vector<8xf32>
    %61 = vector.multi_reduction <add>, %60, %cst_44 [1] : vector<8x16xf32> to vector<8xf32>
    %62 = vector.shape_cast %61 : vector<8xf32> to vector<8x1xf32>
    %63 = tpu.reciprocal %62 {approx = true} : vector<8x1xf32> -> vector<8x1xf32>
    %cst_45 = arith.constant dense<0.000000e+00> : vector<8x32xf32>
    %64 = tpu.matmul %60, %54, %cst_45 {dimension_numbers = #tpu.dot_dimension_numbers<[1], [0], [0], [1], [0, 0, 1, 1], [], []>} : vector<8x16xf32>, vector<16x32xf32>, vector<8x32xf32> -> vector<8x32xf32>
    %65 = vector.broadcast %63 : vector<8x1xf32> to vector<8x32xf32>
    %66 = arith.mulf %64, %65 : vector<8x32xf32>
    %c0_46 = arith.constant 0 : index
    %c64_47 = arith.constant 64 : index
    %67 = vector.load %arg12[%c0_46, %c64_47] : memref<8x128xf32, #tpu.memory_space<vmem>>, vector<8x32xf32>
    tpu.vector_store %arg12[%c0_46, %c64_47], %66 {strides = array<i32>} : memref<8x128xf32, #tpu.memory_space<vmem>>, vector<8x32xf32>,
    %c0_48 = arith.constant 0 : index
    %c96 = arith.constant 96 : index
    %68 = vector.load %arg11[%c0_48, %c96] : memref<8x128xf32, #tpu.memory_space<vmem>>, vector<8x32xf32>
    %cst_49 = arith.constant 0.176776692 : f32
    %69 = vector.broadcast %cst_49 : f32 to vector<8x32xf32>
    %70 = arith.mulf %68, %69 : vector<8x32xf32>
    %c0_50 = arith.constant 0 : index
    %c0_51 = arith.constant 0 : index
    %c96_52 = arith.constant 96 : index
    %71 = vector.load %arg3[%c0_50, %c0_51, %c96_52] : memref<1x16x256xf32, #tpu.memory_space<vmem>>, vector<1x16x32xf32>
    %72 = vector.shape_cast %71 : vector<1x16x32xf32> to vector<16x32xf32>
    %c0_53 = arith.constant 0 : index
    %c0_54 = arith.constant 0 : index
    %c224 = arith.constant 224 : index
    %73 = vector.load %arg3[%c0_53, %c0_54, %c224] : memref<1x16x256xf32, #tpu.memory_space<vmem>>, vector<1x16x32xf32>
    %74 = vector.shape_cast %73 : vector<1x16x32xf32> to vector<16x32xf32>
    %cst_55 = arith.constant dense<0.000000e+00> : vector<8x16xf32>
    %75 = tpu.matmul %70, %72, %cst_55 {dimension_numbers = #tpu.dot_dimension_numbers<[1], [1], [0], [0], [0, 0, 1, 0], [], []>} : vector<8x32xf32>, vector<16x32xf32>, vector<8x16xf32> -> vector<8x16xf32>
    %cst_56 = arith.constant dense<0xFF800000> : vector<8xf32>
    %76 = vector.multi_reduction <maximumf>, %75, %cst_56 [1] : vector<8x16xf32> to vector<8xf32>
    %77 = vector.shape_cast %76 : vector<8xf32> to vector<8x1xf32>
    %78 = vector.broadcast %77 : vector<8x1xf32> to vector<8x16xf32>
    %79 = arith.subf %75, %78 : vector<8x16xf32>
    %80 = math.exp %79 : vector<8x16xf32>
    %cst_57 = arith.constant dense<0.000000e+00> : vector<8xf32>
    %81 = vector.multi_reduction <add>, %80, %cst_57 [1] : vector<8x16xf32> to vector<8xf32>
    %82 = vector.shape_cast %81 : vector<8xf32> to vector<8x1xf32>
    %83 = tpu.reciprocal %82 {approx = true} : vector<8x1xf32> -> vector<8x1xf32>
    %cst_58 = arith.constant dense<0.000000e+00> : vector<8x32xf32>
    %84 = tpu.matmul %80, %74, %cst_58 {dimension_numbers = #tpu.dot_dimension_numbers<[1], [0], [0], [1], [0, 0, 1, 1], [], []>} : vector<8x16xf32>, vector<16x32xf32>, vector<8x32xf32> -> vector<8x32xf32>
    %85 = vector.broadcast %83 : vector<8x1xf32> to vector<8x32xf32>
    %86 = arith.mulf %84, %85 : vector<8x32xf32>
    %c0_59 = arith.constant 0 : index
    %c96_60 = arith.constant 96 : index
    %87 = vector.load %arg12[%c0_59, %c96_60] : memref<8x128xf32, #tpu.memory_space<vmem>>, vector<8x32xf32>
    tpu.vector_store %arg12[%c0_59, %c96_60], %86 {strides = array<i32>} : memref<8x128xf32, #tpu.memory_space<vmem>>, vector<8x32xf32>,
    %c0_61 = arith.constant 0 : index
    %c0_62 = arith.constant 0 : index
    %88 = vector.load %arg12[%c0_61, %c0_62] : memref<8x128xf32, #tpu.memory_space<vmem>>, vector<8x128xf32>
    %c0_63 = arith.constant 0 : index
    %c0_64 = arith.constant 0 : index
    %89 = vector.load %arg6[%c0_63, %c0_64] : memref<128x128xf32, #tpu.memory_space<vmem>>, vector<128x128xf32>
    %cst_65 = arith.constant dense<0.000000e+00> : vector<8x128xf32>
    %90 = tpu.matmul %88, %89, %cst_65 {dimension_numbers = #tpu.dot_dimension_numbers<[1], [0], [0], [1], [0, 0, 1, 1], [], []>} : vector<8x128xf32>, vector<128x128xf32>, vector<8x128xf32> -> vector<8x128xf32>
    %c0_66 = arith.constant 0 : index
    %c0_67 = arith.constant 0 : index
    %91 = vector.load %arg7[%c0_66, %c0_67] : memref<1x128xf32, #tpu.memory_space<vmem>>, vector<1x128xf32>
    %92 = vector.broadcast %91 : vector<1x128xf32> to vector<8x128xf32>
    %93 = arith.addf %90, %92 : vector<8x128xf32>
    %94 = arith.addf %93, %1 : vector<8x128xf32>
    %c0_68 = arith.constant 0 : index
    %c0_69 = arith.constant 0 : index
    %95 = vector.load %arg8[%c0_68, %c0_69] : memref<1x128xf32, #tpu.memory_space<vmem>>, vector<1x128xf32>
    %c0_70 = arith.constant 0 : index
    %c0_71 = arith.constant 0 : index
    %96 = vector.load %arg9[%c0_70, %c0_71] : memref<1x128xf32, #tpu.memory_space<vmem>>, vector<1x128xf32>
    %cst_72 = arith.constant dense<0.000000e+00> : vector<8xf32>
    %97 = vector.multi_reduction <add>, %94, %cst_72 [1] : vector<8x128xf32> to vector<8xf32>
    %98 = vector.shape_cast %97 : vector<8xf32> to vector<8x1xf32>
    %cst_73 = arith.constant 1.280000e+02 : f32
    %99 = vector.broadcast %cst_73 : f32 to vector<8x1xf32>
    %100 = arith.divf %98, %99 : vector<8x1xf32>
    %101 = vector.broadcast %100 : vector<8x1xf32> to vector<8x128xf32>
    %102 = arith.subf %94, %101 : vector<8x128xf32>
    %103 = arith.mulf %102, %102 : vector<8x128xf32>
    %cst_74 = arith.constant dense<0.000000e+00> : vector<8xf32>
    %104 = vector.multi_reduction <add>, %103, %cst_74 [1] : vector<8x128xf32> to vector<8xf32>
    %105 = vector.shape_cast %104 : vector<8xf32> to vector<8x1xf32>
    %cst_75 = arith.constant 1.280000e+02 : f32
    %106 = vector.broadcast %cst_75 : f32 to vector<8x1xf32>
    %107 = arith.divf %105, %106 : vector<8x1xf32>
    %108 = vector.broadcast %100 : vector<8x1xf32> to vector<8x128xf32>
    %109 = arith.subf %94, %108 : vector<8x128xf32>
    %cst_76 = arith.constant 9.99999974E-6 : f32
    %110 = vector.broadcast %cst_76 : f32 to vector<8x1xf32>
    %111 = arith.addf %107, %110 : vector<8x1xf32>
    %112 = math.rsqrt %111 : vector<8x1xf32>
    %113 = vector.broadcast %112 : vector<8x1xf32> to vector<8x128xf32>
    %114 = arith.mulf %109, %113 : vector<8x128xf32>
    %115 = vector.broadcast %95 : vector<1x128xf32> to vector<8x128xf32>
    %116 = arith.mulf %114, %115 : vector<8x128xf32>
    %117 = vector.broadcast %96 : vector<1x128xf32> to vector<8x128xf32>
    %118 = arith.addf %116, %117 : vector<8x128xf32>
    %c0_77 = arith.constant 0 : index
    %c0_78 = arith.constant 0 : index
    %c0_79 = arith.constant 0 : index
    %119 = vector.load %arg10[%c0_77, %c0_78, %c0_79] : memref<1x8x128xf32, #tpu.memory_space<vmem>>, vector<1x8x128xf32>
    %120 = vector.shape_cast %119 : vector<1x8x128xf32> to vector<8x128xf32>
    %121 = vector.shape_cast %118 : vector<8x128xf32> to vector<1x8x128xf32>
    tpu.vector_store %arg10[%c0_77, %c0_78, %c0_79], %121 {strides = array<i32>} : memref<1x8x128xf32, #tpu.memory_space<vmem>>, vector<1x8x128xf32>,
    return
  }
  func.func @transform_0(%arg0: i32, %arg1: i32) -> (i32, i32, i32) {
    %c0_i32 = arith.constant 0 : i32
    %c0_i32_0 = arith.constant 0 : i32
    return %arg0, %arg1, %c0_i32 : i32, i32, i32
  }
  func.func @transform_1(%arg0: i32, %arg1: i32) -> (i32, i32, i32) {
    %c0_i32 = arith.constant 0 : i32
    %c0_i32_0 = arith.constant 0 : i32
    %c0_i32_1 = arith.constant 0 : i32
    return %arg0, %c0_i32, %c0_i32_0 : i32, i32, i32
  }
  func.func @transform_2(%arg0: i32, %arg1: i32) -> (i32, i32) {
    %c0_i32 = arith.constant 0 : i32
    %c0_i32_0 = arith.constant 0 : i32
    %c0_i32_1 = arith.constant 0 : i32
    return %c0_i32, %c0_i32_0 : i32, i32
  }
  func.func @transform_3(%arg0: i32, %arg1: i32) -> (i32, i32) {
    %c0_i32 = arith.constant 0 : i32
    %c0_i32_0 = arith.constant 0 : i32
    %c0_i32_1 = arith.constant 0 : i32
    return %c0_i32, %c0_i32_0 : i32, i32
  }
  func.func @transform_4(%arg0: i32, %arg1: i32) -> (i32, i32) {
    %c0_i32 = arith.constant 0 : i32
    %c0_i32_0 = arith.constant 0 : i32
    %c0_i32_1 = arith.constant 0 : i32
    return %c0_i32, %c0_i32_0 : i32, i32
  }
  func.func @transform_5(%arg0: i32, %arg1: i32) -> (i32, i32) {
    %c0_i32 = arith.constant 0 : i32
    %c0_i32_0 = arith.constant 0 : i32
    %c0_i32_1 = arith.constant 0 : i32
    return %c0_i32, %c0_i32_0 : i32, i32
  }
  func.func @transform_6(%arg0: i32, %arg1: i32) -> (i32, i32) {
    %c0_i32 = arith.constant 0 : i32
    %c0_i32_0 = arith.constant 0 : i32
    %c0_i32_1 = arith.constant 0 : i32
    return %c0_i32, %c0_i32_0 : i32, i32
  }
  func.func @transform_7(%arg0: i32, %arg1: i32) -> (i32, i32) {
    %c0_i32 = arith.constant 0 : i32
    %c0_i32_0 = arith.constant 0 : i32
    %c0_i32_1 = arith.constant 0 : i32
    return %c0_i32, %c0_i32_0 : i32, i32
  }
  func.func @transform_8(%arg0: i32, %arg1: i32) -> (i32, i32, i32) {
    %c0_i32 = arith.constant 0 : i32
    %c0_i32_0 = arith.constant 0 : i32
    return %arg0, %arg1, %c0_i32 : i32, i32, i32
  }
}

</mosaic_0001>

<bundles_post_ra>
// kernel: decoder_layer_forward.5
= control target key start
LH: loop header
LB: loop body
LE: loop exit
PB: predicated region body
PF: predicated region fallthrough
CT: control target
= control target key end

     0   :  { %8 = vsyncpa [#allocation3], 0  ;;  %s309_s0 = inlined_call_operand.hbm [shape: f32[32,128], index: 0, kind: input, shape index: {}]   ;;  %s310_s1 = inlined_call_operand.hbm [shape: f32[128,256], index: 1, kind: input, shape index: {}]   ;;  %s311_s2 = inlined_call_operand.vmem [shape: f32[1,256], index: 2, kind: input, shape index: {}]   ;;  %s312_s3 = inlined_call_operand.vmem [shape: f32[32,256], index: 3, kind: output, shape index: {}]  }
   0x1   :  { %s14_s14 = sshll.u32 %s309_s0, 4  ;;  %s15_s14 = int_to_ptr.hbm [resolvable:$true] %s14_s14 }
   0x2   :  { %9 = vsyncpa [#allocation5], 0  ;;  %s250_s15 = smov [#allocation2]   ;;  %s27_s19 = sshll.u32 %s310_s1, 4  ;;  %s28_s19 = int_to_ptr.hbm [resolvable:$true] %s27_s19 }
   0x3   :  { %s16_s16 = sshll.u32 %s250_s15, 4  ;;  %s251_s20 = smov 128   ;;  %s17_s16 = int_to_ptr.vmem [resolvable:$true] %s16_s16 }
   0x4   :  { %s252_s21 = smov 8   ;;  %s253_s22 = smov [#allocation4]  }
   0x5   :  { %22 = dma.hbm_to_vmem [thread:$0]  %s15_s14, 512, %s17_s16, [#allocation3], %s251_s20, %s251_s20, %s252_s21  }
   0x6   :  { %s29_s23 = sshll.u32 %s253_s22, 4  ;;  %s254_s24 = smov 256   ;;  %s30_s23 = int_to_ptr.vmem [resolvable:$true] %s29_s23 }
   0x7   :  { %s255_s25 = smov 16  }
   0x8   :  { %35 = dma.hbm_to_vmem [thread:$0]  %s28_s19, 4096, %s30_s23, [#allocation5], %s254_s24, %s254_s24, %s255_s25  }
   0x9   :  { %246 = dma.done.wait [#allocation3], 512  }
   0xa   :  { %247 = vsyncadd [#allocation3], 4294966784 }
   0xb   :  { %248 = dma.done.wait [#allocation5], 4096  }
   0xc   :  { %249 = vsyncadd [#allocation5], 4294963200  ;;  %v80_v0 = vld [vmem:[#allocation4 + $0xf0] sm:$0xff]  ;;  %v81_v1 = vld [vmem:[#allocation4 + $0xf8] sm:$0xff] }
   0xd   :  { %v78_v2 = vld [vmem:[#allocation4 + $0xe0] sm:$0xff]  ;;  %160 = vmatpush.msra.mxu2 %v80_v0  ;;  %176 = vmatpush.msra.mxu3 %v81_v1  ;;  %v79_v3 = vld [vmem:[#allocation4 + $0xe8] sm:$0xff]  ;;  %v76_v4 = vld [vmem:[#allocation4 + $0xd0] sm:$0xff] }
   0xe   :  { %v77_v5 = vld [vmem:[#allocation4 + $0xd8] sm:$0xff]  ;;  %88 = vmatpush.msra.mxu0 %v80_v0  ;;  %117 = vmatpush.msra.mxu1 %v81_v1  ;;  %v74_v6 = vld [vmem:[#allocation4 + $0xc0] sm:$0xff]  ;;  %v75_v7 = vld [vmem:[#allocation4 + $0xc8] sm:$0xff] }
   0xf   :  { %161 = vmatpush.msra.mxu2 %v78_v2  ;;  %177 = vmatpush.msra.mxu3 %v79_v3  ;;  %v72_v8 = vld [vmem:[#allocation4 + $0xb0] sm:$0xff]  ;;  %v73_v9 = vld [vmem:[#allocation4 + $0xb8] sm:$0xff]  ;;  %v70_v10 = vld [vmem:[#allocation4 + $0xa0] sm:$0xff] }
  0x10   :  { %89 = vmatpush.msra.mxu0 %v78_v2  ;;  %118 = vmatpush.msra.mxu1 %v79_v3  ;;  %v71_v11 = vld [vmem:[#allocation4 + $0xa8] sm:$0xff]  ;;  %v68_v12 = vld [vmem:[#allocation4 + $0x90] sm:$0xff]  ;;  %v69_v13 = vld [vmem:[#allocation4 + $0x98] sm:$0xff] }
  0x11   :  { %162 = vmatpush.msra.mxu2 %v76_v4  ;;  %178 = vmatpush.msra.mxu3 %v77_v5  ;;  %v66_v14 = vld [vmem:[#allocation4 + $0x80] sm:$0xff]  ;;  %v67_v15 = vld [vmem:[#allocation4 + $0x88] sm:$0xff]  ;;  %v64_v16 = vld [vmem:[#allocation4 + $0x70] sm:$0xff] }
  0x12   :  { %90 = vmatpush.msra.mxu0 %v76_v4  ;;  %119 = vmatpush.msra.mxu1 %v77_v5  ;;  %v65_v17 = vld [vmem:[#allocation4 + $0x78] sm:$0xff]  ;;  %v62_v18 = vld [vmem:[#allocation4 + $0x60] sm:$0xff]  ;;  %v63_v19 = vld [vmem:[#allocation4 + $0x68] sm:$0xff] }
  0x13   :  { %163 = vmatpush.msra.mxu2 %v74_v6  ;;  %179 = vmatpush.msra.mxu3 %v75_v7  ;;  %v60_v20 = vld [vmem:[#allocation4 + $0x50] sm:$0xff]  ;;  %v61_v21 = vld [vmem:[#allocation4 + $0x58] sm:$0xff]  ;;  %v58_v22 = vld [vmem:[#allocation4 + $0x40] sm:$0xff] }
  0x14   :  { %91 = vmatpush.msra.mxu0 %v74_v6  ;;  %120 = vmatpush.msra.mxu1 %v75_v7  ;;  %v59_v23 = vld [vmem:[#allocation4 + $0x48] sm:$0xff]  ;;  %v56_v24 = vld [vmem:[#allocation4 + $0x30] sm:$0xff]  ;;  %v57_v25 = vld [vmem:[#allocation4 + $0x38] sm:$0xff] }
  0x15   :  { %164 = vmatpush.msra.mxu2 %v72_v8  ;;  %180 = vmatpush.msra.mxu3 %v73_v9  ;;  %v54_v26 = vld [vmem:[#allocation4 + $0x20] sm:$0xff]  ;;  %v55_v27 = vld [vmem:[#allocation4 + $0x28] sm:$0xff]  ;;  %v52_v28 = vld [vmem:[#allocation4 + $0x10] sm:$0xff] }
  0x16   :  { %92 = vmatpush.msra.mxu0 %v72_v8  ;;  %121 = vmatpush.msra.mxu1 %v73_v9  ;;  %v53_v29 = vld [vmem:[#allocation4 + $0x18] sm:$0xff]  ;;  %v50_v30 = vld [vmem:[#allocation4] sm:$0xff]  ;;  %v51_v31 = vld [vmem:[#allocation4 + $0x8] sm:$0xff] }
  0x17   :  { %165 = vmatpush.msra.mxu2 %v70_v10  ;;  %181 = vmatpush.msra.mxu3 %v71_v11  ;;  %v48_v32 = vld [vmem:[#allocation2 + $0x10] sm:$0xff]  ;;  %v46_v33 = vld [vmem:[#allocation2] sm:$0xff]  ;;  %v49_v34 = vld [vmem:[#allocation2 + $0x18] sm:$0xff] }
  0x18   :  { %93 = vmatpush.msra.mxu0 %v70_v10  ;;  %122 = vmatpush.msra.mxu1 %v71_v11  ;;  %v47_v35 = vld [vmem:[#allocation2 + $0x8] sm:$0xff]  ;;  %v82_v36 = vld [vmem:[%s311_s2] sm:$0x3] }
  0x19   :  { %166 = vmatpush.msra.mxu2 %v68_v12  ;;  %182 = vmatpush.msra.mxu3 %v69_v13  ;;  %v84_v37 = vperm.slane %v82_v36, 0  ;;  %v85_v38 = vperm.slane %v82_v36, 1 }
  0x1a   :  { %94 = vmatpush.msra.mxu0 %v68_v12  ;;  %123 = vmatpush.msra.mxu1 %v69_v13 }
  0x1b   :  { %167 = vmatpush.msra.mxu2 %v66_v14  ;;  %183 = vmatpush.msra.mxu3 %v67_v15 }
  0x1c   :  { %95 = vmatpush.msra.mxu0 %v66_v14  ;;  %124 = vmatpush.msra.mxu1 %v67_v15 }
  0x1d   :  { %168 = vmatpush.msra.mxu2 %v64_v16  ;;  %184 = vmatpush.msra.mxu3 %v65_v17 }
  0x1e   :  { %96 = vmatpush.msra.mxu0 %v64_v16  ;;  %125 = vmatpush.msra.mxu1 %v65_v17 }
  0x1f   :  { %169 = vmatpush.msra.mxu2 %v62_v18  ;;  %185 = vmatpush.msra.mxu3 %v63_v19 }
  0x20   :  { %97 = vmatpush.msra.mxu0 %v62_v18  ;;  %126 = vmatpush.msra.mxu1 %v63_v19 }
  0x21   :  { %170 = vmatpush.msra.mxu2 %v60_v20  ;;  %186 = vmatpush.msra.mxu3 %v61_v21 }
  0x22   :  { %98 = vmatpush.msra.mxu0 %v60_v20  ;;  %127 = vmatpush.msra.mxu1 %v61_v21 }
  0x23   :  { %171 = vmatpush.msra.mxu2 %v58_v22  ;;  %187 = vmatpush.msra.mxu3 %v59_v23 }
  0x24   :  { %99 = vmatpush.msra.mxu0 %v58_v22  ;;  %128 = vmatpush.msra.mxu1 %v59_v23 }
  0x25   :  { %172 = vmatpush.msra.mxu2 %v56_v24  ;;  %188 = vmatpush.msra.mxu3 %v57_v25 }
  0x26   :  { %100 = vmatpush.msra.mxu0 %v56_v24  ;;  %129 = vmatpush.msra.mxu1 %v57_v25 }
  0x27   :  { %173 = vmatpush.msra.mxu2 %v54_v26  ;;  %189 = vmatpush.msra.mxu3 %v55_v27 }
  0x28   :  { %101 = vmatpush.msra.mxu0 %v54_v26  ;;  %130 = vmatpush.msra.mxu1 %v55_v27 }
  0x29   :  { %174 = vmatpush.msra.mxu2 %v52_v28  ;;  %190 = vmatpush.msra.mxu3 %v53_v29 }
  0x2a   :  { %102 = vmatpush.msra.mxu0 %v52_v28  ;;  %131 = vmatpush.msra.mxu1 %v53_v29 }
  0x2b   :  { %175 = vmatpush.msra.mxu2 %v50_v30  ;;  %191 = vmatpush.msra.mxu3 %v51_v31 }
  0x2c   :  { %110 = vmatmul.f32.vlgmr.msra.gmra.mxu2 %v48_v32  ;;  %139 = vmatmul.f32.vlgmr.msra.gmra.mxu3 %v48_v32 }
  0x2d   :  { %103 = vmatpush.msra.mxu0 %v50_v30  ;;  %132 = vmatpush.msra.mxu1 %v51_v31 }
  0x2e   :  { %104 = vmatmul.f32.vlgmr.msra.gmra.mxu0 %v46_v33  ;;  %133 = vmatmul.f32.vlgmr.msra.gmra.mxu1 %v46_v33 }
  0x34   :  { %113 = vmatmul.f32.gmra.mxu2 %v49_v34  ;;  %142 = vmatmul.f32.gmra.mxu3 %v49_v34 }
  0x36   :  { %107 = vmatmul.f32.gmra.mxu0 %v47_v35  ;;  %136 = vmatmul.f32.gmra.mxu1 %v47_v35 }
  0xab   :  { %v105_v39 = vpop.f32.mrf.mxu0  ;;  %v134_v40 = vpop.f32.mrf.mxu1 }
  0xac   :  { %v106_v41 = vadd.f32 %v105_v39, %v84_v37  ;;  %v135_v42 = vadd.f32 %v134_v40, %v85_v38 }
  0xae   :  { %146 = vst [vmem:[%s312_s3] sm:$0xff] %v106_v41 }
  0xaf   :  { %v111_v43 = vpop.f32.mrf.mxu2  ;;  %147 = vst [vmem:[%s312_s3 + $0x8] sm:$0xff] %v135_v42  ;;  %v140_v44 = vpop.f32.mrf.mxu3 }
  0xb0   :  { %v112_v45 = vadd.f32 %v111_v43, %v84_v37  ;;  %v141_v46 = vadd.f32 %v140_v44, %v85_v38 }
  0xb2   :  { %150 = vst [vmem:[%s312_s3 + $0x20] sm:$0xff] %v112_v45 }
  0xb3   :  { %151 = vst [vmem:[%s312_s3 + $0x28] sm:$0xff] %v141_v46  ;;  %v108_v47 = vpop.f32.mrf.mxu0  ;;  %v137_v48 = vpop.f32.mrf.mxu1 }
  0xb4   :  { %v109_v49 = vadd.f32 %v108_v47, %v84_v37  ;;  %v138_v50 = vadd.f32 %v137_v48, %v85_v38 }
  0xb6   :  { %148 = vst [vmem:[%s312_s3 + $0x10] sm:$0xff] %v109_v49 }
  0xb7   :  { %v114_v51 = vpop.f32.mrf.mxu2  ;;  %149 = vst [vmem:[%s312_s3 + $0x18] sm:$0xff] %v138_v50  ;;  %v143_v52 = vpop.f32.mrf.mxu3 }
  0xb8   :  { %v115_v53 = vadd.f32 %v114_v51, %v84_v37  ;;  %v144_v54 = vadd.f32 %v143_v52, %v85_v38 }
  0xba   :  { %152 = vst [vmem:[%s312_s3 + $0x30] sm:$0xff] %v115_v53 }
  0xbb   :  { %153 = vst [vmem:[%s312_s3 + $0x38] sm:$0xff] %v144_v54 }
  0xbc   :  { %158 = vsyncpa [#allocation3], 1 }
  0xbd   :  { %159 = vsyncpa [#allocation5], 1 }

// kernel: decoder_layer_forward.7
= control target key start
LH: loop header
LB: loop body
LE: loop exit
PB: predicated region body
PF: predicated region fallthrough
CT: control target
= control target key end

     0   :  { %s1590_s0 = inlined_call_operand.vmem [shape: f32[16,128], index: 0, kind: input, shape index: {}]   ;;  %s1591_s1 = inlined_call_operand.hbm [shape: f32[128,1024], index: 1, kind: input, shape index: {}]   ;;  %s1592_s2 = inlined_call_operand.hbm [shape: f32[1,1024], index: 2, kind: input, shape index: {}]   ;;  %s1593_s3 = inlined_call_operand.hbm [shape: f32[1024,128], index: 3, kind: input, shape index: {}]   ;;  %s1594_s4 = inlined_call_operand.vmem [shape: f32[1,128], index: 4, kind: input, shape index: {}]   ;;  %s1595_s5 = inlined_call_operand.vmem [shape: f32[1,128], index: 5, kind: input, shape index: {}]   ;;  %s1596_s6 = inlined_call_operand.vmem [shape: f32[1,128], index: 6, kind: input, shape index: {}]   ;;  %s1597_s7 = inlined_call_operand.hbm [shape: f32[16,128], index: 7, kind: output, shape index: {}]  }
   0x1   :  { %1601 = sst [smem:[#allocation17_spill]] %s1592_s2 }
   0x2   :  { %1602 = sst [smem:[#allocation18_spill]] %s1595_s5 }
   0x3   :  { %1603 = sst [smem:[#allocation19_spill]] %s1596_s6 }
   0x4   :  { %1604 = sst [smem:[#allocation20_spill]] %s1597_s7 }
   0x5   :  { %12 = vsyncpa [#allocation4], 0 }
   0x6   :  { %14 = vsyncpa [#allocation4 + $0x1], 0 }
   0x7   :  { %15 = vsyncpa [#allocation7], 0 }
   0x8   :  { %17 = vsyncpa [#allocation7 + $0x1], 0 }
   0x9   :  { %18 = vsyncpa [#allocation5], 0  ;;  %s1302_s24 = smov 0   ;;  %s1304_s25 = smov 0  }
   0xa   :  { %s1306_s26 = smov 0   ;;  %s1308_s27 = smov 0  }
   0xb   :  { %s1310_s28 = smov 0   ;;  %s1312_s29 = smov 0  }
   0xc LB: > { %1605 = sst [smem:[#allocation13_spill]] %s1238_s26  ;;  %s1331_s30 = sadd.s32 4294967295, %s1250_s29   ;;  %s1250_s29 = sphi %s1312_s29, %s24_s29   ;;  %s1246_s28 = sphi %s1310_s28, %s1623_s28   ;;  %s1242_s27 = sphi %s1308_s27, %s1622_s27   ;;  %s1238_s26 = sphi %s1306_s26, %s1618_s26   ;;  %s1234_s25 = sphi %s1304_s25, %s1621_s25   ;;  %s1230_s24 = sphi %s1302_s24, %s1620_s24  }
   0xd   : > { %1606 = sst [smem:[#allocation14_spill]] %s1250_s29  ;;  %s33_s8 = sadd.s32 1, %s1246_s28 }
   0xe   : > { %p34_p0 = scmp.ge.s32.totalorder %s33_s8, 2  ;;  %s69_s9 = sadd.s32 1, %s1238_s26 }
   0xf   : > { %p76_p1 = scmp.ne.s32.totalorder %s1238_s26, %s1234_s25  ;;  %p77_p2 = scmp.eq.s32.totalorder %s1250_s29, 0 }
  0x10   : > { %s1625_s8 = smov (%p34_p0, %s33_s8), 0  ;;  %p82_p4 = scmp.ne.s32.totalorder %s1234_s25, %s1230_s24 }
  0x11   : > { %1607 = sst [smem:[#allocation15_spill]] %s1625_s8  ;;  %p78_p3 = por %p77_p2, %p76_p1 }
  0x12   : > { %s66_s10 = ssub.s32 %s1246_s28, %s1625_s8  ;;  %p83_p5 = scmp.eq.s32.totalorder %s1331_s30, 0 }
  0x13   : > { %p67_p6 = scmp.eq.s32.totalorder %s66_s10, 0  ;;  %p1004_p8 = scmp.lt.s32.totalorder %s1250_s29, 2 }
  0x14   : > { %p1344_p7 = por %p83_p5, %p82_p4  ;;  %s1353_s13 = sand.u32 1, %s1238_s26  }
  0x15   : > { %s1350_s12 = scalar_select %p67_p6, %s1238_s26, %s69_s9  }
  0x16   : > { %p1355_p9 = pnand %p1004_p8, %p78_p3  ;;  %s964_s15 = sshll.u32 %s1353_s13, 9 }
  0x17   : > { %1609 = sst [smem:[#allocation16_spill]] %s1350_s12  ;;  %s269_s16 = scalar_lea.vmem [#allocation3], %s964_s15 }
  0x18   : > { %s277_s17 = sshll.u32 %s269_s16, 4  ;;  %s287_s18 = sand.u32 1, %s1250_s29   ;;  %s1361_s17 = int_to_ptr.vmem [resolvable:$true] %s277_s17 }
  0x19   : > { %s967_s19 = sshll.u32 %s1353_s13, 2  ;;  %s968_s20 = sshll.u32 %s1246_s28, 2 }
  0x1a   : > { %s1611_s2 = sld [smem:[#allocation17_spill]]  ;;  %s291_s9 = scalar_lea.vmem [#allocation6], %s967_s19 }
  0x1b   : > { %s299_s10 = sshll.u32 %s291_s9, 4  ;;  %s288_s8 = scalar_lea.sflag [#allocation7], %s287_s18  ;;  %s300_s10 = int_to_ptr.vmem [resolvable:$true] %s299_s10 }
  0x1c   : > { %p972_p10 = scmp.ge.s32.totalorder %s1250_s29, 1  ;;  %s310_s16 = scalar_lea.vmem [#allocation8], %s964_s15 }
  0x1d   : > { %s318_s12 = sshll.u32 %s310_s16, 4  ;;  %p326_p11 = scmp.lt.s32.totalorder %s1250_s29, 3  ;;  %s319_s12 = int_to_ptr.vmem [resolvable:$true] %s318_s12 }
  0x1e   : > { %s982_s19 = sshll.u32 %s1246_s28, 5  ;;  %s266_s9 = scalar_lea.sflag [#allocation4], %s1353_s13 }
  0x1f   : > { %p1372_p12 = pnand %p972_p10, %p326_p11  ;;  %s1254_s15 = smov 32  }
  0x20   : > { %s295_s23 = scalar_lea.hbm %s1611_s2, %s968_s20  ;;  %s1253_s2 = smov 512  }
  0x21   : > { %s297_s24 = sshll.u32 %s295_s23, 4  ;;  %s274_s23 = scalar_lea.hbm %s1591_s1, %s982_s19  ;;  %s298_s24 = int_to_ptr.hbm [resolvable:$true] %s297_s24 }
  0x22   : > { %1000 = dma.hbm_to_vmem [thread:$0]  (!%p1355_p9), %s298_s24, 64, %s300_s10, %s288_s8  }
  0x23   : > { %s275_s18 = sshll.u32 %s274_s23, 4  ;;  %s983_s24 = sshll.u32 %s1246_s28, 9  ;;  %s276_s18 = int_to_ptr.hbm [resolvable:$true] %s275_s18 }
  0x24   : > { %s1252_s10 = smov 1024   ;;  %s315_s29 = scalar_lea.hbm %s1593_s3, %s983_s24 }
  0x25   : > { %997 = dma.hbm_to_vmem [thread:$0]  (!%p1355_p9), %s276_s18, 8192, %s1361_s17, %s266_s9, %s1252_s10, %s1253_s2, %s1254_s15  }
  0x26   : > { %s316_s7 = sshll.u32 %s315_s29, 4  ;;  %s1255_s6 = smov 128   ;;  %s317_s7 = int_to_ptr.hbm [resolvable:$true] %s316_s7 }
  0x27   : > { %s1256_s5 = smov 8   ;;  %330 = sbr.rel (%p1372_p12) target bundleno = 664 (0x298), region = 48 }
  0x28   : > { %1003 = dma.hbm_to_vmem [thread:$0]  (!%p1355_p9), %s317_s7, 8192, %s319_s12, %s288_s8, %s1255_s6, %s1255_s6, %s1256_s5  }
  0x29   : > { %s332_s13 = sand.u32 (!%p1372_p12), 1, %s1234_s25  }
  0x2a   : > { %s973_s19 = sshll.u32 (!%p1372_p12), %s332_s13, 9  ;;  %s333_s20 = scalar_lea.sflag (!%p1372_p12), [#allocation4], %s332_s13 }
  0x2b   : > { %s1393_s22 = scalar_lea.vmem (!%p1372_p12), [#allocation3], %s973_s19 }
  0x2c   : > { %1217 = dma.done.wait (%p1344_p7), %s333_s20, 8192  }
  0x2d   : > { %1219 = vsyncadd (%p1344_p7), %s333_s20, 4294959104  ;;  %s342_s2 = sand.u32 1, %s1331_s30   ;;  %s974_s26 = sshll.u32 %s332_s13, 2 }
  0x2e   : > { %s343_s5 = scalar_lea.sflag [#allocation7], %s342_s2  ;;  %s1400_s6 = scalar_lea.vmem [#allocation6], %s974_s26 }
  0x2f   : > { %1221 = dma.done.wait (%p1344_p7), %s343_s5, 8256  }
  0x30   : > { %1223 = vsyncadd (%p1344_p7), %s343_s5, 4294959040  ;;  %s1406_s7 = scalar_lea.vmem [#allocation8], %s973_s19  ;;  %p976_p13 = scmp.ne.s32.totalorder %s1242_s27, 0 }
  0x32   : > { %411 = sbr.rel (%p976_p13) target bundleno = 58 (0x3a), region = 64 }
  0x37   : > { %v1257_v0 = vmov 0.0  }
  0x38   : > { %412 = vst [vmem:[#allocation2] sm:$0xff] %v1257_v0 }
  0x39   : > { %413 = vst [vmem:[#allocation2 + $0x8] sm:$0xff] %v1257_v0 }
  0x3a PF: > { %v478_v1 = vld [vmem:[%s1393_s22 + $0x1f0] sm:$0xff]  ;;  %v479_v3 = vld [vmem:[%s1393_s22 + $0x1f8] sm:$0xff]  ;;  %v476_v8 = vld [vmem:[%s1393_s22 + $0x1e0] sm:$0xff]  ;;  %p977_p0 = scmp.ne.s32.totalorder %s1242_s27, 1 }
  0x3b   : > { %v474_v2 = vld [vmem:[%s1393_s22 + $0x1d0] sm:$0xff]  ;;  %536 = vmatpush.msra.mxu2 %v478_v1  ;;  %559 = vmatpush.msra.mxu3 %v479_v3  ;;  %v475_v4 = vld [vmem:[%s1393_s22 + $0x1d8] sm:$0xff]  ;;  %v477_v9 = vld [vmem:[%s1393_s22 + $0x1e8] sm:$0xff]  ;;  %s1613_s23 = sld [smem:[#allocation18_spill]] (!%p977_p0) }
  0x3c   : > { %v470_v5 = vld [vmem:[%s1393_s22 + $0x1b0] sm:$0xff]  ;;  %v471_v6 = vld [vmem:[%s1393_s22 + $0x1b8] sm:$0xff]  ;;  %490 = vmatpush.msra.mxu0 %v476_v8  ;;  %513 = vmatpush.msra.mxu1 %v477_v9  ;;  %v472_v11 = vld [vmem:[%s1393_s22 + $0x1c0] sm:$0xff]  ;;  %s1614_s9 = sld [smem:[#allocation19_spill]] (!%p977_p0) }
  0x3d   : > { %537 = vmatpush.msra.mxu2 %v474_v2  ;;  %560 = vmatpush.msra.mxu3 %v475_v4  ;;  %v466_v7 = vld [vmem:[%s1393_s22 + $0x190] sm:$0xff]  ;;  %v467_v10 = vld [vmem:[%s1393_s22 + $0x198] sm:$0xff]  ;;  %v473_v12 = vld [vmem:[%s1393_s22 + $0x1c8] sm:$0xff] }
  0x3e   : > { %v468_v13 = vld [vmem:[%s1393_s22 + $0x1a0] sm:$0xff]  ;;  %v462_v14 = vld [vmem:[%s1393_s22 + $0x170] sm:$0xff]  ;;  %v463_v15 = vld [vmem:[%s1393_s22 + $0x178] sm:$0xff]  ;;  %491 = vmatpush.msra.mxu0 %v472_v11  ;;  %514 = vmatpush.msra.mxu1 %v473_v12 }
  0x3f   : > { %538 = vmatpush.msra.mxu2 %v470_v5  ;;  %561 = vmatpush.msra.mxu3 %v471_v6  ;;  %v469_v16 = vld [vmem:[%s1393_s22 + $0x1a8] sm:$0xff]  ;;  %v464_v17 = vld [vmem:[%s1393_s22 + $0x180] sm:$0xff]  ;;  %v458_v19 = vld [vmem:[%s1393_s22 + $0x150] sm:$0xff] }
  0x40   : > { %v465_v18 = vld [vmem:[%s1393_s22 + $0x188] sm:$0xff]  ;;  %v459_v20 = vld [vmem:[%s1393_s22 + $0x158] sm:$0xff]  ;;  %492 = vmatpush.msra.mxu0 %v468_v13  ;;  %515 = vmatpush.msra.mxu1 %v469_v16  ;;  %v460_v21 = vld [vmem:[%s1393_s22 + $0x160] sm:$0xff] }
  0x41   : > { %539 = vmatpush.msra.mxu2 %v466_v7  ;;  %562 = vmatpush.msra.mxu3 %v467_v10  ;;  %v461_v22 = vld [vmem:[%s1393_s22 + $0x168] sm:$0xff]  ;;  %v454_v23 = vld [vmem:[%s1393_s22 + $0x130] sm:$0xff]  ;;  %v455_v24 = vld [vmem:[%s1393_s22 + $0x138] sm:$0xff] }
  0x42   : > { %493 = vmatpush.msra.mxu0 %v464_v17  ;;  %516 = vmatpush.msra.mxu1 %v465_v18  ;;  %v456_v25 = vld [vmem:[%s1393_s22 + $0x140] sm:$0xff]  ;;  %v457_v26 = vld [vmem:[%s1393_s22 + $0x148] sm:$0xff]  ;;  %v450_v27 = vld [vmem:[%s1393_s22 + $0x110] sm:$0xff] }
  0x43   : > { %540 = vmatpush.msra.mxu2 %v462_v14  ;;  %563 = vmatpush.msra.mxu3 %v463_v15  ;;  %v451_v28 = vld [vmem:[%s1393_s22 + $0x118] sm:$0xff]  ;;  %v452_v29 = vld [vmem:[%s1393_s22 + $0x120] sm:$0xff]  ;;  %v453_v30 = vld [vmem:[%s1393_s22 + $0x128] sm:$0xff] }
  0x44   : > { %494 = vmatpush.msra.mxu0 %v460_v21  ;;  %517 = vmatpush.msra.mxu1 %v461_v22  ;;  %v446_v31 = vld [vmem:[%s1393_s22 + $0xf0] sm:$0xff]  ;;  %v447_v32 = vld [vmem:[%s1393_s22 + $0xf8] sm:$0xff]  ;;  %v448_v33 = vld [vmem:[%s1393_s22 + $0x100] sm:$0xff] }
  0x45   : > { %541 = vmatpush.msra.mxu2 %v458_v19  ;;  %564 = vmatpush.msra.mxu3 %v459_v20  ;;  %v449_v34 = vld [vmem:[%s1393_s22 + $0x108] sm:$0xff]  ;;  %v442_v35 = vld [vmem:[%s1393_s22 + $0xd0] sm:$0xff]  ;;  %v443_v36 = vld [vmem:[%s1393_s22 + $0xd8] sm:$0xff] }
  0x46   : > { %495 = vmatpush.msra.mxu0 %v456_v25  ;;  %518 = vmatpush.msra.mxu1 %v457_v26  ;;  %v444_v37 = vld [vmem:[%s1393_s22 + $0xe0] sm:$0xff]  ;;  %v445_v38 = vld [vmem:[%s1393_s22 + $0xe8] sm:$0xff]  ;;  %v438_v39 = vld [vmem:[%s1393_s22 + $0xb0] sm:$0xff] }
  0x47   : > { %542 = vmatpush.msra.mxu2 %v454_v23  ;;  %565 = vmatpush.msra.mxu3 %v455_v24  ;;  %v439_v40 = vld [vmem:[%s1393_s22 + $0xb8] sm:$0xff]  ;;  %v440_v41 = vld [vmem:[%s1393_s22 + $0xc0] sm:$0xff]  ;;  %v441_v42 = vld [vmem:[%s1393_s22 + $0xc8] sm:$0xff] }
  0x48   : > { %496 = vmatpush.msra.mxu0 %v452_v29  ;;  %519 = vmatpush.msra.mxu1 %v453_v30  ;;  %v434_v43 = vld [vmem:[%s1393_s22 + $0x90] sm:$0xff]  ;;  %v435_v44 = vld [vmem:[%s1393_s22 + $0x98] sm:$0xff]  ;;  %v436_v45 = vld [vmem:[%s1393_s22 + $0xa0] sm:$0xff] }
  0x49   : > { %543 = vmatpush.msra.mxu2 %v450_v27  ;;  %566 = vmatpush.msra.mxu3 %v451_v28  ;;  %v437_v46 = vld [vmem:[%s1393_s22 + $0xa8] sm:$0xff]  ;;  %v430_v47 = vld [vmem:[%s1393_s22 + $0x70] sm:$0xff]  ;;  %v431_v48 = vld [vmem:[%s1393_s22 + $0x78] sm:$0xff] }
  0x4a   : > { %497 = vmatpush.msra.mxu0 %v448_v33  ;;  %520 = vmatpush.msra.mxu1 %v449_v34  ;;  %v432_v49 = vld [vmem:[%s1393_s22 + $0x80] sm:$0xff]  ;;  %v433_v50 = vld [vmem:[%s1393_s22 + $0x88] sm:$0xff]  ;;  %v426_v51 = vld [vmem:[%s1393_s22 + $0x50] sm:$0xff] }
  0x4b   : > { %544 = vmatpush.msra.mxu2 %v446_v31  ;;  %567 = vmatpush.msra.mxu3 %v447_v32  ;;  %v427_v52 = vld [vmem:[%s1393_s22 + $0x58] sm:$0xff]  ;;  %v428_v53 = vld [vmem:[%s1393_s22 + $0x60] sm:$0xff]  ;;  %v429_v54 = vld [vmem:[%s1393_s22 + $0x68] sm:$0xff] }
  0x4c   : > { %498 = vmatpush.msra.mxu0 %v444_v37  ;;  %521 = vmatpush.msra.mxu1 %v445_v38  ;;  %v422_v55 = vld [vmem:[%s1393_s22 + $0x30] sm:$0xff]  ;;  %v423_v56 = vld [vmem:[%s1393_s22 + $0x38] sm:$0xff]  ;;  %v424_v57 = vld [vmem:[%s1393_s22 + $0x40] sm:$0xff] }
  0x4d   : > { %545 = vmatpush.msra.mxu2 %v442_v35  ;;  %568 = vmatpush.msra.mxu3 %v443_v36  ;;  %v425_v58 = vld [vmem:[%s1393_s22 + $0x48] sm:$0xff]  ;;  %v418_v59 = vld [vmem:[%s1393_s22 + $0x10] sm:$0xff]  ;;  %v419_v60 = vld [vmem:[%s1393_s22 + $0x18] sm:$0xff] }
  0x4e   : > { %499 = vmatpush.msra.mxu0 %v440_v41  ;;  %522 = vmatpush.msra.mxu1 %v441_v42  ;;  %v1472_v61 = vld [vmem:[%s1590_s0] sm:$0xff]  ;;  %v420_v62 = vld [vmem:[%s1393_s22 + $0x20] sm:$0xff]  ;;  %v421_v63 = vld [vmem:[%s1393_s22 + $0x28] sm:$0xff] }
  0x4f   : > { %546 = vmatpush.msra.mxu2 %v438_v39  ;;  %569 = vmatpush.msra.mxu3 %v439_v40  ;;  %v639_v0 = vld [vmem:[%s1406_s7 + $0x178] sm:$0xff]  ;;  %v417_v3 = vld [vmem:[%s1393_s22 + $0x8] sm:$0xff]  ;;  %v638_v4 = vld [vmem:[%s1406_s7 + $0x170] sm:$0xff] }
  0x50   : > { %500 = vmatpush.msra.mxu0 %v436_v45  ;;  %523 = vmatpush.msra.mxu1 %v437_v46  ;;  %v655_v1 = vld [vmem:[%s1406_s7 + $0x1f8] sm:$0xff]  ;;  %v654_v7 = vld [vmem:[%s1406_s7 + $0x1f0] sm:$0xff]  ;;  %v637_v8 = vld [vmem:[%s1406_s7 + $0x168] sm:$0xff] }
  0x51   : > { %547 = vmatpush.msra.mxu2 %v434_v43  ;;  %570 = vmatpush.msra.mxu3 %v435_v44  ;;  %v416_v2 = vld [vmem:[%s1393_s22] sm:$0xff]  ;;  %v606_v9 = vld [vmem:[%s1406_s7 + $0x70] sm:$0xff]  ;;  %v636_v12 = vld [vmem:[%s1406_s7 + $0x160] sm:$0xff] }
  0x52   : > { %501 = vmatpush.msra.mxu0 %v432_v49  ;;  %524 = vmatpush.msra.mxu1 %v433_v50  ;;  %v607_v5 = vld [vmem:[%s1406_s7 + $0x78] sm:$0xff]  ;;  %v1493_v10 = vld [vmem:[%s1590_s0 + $0x8] sm:$0xff]  ;;  %v653_v13 = vld [vmem:[%s1406_s7 + $0x1e8] sm:$0xff] }
  0x53   : > { %548 = vmatpush.msra.mxu2 %v430_v47  ;;  %571 = vmatpush.msra.mxu3 %v431_v48  ;;  %v623_v6 = vld [vmem:[%s1406_s7 + $0xf8] sm:$0xff]  ;;  %v622_v11 = vld [vmem:[%s1406_s7 + $0xf0] sm:$0xff]  ;;  %v605_v14 = vld [vmem:[%s1406_s7 + $0x68] sm:$0xff] }
  0x54   : > { %502 = vmatpush.msra.mxu0 %v428_v53  ;;  %525 = vmatpush.msra.mxu1 %v429_v54  ;;  %v621_v15 = vld [vmem:[%s1406_s7 + $0xe8] sm:$0xff]  ;;  %v635_v16 = vld [vmem:[%s1406_s7 + $0x158] sm:$0xff]  ;;  %v652_v17 = vld [vmem:[%s1406_s7 + $0x1e0] sm:$0xff] }
  0x55   : > { %549 = vmatpush.msra.mxu2 %v426_v51  ;;  %572 = vmatpush.msra.mxu3 %v427_v52  ;;  %v604_v18 = vld [vmem:[%s1406_s7 + $0x60] sm:$0xff]  ;;  %v634_v20 = vld [vmem:[%s1406_s7 + $0x150] sm:$0xff]  ;;  %v651_v21 = vld [vmem:[%s1406_s7 + $0x1d8] sm:$0xff] }
  0x56   : > { %503 = vmatpush.msra.mxu0 %v424_v57  ;;  %526 = vmatpush.msra.mxu1 %v425_v58  ;;  %v620_v19 = vld [vmem:[%s1406_s7 + $0xe0] sm:$0xff]  ;;  %v603_v22 = vld [vmem:[%s1406_s7 + $0x58] sm:$0xff]  ;;  %v633_v24 = vld [vmem:[%s1406_s7 + $0x148] sm:$0xff] }
  0x57   : > { %550 = vmatpush.msra.mxu2 %v422_v55  ;;  %573 = vmatpush.msra.mxu3 %v423_v56  ;;  %v619_v23 = vld [vmem:[%s1406_s7 + $0xd8] sm:$0xff]  ;;  %v650_v25 = vld [vmem:[%s1406_s7 + $0x1d0] sm:$0xff]  ;;  %v632_v28 = vld [vmem:[%s1406_s7 + $0x140] sm:$0xff] }
  0x58   : > { %504 = vmatpush.msra.mxu0 %v420_v62  ;;  %527 = vmatpush.msra.mxu1 %v421_v63  ;;  %v602_v26 = vld [vmem:[%s1406_s7 + $0x50] sm:$0xff]  ;;  %v649_v29 = vld [vmem:[%s1406_s7 + $0x1c8] sm:$0xff]  ;;  %v631_v32 = vld [vmem:[%s1406_s7 + $0x138] sm:$0xff] }
  0x59   : > { %551 = vmatpush.msra.mxu2 %v418_v59  ;;  %574 = vmatpush.msra.mxu3 %v419_v60  ;;  %v618_v27 = vld [vmem:[%s1406_s7 + $0xd0] sm:$0xff]  ;;  %v601_v30 = vld [vmem:[%s1406_s7 + $0x48] sm:$0xff]  ;;  %v648_v33 = vld [vmem:[%s1406_s7 + $0x1c0] sm:$0xff] }
  0x5a   : > { %552 = vmatmul.f32.vlgmr.msra.gmra.mxu2 %v1472_v61  ;;  %575 = vmatmul.f32.vlgmr.msra.gmra.mxu3 %v1472_v61  ;;  %v617_v31 = vld [vmem:[%s1406_s7 + $0xc8] sm:$0xff]  ;;  %v600_v34 = vld [vmem:[%s1406_s7 + $0x40] sm:$0xff]  ;;  %v630_v36 = vld [vmem:[%s1406_s7 + $0x130] sm:$0xff] }
  0x5b   : > { %702 = vmatpush.msrb.mxu2 %v639_v0  ;;  %725 = vmatpush.msrb.mxu3 %v655_v1  ;;  %v616_v35 = vld [vmem:[%s1406_s7 + $0xc0] sm:$0xff]  ;;  %v647_v37 = vld [vmem:[%s1406_s7 + $0x1b8] sm:$0xff]  ;;  %v629_v40 = vld [vmem:[%s1406_s7 + $0x128] sm:$0xff] }
  0x5c   : > { %505 = vmatpush.msra.mxu0 %v416_v2  ;;  %528 = vmatpush.msra.mxu1 %v417_v3  ;;  %v599_v38 = vld [vmem:[%s1406_s7 + $0x38] sm:$0xff]  ;;  %v646_v41 = vld [vmem:[%s1406_s7 + $0x1b0] sm:$0xff]  ;;  %v628_v44 = vld [vmem:[%s1406_s7 + $0x120] sm:$0xff] }
  0x5d   : > { %506 = vmatmul.f32.vlgmr.msra.gmra.mxu0 %v1472_v61  ;;  %529 = vmatmul.f32.vlgmr.msra.gmra.mxu1 %v1472_v61  ;;  %v615_v39 = vld [vmem:[%s1406_s7 + $0xb8] sm:$0xff]  ;;  %v598_v42 = vld [vmem:[%s1406_s7 + $0x30] sm:$0xff]  ;;  %v645_v45 = vld [vmem:[%s1406_s7 + $0x1a8] sm:$0xff] }
  0x5e   : > { %703 = vmatpush.msrb.mxu2 %v638_v4  ;;  %656 = vmatpush.msrb.mxu0 %v607_v5  ;;  %v614_v43 = vld [vmem:[%s1406_s7 + $0xb0] sm:$0xff]  ;;  %v597_v46 = vld [vmem:[%s1406_s7 + $0x28] sm:$0xff]  ;;  %v627_v48 = vld [vmem:[%s1406_s7 + $0x118] sm:$0xff] }
  0x5f   : > { %679 = vmatpush.msrb.mxu1 %v623_v6  ;;  %726 = vmatpush.msrb.mxu3 %v654_v7  ;;  %v613_v47 = vld [vmem:[%s1406_s7 + $0xa8] sm:$0xff]  ;;  %v644_v49 = vld [vmem:[%s1406_s7 + $0x1a0] sm:$0xff]  ;;  %v626_v52 = vld [vmem:[%s1406_s7 + $0x110] sm:$0xff] }
  0x60   : > { %704 = vmatpush.msrb.mxu2 %v637_v8  ;;  %657 = vmatpush.msrb.mxu0 %v606_v9  ;;  %v596_v50 = vld [vmem:[%s1406_s7 + $0x20] sm:$0xff]  ;;  %v643_v53 = vld [vmem:[%s1406_s7 + $0x198] sm:$0xff]  ;;  %v625_v56 = vld [vmem:[%s1406_s7 + $0x108] sm:$0xff] }
  0x61   : > { %680 = vmatpush.msrb.mxu1 %v622_v11  ;;  %727 = vmatpush.msrb.mxu3 %v653_v13  ;;  %v612_v51 = vld [vmem:[%s1406_s7 + $0xa0] sm:$0xff]  ;;  %v595_v54 = vld [vmem:[%s1406_s7 + $0x18] sm:$0xff]  ;;  %v642_v57 = vld [vmem:[%s1406_s7 + $0x190] sm:$0xff] }
  0x62   : > { %555 = vmatmul.f32.gmra.mxu2 %v1493_v10  ;;  %578 = vmatmul.f32.gmra.mxu3 %v1493_v10  ;;  %v611_v55 = vld [vmem:[%s1406_s7 + $0x98] sm:$0xff]  ;;  %v594_v58 = vld [vmem:[%s1406_s7 + $0x10] sm:$0xff]  ;;  %v624_v60 = vld [vmem:[%s1406_s7 + $0x100] sm:$0xff] }
  0x63   : > { %705 = vmatpush.msrb.mxu2 %v636_v12  ;;  %658 = vmatpush.msrb.mxu0 %v605_v14  ;;  %v610_v59 = vld [vmem:[%s1406_s7 + $0x90] sm:$0xff]  ;;  %v641_v62 = vld [vmem:[%s1406_s7 + $0x188] sm:$0xff]  ;;  %v640_v1 = vld [vmem:[%s1406_s7 + $0x180] sm:$0xff] }
  0x64   : > { %681 = vmatpush.msrb.mxu1 %v621_v15  ;;  %728 = vmatpush.msrb.mxu3 %v652_v17  ;;  %v593_v63 = vld [vmem:[%s1406_s7 + $0x8] sm:$0xff]  ;;  %v592_v2 = vld [vmem:[%s1406_s7] sm:$0xff]  ;;  %v480_v4 = vld [vmem:[%s1400_s6] sm:$0xf] }
  0x65   : > { %706 = vmatpush.msrb.mxu2 %v635_v16  ;;  %509 = vmatmul.f32.gmra.mxu0 %v1493_v10  ;;  %v609_v0 = vld [vmem:[%s1406_s7 + $0x88] sm:$0xff]  ;;  %v608_v3 = vld [vmem:[%s1406_s7 + $0x80] sm:$0xff]  ;;  %v482_v5 = vperm.slane %v480_v4, 0  ;;  %v483_v6 = vperm.slane %v480_v4, 1  ;;  %v484_v7 = vperm.slane %v480_v4, 2  ;;  %v485_v8 = vperm.slane %v480_v4, 3 }
  0x66   : > { %532 = vmatmul.f32.gmra.mxu1 %v1493_v10  ;;  %659 = vmatpush.msrb.mxu0 %v604_v18 }
  0x67   : > { %682 = vmatpush.msrb.mxu1 %v620_v19  ;;  %707 = vmatpush.msrb.mxu2 %v634_v20 }
  0x68   : > { %729 = vmatpush.msrb.mxu3 %v651_v21  ;;  %660 = vmatpush.msrb.mxu0 %v603_v22 }
  0x69   : > { %683 = vmatpush.msrb.mxu1 %v619_v23  ;;  %708 = vmatpush.msrb.mxu2 %v633_v24 }
  0x6a   : > { %730 = vmatpush.msrb.mxu3 %v650_v25  ;;  %661 = vmatpush.msrb.mxu0 %v602_v26 }
  0x6b   : > { %684 = vmatpush.msrb.mxu1 %v618_v27  ;;  %709 = vmatpush.msrb.mxu2 %v632_v28 }
  0x6c   : > { %731 = vmatpush.msrb.mxu3 %v649_v29  ;;  %662 = vmatpush.msrb.mxu0 %v601_v30 }
  0x6d   : > { %685 = vmatpush.msrb.mxu1 %v617_v31  ;;  %710 = vmatpush.msrb.mxu2 %v631_v32 }
  0x6e   : > { %732 = vmatpush.msrb.mxu3 %v648_v33  ;;  %663 = vmatpush.msrb.mxu0 %v600_v34 }
  0x6f   : > { %686 = vmatpush.msrb.mxu1 %v616_v35  ;;  %711 = vmatpush.msrb.mxu2 %v630_v36 }
  0x70   : > { %733 = vmatpush.msrb.mxu3 %v647_v37  ;;  %664 = vmatpush.msrb.mxu0 %v599_v38 }
  0x71   : > { %687 = vmatpush.msrb.mxu1 %v615_v39  ;;  %712 = vmatpush.msrb.mxu2 %v629_v40  ;;  %v590_v40 = vld [vmem:[#allocation2] sm:$0xff] }
  0x72   : > { %734 = vmatpush.msrb.mxu3 %v646_v41  ;;  %665 = vmatpush.msrb.mxu0 %v598_v42 }
  0x73   : > { %688 = vmatpush.msrb.mxu1 %v614_v43  ;;  %713 = vmatpush.msrb.mxu2 %v628_v44 }
  0x74   : > { %735 = vmatpush.msrb.mxu3 %v645_v45  ;;  %666 = vmatpush.msrb.mxu0 %v597_v46 }
  0x75   : > { %689 = vmatpush.msrb.mxu1 %v613_v47  ;;  %714 = vmatpush.msrb.mxu2 %v627_v48 }
  0x76   : > { %736 = vmatpush.msrb.mxu3 %v644_v49  ;;  %667 = vmatpush.msrb.mxu0 %v596_v50  ;;  %v591_v49 = vld [vmem:[#allocation2 + $0x8] sm:$0xff] }
  0x77   : > { %690 = vmatpush.msrb.mxu1 %v612_v51  ;;  %715 = vmatpush.msrb.mxu2 %v626_v52 }
  0x78   : > { %737 = vmatpush.msrb.mxu3 %v643_v53  ;;  %668 = vmatpush.msrb.mxu0 %v595_v54 }
  0x79   : > { %691 = vmatpush.msrb.mxu1 %v611_v55  ;;  %716 = vmatpush.msrb.mxu2 %v625_v56 }
  0x7a   : > { %738 = vmatpush.msrb.mxu3 %v642_v57  ;;  %669 = vmatpush.msrb.mxu0 %v594_v58 }
  0x7b   : > { %692 = vmatpush.msrb.mxu1 %v610_v59  ;;  %717 = vmatpush.msrb.mxu2 %v624_v60 }
  0x7c   : > { %739 = vmatpush.msrb.mxu3 %v641_v62  ;;  %670 = vmatpush.msrb.mxu0 %v593_v63 }
  0x7d   : > { %693 = vmatpush.msrb.mxu1 %v609_v0 }
  0x7e   : > { %740 = vmatpush.msrb.mxu3 %v640_v1  ;;  %671 = vmatpush.msrb.mxu0 %v592_v2 }
  0x7f   : > { %694 = vmatpush.msrb.mxu1 %v608_v3 }
  0xda   : > { %v507_v9 = vpop.f32.mrf.mxu0  ;;  %v530_v11 = vpop.f32.mrf.mxu1 }
  0xdb   : > { %v508_v12 = vadd.f32 %v507_v9, %v482_v5  ;;  %v531_v13 = vadd.f32 %v530_v11, %v483_v6 }
  0xdd   : > { %v553_v14 = vpop.f32.mrf.mxu2  ;;  %v576_v15 = vpop.f32.mrf.mxu3  ;;  %v582_v18 = vmax.f32 %v508_v12, 0.0  ;;  %v583_v19 = vmax.f32 %v531_v13, 0.0 }
  0xde   : > { %v554_v16 = vadd.f32 %v553_v14, %v484_v7  ;;  %v577_v17 = vadd.f32 %v576_v15, %v485_v8 }
  0xdf   : > { %672 = vmatmul.f32.vlgmr.msrb.gmra.mxu0 %v582_v18  ;;  %695 = vmatmul.f32.vlgmr.msrb.gmra.mxu1 %v583_v19 }
  0xe0   : > { %v584_v20 = vmax.f32 %v554_v16, 0.0  ;;  %v585_v21 = vmax.f32 %v577_v17, 0.0 }
  0xe2   : > { %718 = vmatmul.f32.vlgmr.msrb.gmra.mxu2 %v584_v20  ;;  %741 = vmatmul.f32.vlgmr.msrb.gmra.mxu3 %v585_v21  ;;  %v510_v22 = vpop.f32.mrf.mxu0 }
  0xe3   : > { %v533_v23 = vpop.f32.mrf.mxu1  ;;  %v511_v24 = vadd.f32 %v510_v22, %v482_v5 }
  0xe4   : > { %v534_v25 = vadd.f32 %v533_v23, %v483_v6 }
  0xe5   : > { %v556_v26 = vpop.f32.mrf.mxu2  ;;  %v579_v27 = vpop.f32.mrf.mxu3  ;;  %v586_v30 = vmax.f32 %v511_v24, 0.0 }
  0xe6   : > { %v557_v28 = vadd.f32 %v556_v26, %v484_v7  ;;  %v580_v29 = vadd.f32 %v579_v27, %v485_v8  ;;  %v587_v31 = vmax.f32 %v534_v25, 0.0 }
  0xe7   : > { %675 = vmatmul.f32.gmra.mxu0 %v586_v30 }
  0xe8   : > { %v588_v32 = vmax.f32 %v557_v28, 0.0  ;;  %v589_v33 = vmax.f32 %v580_v29, 0.0  ;;  %698 = vmatmul.f32.gmra.mxu1 %v587_v31 }
  0xea   : > { %721 = vmatmul.f32.gmra.mxu2 %v588_v32  ;;  %744 = vmatmul.f32.gmra.mxu3 %v589_v33 }
 0x15c   : > { %v673_v34 = vpop.f32.mrf.mxu0  ;;  %v696_v35 = vpop.f32.mrf.mxu1 }
 0x15d   : > { %v697_v36 = vadd.f32 %v696_v35, %v673_v34 }
 0x164   : > { %v676_v41 = vpop.f32.mrf.mxu0 }
 0x165   : > { %v719_v37 = vpop.f32.mrf.mxu2  ;;  %v742_v38 = vpop.f32.mrf.mxu3 }
 0x166   : > { %v720_v39 = vadd.f32 %v719_v37, %v697_v36  ;;  %v699_v42 = vpop.f32.mrf.mxu1 }
 0x167   : > { %v700_v45 = vadd.f32 %v699_v42, %v676_v41 }
 0x168   : > { %v743_v43 = vadd.f32 %v742_v38, %v720_v39 }
 0x16a   : > { %v748_v44 = vadd.f32 %v743_v43, %v590_v40 }
 0x16c   : > { %750 = vst [vmem:[#allocation2] sm:$0xff] %v748_v44 }
 0x16d   : > { %v722_v46 = vpop.f32.mrf.mxu2  ;;  %v745_v47 = vpop.f32.mrf.mxu3 }
 0x16e   : > { %v723_v48 = vadd.f32 %v722_v46, %v700_v45 }
 0x170   : > { %v746_v50 = vadd.f32 %v745_v47, %v723_v48  ;;  %755 = sbr.rel (%p977_p0) target bundleno = 654 (0x28e), region = 68 }
 0x172   : > { %v749_v51 = vadd.f32 %v746_v50, %v591_v49 }
 0x174   : > { %751 = vst [vmem:[#allocation2 + $0x8] sm:$0xff] %v749_v51 }
 0x175   : > { %v756_v52 = vld [vmem:[#allocation2] sm:$0xff]  ;;  %v1258_v59 = vmov 128.0  }
 0x176   : > { %v1065_v53 = vld [vmem:[%s1594_s4] ss:$0 sm:$0xff]  ;;  %1068 = vrcp.f32 %v1258_v59 }
 0x177   : > { %v762_v54 = vadd.f32 %v1065_v53, %v756_v52  ;;  %v1066_v24 = vld [vmem:[%s1613_s23] ss:$0 sm:$0xff] }
 0x178   : > { %v1067_v27 = vld [vmem:[%s1614_s9] ss:$0 sm:$0xff] }
 0x179   : > { %v764_v56 = vadd.f32 %v762_v54, %v1472_v61 }
 0x17b   : > { %v757_v55 = vld [vmem:[#allocation2 + $0x8] sm:$0xff]  ;;  %768 = vadd.xlane.f32.xlu0 %v764_v56 }
 0x17c   : > { %v763_v57 = vadd.f32 %v1065_v53, %v757_v55  ;;  %v1069_v60 = vpop.eup %1068 }
 0x17d   : > { %v773_v62 = vmul.f32 128.0, %v1069_v60  ;;  %vm777_vm0 = vweird.f32 %v1069_v60 }
 0x17e   : > { %v765_v58 = vadd.f32 %v763_v57, %v1493_v10 }
 0x17f   : > { %v774_v63 = vsub.f32 1.0, %v773_v62 }
 0x181   : > { %v775_v0 = vmul.f32 %v1069_v60, %v774_v63 }
 0x183   : > { %770 = vadd.xlane.f32.xlu0 %v765_v58  ;;  %v776_v1 = vadd.f32 %v1069_v60, %v775_v0 }
 0x185   : > { %v778_v2 = vsel %vm777_vm0, %v1069_v60, %v776_v1 }
 0x1ee   : > { %v769_v3 = vpop.xlane.xlu0 %768 }
 0x1ef   : > { %v779_v4 = vmul.f32 %v778_v2, %v769_v3 }
 0x1f1   : > { %v781_v5 = vsub.f32 %v764_v56, %v779_v4 }
 0x1f3   : > { %v783_v6 = vmul.f32 %v781_v5, %v781_v5 }
 0x1f5   : > { %785 = vadd.xlane.f32.xlu1 %v783_v6 }
 0x1f6   : > { %v771_v61 = vpop.xlane.xlu0 %770 }
 0x1f7   : > { %v780_v7 = vmul.f32 %v778_v2, %v771_v61 }
 0x1f9   : > { %v782_v8 = vsub.f32 %v765_v58, %v780_v7 }
 0x1fb   : > { %v784_v9 = vmul.f32 %v782_v8, %v782_v8 }
 0x1fd   : > { %787 = vadd.xlane.f32.xlu1 %v784_v9 }
 0x268   : > { %v786_v10 = vpop.xlane.xlu1 %785 }
 0x269   : > { %v789_v11 = vmul.f32 %v786_v10, %v778_v2 }
 0x26b   : > { %v791_v12 = vadd.f32 1e-05, %v789_v11 }
 0x26d   : > { %1070 = vrsqrt.f32 %v791_v12  ;;  %vm799_vm2 = vweird.f32 %v791_v12 }
 0x270   : > { %v788_v13 = vpop.xlane.xlu1 %787 }
 0x271   : > { %v790_v14 = vmul.f32 %v788_v13, %v778_v2 }
 0x273   : > { %v1071_v15 = vpop.eup %1070  ;;  %v792_v16 = vadd.f32 1e-05, %v790_v14 }
 0x274   : > { %v794_v17 = vmul.f32 %v1071_v15, %v791_v12  ;;  %vm800_vm1 = vweird.f32 %v1071_v15 }
 0x275   : > { %1072 = vrsqrt.f32 %v792_v16  ;;  %vm801_vm3 = vmor %vm799_vm2, %vm800_vm1  ;;  %vm809_vm5 = vweird.f32 %v792_v16 }
 0x276   : > { %v795_v18 = vmul.f32 %v1071_v15, %v794_v17 }
 0x278   : > { %v796_v19 = vmul.f32 0.5, %v795_v18 }
 0x27a   : > { %v797_v20 = vsub.f32 1.5, %v796_v19 }
 0x27b   : > { %v1073_v21 = vpop.eup %1072 }
 0x27c   : > { %v798_v22 = vmul.f32 %v1071_v15, %v797_v20  ;;  %v804_v23 = vmul.f32 %v1073_v21, %v792_v16  ;;  %vm810_vm4 = vweird.f32 %v1073_v21 }
 0x27d   : > { %vm811_vm6 = vmor %vm809_vm5, %vm810_vm4 }
 0x27e   : > { %v802_v25 = vsel %vm801_vm3, %v1071_v15, %v798_v22  ;;  %v805_v26 = vmul.f32 %v1073_v21, %v804_v23 }
 0x27f   : > { %v813_v28 = vmul.f32 %v802_v25, %v781_v5 }
 0x280   : > { %v806_v29 = vmul.f32 0.5, %v805_v26 }
 0x281   : > { %v818_v30 = vmul.f32 %v1066_v24, %v813_v28 }
 0x282   : > { %v807_v31 = vsub.f32 1.5, %v806_v29 }
 0x283   : > { %v823_v32 = vadd.f32 %v1067_v27, %v818_v30 }
 0x284   : > { %v808_v33 = vmul.f32 %v1073_v21, %v807_v31 }
 0x285   : > { %825 = vst [vmem:[#allocation9] sm:$0xff] %v823_v32 }
 0x286   : > { %v812_v34 = vsel %vm811_vm6, %v1073_v21, %v808_v33 }
 0x287   : > { %v814_v35 = vmul.f32 %v812_v34, %v782_v8 }
 0x289   : > { %v819_v36 = vmul.f32 %v1066_v24, %v814_v35 }
 0x28b   : > { %v824_v37 = vadd.f32 %v1067_v27, %v819_v36 }
 0x28d   : > { %826 = vst [vmem:[#allocation9 + $0x8] sm:$0xff] %v824_v37 }
 0x28e PF: > { %p1005_p1 = scmp.eq.s32.totalorder %s1331_s30, 1  ;;  %s1615_s16 = sld [smem:[#allocation20_spill]] }
 0x28f   : > { %s1259_s19 = smov [#allocation9]   ;;  %s1260_s22 = smov 128  }
 0x290   : > { %s835_s20 = sshll.u32 %s1259_s19, 4  ;;  %s1261_s2 = smov 8   ;;  %s836_s20 = int_to_ptr.vmem [resolvable:$true] %s835_s20 }
 0x294   : > { %s837_s13 = sshll.u32 %s1615_s16, 4  ;;  %s838_s13 = int_to_ptr.hbm [resolvable:$true] %s837_s13 }
 0x295   : > { %991 = dma.vmem_to_hbm [thread:$0]  (%p1005_p1), %s836_s20, 256, %s838_s13, [#allocation5], %s1260_s22, %s1260_s22, %s1261_s2  }
 0x296   : > { %1225 = dma.done.wait (%p1005_p1), [#allocation5], 256  }
 0x297   : > { %1227 = vsyncadd (%p1005_p1), [#allocation5], 4294967040 }
 0x298 PF: > { %s1616_s26 = sld [smem:[#allocation14_spill]]  ;;  %s1620_s24 = smov %s1234_s25 }
 0x299   : > { %s1617_s5 = sld [smem:[#allocation13_spill]]  ;;  %s1622_s27 = smov %s1246_s28 }
 0x29a   : > { %s1619_s30 = sld [smem:[#allocation15_spill]] }
 0x29e   : > { %s24_s29 = sadd.s32 1, %s1616_s26   ;;  %s1618_s26 = sld [smem:[#allocation16_spill]] }
 0x29f   : > { %p21_p2 = scmp.ge.s32.totalorder %s24_s29, 4   ;;  %s1621_s25 = smov %s1617_s5 }
 0x2a0   : > { %s1623_s28 = smov %s1619_s30 }
 0x2a1   :  { %23 = sbr.rel (!%p21_p2) target bundleno = 12 (0xc), region = 121 }
 0x2a6   :  { %854 = vsyncpa [#allocation4], 1 }
 0x2a7   :  { %856 = vsyncpa [#allocation4 + $0x1], 1 }
 0x2a8   :  { %857 = vsyncpa [#allocation7], 1 }
 0x2a9   :  { %859 = vsyncpa [#allocation7 + $0x1], 1 }
 0x2aa   :  { %860 = vsyncpa [#allocation5], 1 }
 0x2ab   :  { %862 = vsyncpa [#allocation5 + $0x1], 1 }

// kernel: decoder_layer_forward.6
= control target key start
LH: loop header
LB: loop body
LE: loop exit
PB: predicated region body
PF: predicated region fallthrough
CT: control target
= control target key end

     0   :  { %13 = vsyncpa [#allocation5], 0  ;;  %s1369_s0 = inlined_call_operand.vmem [shape: f32[2,8,128], index: 0, kind: input, shape index: {}]   ;;  %s1370_s1 = inlined_call_operand.vmem [shape: f32[2,16,256], index: 1, kind: input, shape index: {}]   ;;  %s1371_s2 = inlined_call_operand.hbm [shape: f32[128,128], index: 2, kind: input, shape index: {}]   ;;  %s1372_s3 = inlined_call_operand.vmem [shape: f32[1,128], index: 3, kind: input, shape index: {}]   ;;  %s1373_s4 = inlined_call_operand.hbm [shape: f32[128,128], index: 4, kind: input, shape index: {}]   ;;  %s1374_s5 = inlined_call_operand.vmem [shape: f32[1,128], index: 5, kind: input, shape index: {}]   ;;  %s1375_s6 = inlined_call_operand.vmem [shape: f32[1,128], index: 6, kind: input, shape index: {}]   ;;  %s1376_s7 = inlined_call_operand.vmem [shape: f32[1,128], index: 7, kind: input, shape index: {}]   ;;  %s1377_s8 = inlined_call_operand.vmem [shape: f32[2,8,128], index: 8, kind: output, shape index: {}]  }
   0x1   :  { %14 = vsyncpa [#allocation7], 0  ;;  %s1223_s27 = smov 0   ;;  %s1225_s28 = smov 0  }
   0x2   :  { %s1227_s29 = smov 0  }
   0x3 LB: > { %s956_s30 = sadd.s32 4294967295, %s1168_s29   ;;  %s32_s9 = sadd.s32 1, %s1164_s28  ;;  %s1168_s29 = sphi %s1227_s29, %s20_s29   ;;  %s1164_s28 = sphi %s1225_s28, %s1381_s28   ;;  %s1160_s27 = sphi %s1223_s27, %s1380_s27  }
   0x4   : > { %p34_p0 = scmp.ge.s32.totalorder %s32_s9, 2  ;;  %p958_p1 = scmp.ge.s32.totalorder %s1168_s29, 1 }
   0x5   : > { %p245_p2 = scmp.lt.s32.totalorder %s1168_s29, 3  ;;  %p1248_p4 = scmp.eq.s32.totalorder %s956_s30, 0 }
   0x6   : > { %s1383_s9 = smov (%p34_p0, %s32_s9), 0  ;;  %s256_s14 = sshll.u32 %s1371_s2, 4  ;;  %s257_s14 = int_to_ptr.hbm [resolvable:$true] %s256_s14 }
   0x7   : > { %p1244_p3 = pnand %p958_p1, %p245_p2  ;;  %s1170_s15 = smov [#allocation4]  }
   0x8   : > { %s258_s16 = sshll.u32 %s1170_s15, 4  ;;  %s273_s19 = sshll.u32 %s1373_s4, 4  ;;  %s259_s16 = int_to_ptr.vmem [resolvable:$true] %s258_s16  ;;  %s274_s19 = int_to_ptr.hbm [resolvable:$true] %s273_s19 }
   0x9   : > { %p996_p5 = pneg %p1244_p3  ;;  %s1171_s20 = smov 128  }
   0xa   : > { %s1172_s21 = smov 8   ;;  %s1173_s22 = smov [#allocation6]  }
   0xb   : > { %p997_p6 = pnand %p1248_p4, %p996_p5  ;;  %s275_s23 = sshll.u32 %s1173_s22, 4  ;;  %s276_s23 = int_to_ptr.vmem [resolvable:$true] %s275_s23 }
   0xc   : > { %318 = sbr.rel (%p1244_p3) target bundleno = 1633 (0x661), region = 52 }
   0xd   : > { %999 = dma.hbm_to_vmem [thread:$0]  (!%p997_p6), %s257_s14, 2048, %s259_s16, [#allocation5], %s1171_s20, %s1171_s20, %s1172_s21  }
   0xe   : > { %1002 = dma.hbm_to_vmem [thread:$0]  (!%p997_p6), %s274_s19, 2048, %s276_s23, [#allocation7], %s1171_s20, %s1171_s20, %s1172_s21  }
  0x11   : > { %1151 = dma.done.wait (%p1248_p4), [#allocation5], 2048  }
  0x12   : > { %1153 = vsyncadd (%p1248_p4), [#allocation5], 4294965248 }
  0x13   : > { %1155 = dma.done.wait (%p1248_p4), [#allocation7], 2048  }
  0x14   : > { %1157 = vsyncadd (%p1248_p4), [#allocation7], 4294965248  ;;  %p367_p7 = scmp.lt.s32.totalorder %s1160_s27, 1  ;;  %v402_v0 = vld [vmem:[#allocation4 + $0x78] sm:$0xff]  ;;  %v401_v1 = vld [vmem:[#allocation4 + $0x70] sm:$0xff]  ;;  %vm434_vm0 = vcmask 261120  }
  0x15   : > { %407 = vmatpush.msra.mxu0 %v402_v0  ;;  %v400_v2 = vld [vmem:[#allocation4 + $0x68] sm:$0xff]  ;;  %v399_v3 = vld [vmem:[#allocation4 + $0x60] sm:$0xff]  ;;  %v398_v5 = vld [vmem:[#allocation4 + $0x58] sm:$0xff]  ;;  %s1174_s10 = smov 96   ;;  %s1175_s17 = smov 64   ;;  %vm464_vm1 = vcmask 130048  }
  0x16   : > { %s1385_s27 = smov (!%p367_p7, %s1160_s27), 1  ;;  %v397_v7 = vld [vmem:[#allocation4 + $0x50] sm:$0xff]  ;;  %v396_v8 = vld [vmem:[#allocation4 + $0x48] sm:$0xff]  ;;  %v395_v9 = vld [vmem:[#allocation4 + $0x40] sm:$0xff]  ;;  %s1176_s18 = smov 32   ;;  %vm587_vm2 = vcmask 523520  }
  0x17   : > { %s987_s24 = sshll.u32 %s1385_s27, 5  ;;  %408 = vmatpush.msra.mxu0 %v401_v1  ;;  %v394_v10 = vld [vmem:[#allocation4 + $0x38] sm:$0xff]  ;;  %v393_v11 = vld [vmem:[#allocation4 + $0x30] sm:$0xff]  ;;  %v392_v12 = vld [vmem:[#allocation4 + $0x28] sm:$0xff]  ;;  %s965_s11 = sshll.u32 %s1385_s27, 3  ;;  %vm676_vm3 = vcmask 785920  }
  0x18   : > { %s1280_s30 = scalar_lea.vmem %s1370_s1, %s987_s24  ;;  %v391_v13 = vld [vmem:[#allocation4 + $0x20] sm:$0xff]  ;;  %v390_v14 = vld [vmem:[#allocation4 + $0x18] sm:$0xff]  ;;  %v389_v15 = vld [vmem:[#allocation4 + $0x10] sm:$0xff]  ;;  %s373_s14 = scalar_lea.vmem %s1369_s0, %s965_s11  ;;  %vm765_vm4 = vcmask 1048320  }
  0x19   : > { %409 = vmatpush.msra.mxu0 %v400_v2  ;;  %v502_v4 = vld [vmem:[%s1280_s30] sm:$0xff]  ;;  %v431_v6 = vld [vmem:[%s1280_s30 + $0x10] sm:$0xff]  ;;  %v387_v17 = vld [vmem:[#allocation4] sm:$0xff] }
  0x1a   : > { %511 = vrot.lane.b32.xlu1 %v502_v4, %s1174_s10  ;;  %969 = vmatpush.xpose.msk.msra.mxu1 %vm434_vm0, %v431_v6  ;;  %v388_v16 = vld [vmem:[#allocation4 + $0x8] sm:$0xff]  ;;  %v1293_v18 = vld [vmem:[%s373_s14] sm:$0xff]  ;;  %v433_v25 = vld [vmem:[%s1280_s30 + $0x18] sm:$0xff] }
  0x1b   : > { %410 = vmatpush.msra.mxu0 %v399_v3  ;;  %v1054_v19 = vld [vmem:[%s1372_s3] ss:$0 sm:$0xff]  ;;  %v432_v26 = vld [vmem:[%s1280_s30 + $0x8] sm:$0xff]  ;;  %492 = vmatpush.msra.mxu2 %v433_v25  ;;  %s385_s30 = scalar_lea.vmem %s1377_s8, %s965_s11 }
  0x1c   : > { %v1039_v30 = vpack.i.bf16 %v432_v26, %v433_v25 }
  0x1d   : > { %411 = vmatpush.msra.mxu0 %v398_v5  ;;  %493 = vmatpush.msra.mxu2 %v432_v26  ;;  %v783_v26 = vld [vmem:[#allocation6 + $0x78] sm:$0xff] }
  0x1e   : > { %970 = vmatpush.xpose.msk.msra.mxu1 %vm434_vm0, %v502_v4  ;;  %1040 = vrot.lane.b32.xlu2 %v1039_v30, %s1174_s10 }
  0x1f   : > { %412 = vmatpush.msra.mxu0 %v397_v7  ;;  %788 = vmatpush.msra.mxu3 %v783_v26 }
  0x21   : > { %413 = vmatpush.msra.mxu0 %v396_v8 }
  0x23   : > { %414 = vmatpush.msra.mxu0 %v395_v9 }
  0x25   : > { %415 = vmatpush.msra.mxu0 %v394_v10 }
  0x27   : > { %416 = vmatpush.msra.mxu0 %v393_v11 }
  0x29   : > { %417 = vmatpush.msra.mxu0 %v392_v12 }
  0x2b   : > { %418 = vmatpush.msra.mxu0 %v391_v13 }
  0x2d   : > { %419 = vmatpush.msra.mxu0 %v390_v14 }
  0x2f   : > { %420 = vmatpush.msra.mxu0 %v389_v15 }
  0x31   : > { %421 = vmatpush.msra.mxu0 %v388_v16 }
  0x33   : > { %422 = vmatpush.msra.mxu0 %v387_v17 }
  0x34   : > { %423 = vmatmul.f32.vlgmr.msra.gmra.mxu0 %v1293_v18 }
  0x78   : > { %v1041_v36 = vpop.permute.xlu2 %1040 }
  0x79   : > { %v1043_v38 = vunpack.i.h.bf16 %v1041_v36  ;;  %v1042_v39 = vunpack.i.l.bf16 %v1041_v36  ;;  %v773_v36 = vld [vmem:[#allocation6 + $0x28] sm:$0xff] }
  0x8c   : > { %v512_v32 = vpop.permute.xlu1 %511 }
  0xb1   : > { %v424_v20 = vpop.f32.mrf.mxu0 }
  0xb2   : > { %v425_v21 = vadd.f32 %v1054_v19, %v424_v20 }
  0xb4   : > { %v429_v22 = vmul.f32 0.17677669, %v425_v21 }
  0xb6   : > { %507 = vrot.lane.b32.xlu1 %v429_v22, %s1174_s10  ;;  %971 = vmatmul.msk.f32.vlgmr.msra.gmra.mxu1 %vm434_vm0, %v429_v22 }
  0xbe   : > { %602 = vrot.lane.b32.xlu1 %v431_v6, %s1175_s17 }
  0xc6   : > { %691 = vrot.lane.b32.xlu1 %v431_v6, %s1176_s18 }
  0xce   : > { %689 = vrot.lane.b32.xlu1 %v502_v4, %s1176_s18 }
 0x128   : > { %v508_v34 = vpop.permute.xlu1 %507 }
 0x130   : > { %v603_v37 = vpop.permute.xlu1 %602 }
 0x131   : > { %977 = vmatpush.xpose.msk.msrb.mxu1 %vm434_vm0, %v603_v37  ;;  %v772_v37 = vld [vmem:[#allocation6 + $0x20] sm:$0xff] }
 0x133   : > { %v461_v23 = vpop.f32.mrf.mxu1 }
 0x134   : > { %v465_v24 = vsel %vm464_vm1, %v461_v23, -inf }
 0x135   : > { %466 = vmax.xlane.f32.xlu0 %v465_v24 }
 0x138   : > { %v692_v43 = vpop.permute.xlu1 %691 }
 0x140   : > { %v690_v45 = vpop.permute.xlu1 %689 }
 0x149   : > { %513 = vrot.lane.b32.xlu0 %v431_v6, %s1174_s10 }
 0x151   : > { %600 = vrot.lane.b32.xlu0 %v502_v4, %s1175_s17 }
 0x159   : > { %685 = vrot.lane.b32.xlu0 %v429_v22, %s1176_s18 }
 0x161   : > { %1045 = vrot.lane.b32.xlu0 %v1039_v30, %s1175_s17 }
 0x169   : > { %1050 = vrot.lane.b32.xlu0 %v1039_v30, %s1176_s18  ;;  %v779_v30 = vld [vmem:[#allocation6 + $0x58] sm:$0xff] }
 0x1a8   : > { %v467_v27 = vpop.xlane.xlu0 %466 }
 0x1a9   : > { %v468_v28 = vsub.f32 %v461_v23, %v467_v27  ;;  %v782_v27 = vld [vmem:[#allocation6 + $0x70] sm:$0xff] }
 0x1aa   : > { %789 = vmatpush.msra.mxu3 %v782_v27 }
 0x1ab   : > { %v469_v29 = vmul.f32 1.442695, %v468_v28  ;;  %v781_v28 = vld [vmem:[#allocation6 + $0x68] sm:$0xff] }
 0x1ac   : > { %790 = vmatpush.msra.mxu3 %v781_v28 }
 0x1ad   : > { %1058 = vpow2.f32 %v469_v29  ;;  %v780_v29 = vld [vmem:[#allocation6 + $0x60] sm:$0xff] }
 0x1ae   : > { %791 = vmatpush.msra.mxu3 %v780_v29 }
 0x1b0   : > { %792 = vmatpush.msra.mxu3 %v779_v30 }
 0x1b3   : > { %v1312_v31 = vpop.eup %1058 }
 0x1b4   : > { %972 = vmatmul.msk.f32.vlgmr.msra.gmra.mxu2 %vm464_vm1, %v1312_v31  ;;  %v471_v7 = vsel %vm464_vm1, %v1312_v31, 0.0  ;;  %v778_v31 = vld [vmem:[#allocation6 + $0x50] sm:$0xff] }
 0x1b5   : > { %793 = vmatpush.msra.mxu3 %v778_v31 }
 0x1bb   : > { %v514_v33 = vpop.permute.xlu0 %513 }
 0x1bc   : > { %973 = vmatpush.xpose.msk.msrb.mxu2 %vm434_vm0, %v514_v33  ;;  %v776_v33 = vld [vmem:[#allocation6 + $0x40] sm:$0xff] }
 0x1c0   : > { %974 = vmatpush.xpose.msk.msrb.mxu2 %vm434_vm0, %v512_v32  ;;  %v777_v32 = vld [vmem:[#allocation6 + $0x48] sm:$0xff] }
 0x1c1   : > { %794 = vmatpush.msra.mxu3 %v777_v32 }
 0x1c3   : > { %975 = vmatmul.msk.f32.vlgmr.msrb.gmra.mxu2 %vm434_vm0, %v508_v34  ;;  %v601_v40 = vpop.permute.xlu0 %600  ;;  %v775_v34 = vld [vmem:[#allocation6 + $0x38] sm:$0xff]  ;;  %795 = vmatpush.msra.mxu3 %v776_v33 }
 0x1c4   : > { %576 = vmatpush.msra.mxu2 %v1042_v39  ;;  %978 = vmatpush.xpose.msk.msrb.mxu1 %vm434_vm0, %v601_v40  ;;  %v771_v39 = vld [vmem:[#allocation6 + $0x18] sm:$0xff]  ;;  %v770_v40 = vld [vmem:[#allocation6 + $0x10] sm:$0xff] }
 0x1c5   : > { %796 = vmatpush.msra.mxu3 %v775_v34 }
 0x1c6   : > { %577 = vmatpush.msra.mxu2 %v1043_v38 }
 0x1c8   : > { %981 = vmatpush.xpose.msk.msrb.mxu2 %vm434_vm0, %v692_v43 }
 0x1cb   : > { %v686_v44 = vpop.permute.xlu0 %685 }
 0x1cc   : > { %982 = vmatpush.xpose.msk.msrb.mxu2 %vm434_vm0, %v690_v45  ;;  %v1055_v45 = vld [vmem:[%s1374_s5] ss:$0 sm:$0xff] }
 0x1d3   : > { %v1046_v46 = vpop.permute.xlu0 %1045 }
 0x1d4   : > { %v1048_v47 = vunpack.i.h.bf16 %v1046_v46  ;;  %v1047_v48 = vunpack.i.l.bf16 %v1046_v46 }
 0x1d6   : > { %665 = vmatpush.msra.mxu1 %v1047_v48 }
 0x1d8   : > { %666 = vmatpush.msra.mxu1 %v1048_v47 }
 0x1db   : > { %v1051_v52 = vpop.permute.xlu0 %1050 }
 0x1dc   : > { %v1052_v53 = vunpack.i.l.bf16 %v1051_v52  ;;  %v1053_v55 = vunpack.i.h.bf16 %v1051_v52 }
 0x237   : > { %v1320_v35 = vpop.f32.mrf.mxu2 }
 0x246   : > { %v538_v41 = vpop.f32.mrf.mxu2 }
 0x247   : > { %v541_v42 = vsel %vm464_vm1, %v538_v41, -inf }
 0x248   : > { %542 = vmax.xlane.f32.xlu2 %v541_v42  ;;  %v768_v42 = vld [vmem:[#allocation6] sm:$0xff] }
 0x260   : > { %596 = vrot.lane.b32.xlu2 %v429_v22, %s1175_s17 }
 0x2bb   : > { %v543_v49 = vpop.xlane.xlu2 %542 }
 0x2bc   : > { %v544_v50 = vsub.f32 %v538_v41, %v543_v49  ;;  %v769_v41 = vld [vmem:[#allocation6 + $0x8] sm:$0xff]  ;;  %v1177_v49 = vmov 128.0  }
 0x2be   : > { %v545_v51 = vmul.f32 1.442695, %v544_v50 }
 0x2c0   : > { %1060 = vpow2.f32 %v545_v51 }
 0x2c3   : > { %v597_v54 = vpop.permute.xlu2 %596 }
 0x2c4   : > { %979 = vmatmul.msk.f32.vlgmr.msrb.gmra.mxu1 %vm434_vm0, %v597_v54 }
 0x2c5   : > { %754 = vmatpush.msrb.mxu1 %v1052_v53 }
 0x2c6   : > { %v1061_v56 = vpop.eup %1060 }
 0x2c7   : > { %976 = vmatmul.msk.f32.vlgmr.msra.gmra.mxu2 %vm464_vm1, %v1061_v56  ;;  %v547_v57 = vsel %vm464_vm1, %v1061_v56, 0.0  ;;  %755 = vmatpush.msrb.mxu1 %v1053_v55 }
 0x2c8   : > { %548 = vadd.xlane.f32.xlu0 %v547_v57 }
 0x2cf   : > { %983 = vmatmul.msk.f32.vlgmr.msrb.gmra.mxu2 %vm434_vm0, %v686_v44 }
 0x33b   : > { %v549_v10 = vpop.xlane.xlu0 %548 }
 0x341   : > { %v627_v58 = vpop.f32.mrf.mxu1 }
 0x342   : > { %v630_v59 = vsel %vm464_vm1, %v627_v58, -inf }
 0x343   : > { %631 = vmax.xlane.f32.xlu1 %v630_v59 }
 0x34a   : > { %v579_v60 = vpop.f32.mrf.mxu2 }
 0x352   : > { %v716_v61 = vpop.f32.mrf.mxu2 }
 0x353   : > { %v719_v62 = vsel %vm464_vm1, %v716_v61, -inf }
 0x354   : > { %720 = vmax.xlane.f32.xlu2 %v719_v62 }
 0x3b6   : > { %v632_v63 = vpop.xlane.xlu1 %631 }
 0x3b7   : > { %v633_v0 = vsub.f32 %v627_v58, %v632_v63 }
 0x3b9   : > { %v634_v1 = vmul.f32 1.442695, %v633_v0 }
 0x3bb   : > { %1062 = vpow2.f32 %v634_v1 }
 0x3c1   : > { %v1063_v2 = vpop.eup %1062 }
 0x3c2   : > { %980 = vmatmul.msk.f32.vlgmr.msra.gmra.mxu1 %vm464_vm1, %v1063_v2  ;;  %v636_v3 = vsel %vm464_vm1, %v1063_v2, 0.0 }
 0x3c3   : > { %637 = vadd.xlane.f32.xlu2 %v636_v3 }
 0x3c7   : > { %v721_v4 = vpop.xlane.xlu2 %720 }
 0x3c8   : > { %v722_v5 = vsub.f32 %v716_v61, %v721_v4  ;;  %v1056_v4 = vld [vmem:[%s1375_s6] ss:$0 sm:$0xff] }
 0x3ca   : > { %v723_v6 = vmul.f32 1.442695, %v722_v5 }
 0x3cb   : > { %472 = vadd.xlane.f32.xlu2 %v471_v7 }
 0x3cc   : > { %1064 = vpow2.f32 %v723_v6  ;;  %v1057_v6 = vld [vmem:[%s1376_s7] ss:$0 sm:$0xff] }
 0x3cd   : > { %1066 = vrcp.f32 %v549_v10 }
 0x3d2   : > { %v1065_v8 = vpop.eup %1064 }
 0x3d3   : > { %984 = vmatmul.msk.f32.vlgmr.msrb.gmra.mxu1 %vm464_vm1, %v1065_v8  ;;  %v725_v9 = vsel %vm464_vm1, %v1065_v8, 0.0  ;;  %v1067_v11 = vpop.eup %1066 }
 0x3d4   : > { %726 = vadd.xlane.f32.xlu1 %v725_v9  ;;  %v582_v12 = vmul.f32 %v1067_v11, %v579_v60 }
 0x3ed   : > { %584 = vrot.lane.b32.xlu1 %v582_v12, %s1176_s18 }
 0x436   : > { %v638_v13 = vpop.xlane.xlu2 %637 }
 0x437   : > { %1068 = vrcp.f32 %v638_v13 }
 0x43d   : > { %v1069_v15 = vpop.eup %1068 }
 0x43e   : > { %v473_v14 = vpop.xlane.xlu2 %472 }
 0x43f   : > { %1070 = vrcp.f32 %v473_v14  ;;  %v668_v16 = vpop.f32.mrf.mxu1 }
 0x440   : > { %v671_v17 = vmul.f32 %v1069_v15, %v668_v16 }
 0x442   : > { %673 = vrot.lane.b32.xlu2 %v671_v17, %s1175_s17 }
 0x445   : > { %v1071_v19 = vpop.eup %1070 }
 0x446   : > { %v498_v20 = vmul.f32 %v1071_v19, %v1320_v35  ;;  %v774_v35 = vld [vmem:[#allocation6 + $0x30] sm:$0xff] }
 0x447   : > { %v727_v21 = vpop.xlane.xlu1 %726  ;;  %797 = vmatpush.msra.mxu3 %v774_v35 }
 0x448   : > { %499 = vst.msk [vmem:[#allocation3] sm:$0xff] %vm434_vm0, %v498_v20  ;;  %1072 = vrcp.f32 %v727_v21 }
 0x449   : > { %798 = vmatpush.msra.mxu3 %v773_v36  ;;  %1074 = vrcp.f32 %v1177_v49 }
 0x44b   : > { %799 = vmatpush.msra.mxu3 %v772_v37 }
 0x44d   : > { %800 = vmatpush.msra.mxu3 %v771_v39 }
 0x44e   : > { %v1073_v22 = vpop.eup %1072 }
 0x44f   : > { %801 = vmatpush.msra.mxu3 %v770_v40  ;;  %v1075_v50 = vpop.eup %1074 }
 0x450   : > { %v757_v23 = vpop.f32.mrf.mxu1  ;;  %v814_v51 = vmul.f32 128.0, %v1075_v50  ;;  %vm818_vm5 = vweird.f32 %v1075_v50 }
 0x451   : > { %v760_v24 = vmul.f32 %v1073_v22, %v757_v23  ;;  %802 = vmatpush.msra.mxu3 %v769_v41 }
 0x452   : > { %v815_v52 = vsub.f32 1.0, %v814_v51 }
 0x453   : > { %762 = vrot.lane.b32.xlu0 %v760_v24, %s1174_s10  ;;  %803 = vmatpush.msra.mxu3 %v768_v42 }
 0x454   : > { %v816_v53 = vmul.f32 %v1075_v50, %v815_v52 }
 0x456   : > { %v817_v54 = vadd.f32 %v1075_v50, %v816_v53 }
 0x458   : > { %v819_v55 = vsel %vm818_vm5, %v1075_v50, %v817_v54 }
 0x45f   : > { %v585_v25 = vpop.permute.xlu1 %584 }
 0x460   : > { %588 = vst.msk [vmem:[#allocation3] sm:$0xff] %vm587_vm2, %v585_v25 }
 0x49c   : > { %v674_v38 = vpop.permute.xlu2 %673 }
 0x49d   : > { %677 = vst.msk [vmem:[#allocation3] sm:$0xff] %vm676_vm3, %v674_v38 }
 0x4c5   : > { %v763_v43 = vpop.permute.xlu0 %762 }
 0x4c6   : > { %766 = vst.msk [vmem:[#allocation3] sm:$0xff] %vm765_vm4, %v763_v43 }
 0x4cd   : > { %v767_v44 = vld [vmem:[#allocation3] sm:$0xff] }
 0x4ce   : > { %804 = vmatmul.f32.vlgmr.msra.gmra.mxu3 %v767_v44 }
 0x551   : > { %v805_v46 = vpop.f32.mrf.mxu3 }
 0x552   : > { %v806_v47 = vadd.f32 %v1055_v45, %v805_v46 }
 0x554   : > { %v808_v48 = vadd.f32 %v806_v47, %v1293_v18 }
 0x556   : > { %811 = vadd.xlane.f32.xlu1 %v808_v48 }
 0x5c9   : > { %v812_v56 = vpop.xlane.xlu1 %811 }
 0x5ca   : > { %v820_v57 = vmul.f32 %v819_v55, %v812_v56 }
 0x5cc   : > { %v821_v58 = vsub.f32 %v808_v48, %v820_v57 }
 0x5ce   : > { %v822_v59 = vmul.f32 %v821_v58, %v821_v58 }
 0x5d0   : > { %823 = vadd.xlane.f32.xlu2 %v822_v59 }
 0x643   : > { %v824_v60 = vpop.xlane.xlu2 %823 }
 0x644   : > { %v825_v61 = vmul.f32 %v824_v60, %v819_v55 }
 0x646   : > { %v826_v62 = vadd.f32 1e-05, %v825_v61 }
 0x648   : > { %1076 = vrsqrt.f32 %v826_v62  ;;  %vm833_vm7 = vweird.f32 %v826_v62 }
 0x64e   : > { %v1077_v18 = vpop.eup %1076 }
 0x64f   : > { %v828_v63 = vmul.f32 %v1077_v18, %v826_v62  ;;  %vm834_vm6 = vweird.f32 %v1077_v18 }
 0x650   : > { %vm835_vm8 = vmor %vm833_vm7, %vm834_vm6 }
 0x651   : > { %v829_v0 = vmul.f32 %v1077_v18, %v828_v63 }
 0x653   : > { %v830_v1 = vmul.f32 0.5, %v829_v0 }
 0x655   : > { %v831_v2 = vsub.f32 1.5, %v830_v1 }
 0x657   : > { %v832_v3 = vmul.f32 %v1077_v18, %v831_v2 }
 0x659   : > { %v836_v5 = vsel %vm835_vm8, %v1077_v18, %v832_v3 }
 0x65a   : > { %v837_v7 = vmul.f32 %v836_v5, %v821_v58 }
 0x65c   : > { %v841_v8 = vmul.f32 %v1056_v4, %v837_v7 }
 0x65e   : > { %v845_v9 = vadd.f32 %v1057_v6, %v841_v8 }
 0x660   : > { %846 = vst [vmem:[%s385_s30] sm:$0xff] %v845_v9 }
 0x661 PF: > { %s20_s29 = sadd.s32 1, %s1168_s29   ;;  %s1380_s27 = smov %s1164_s28 }
 0x662   : > { %p17_p8 = scmp.ge.s32.totalorder %s20_s29, 4   ;;  %s1381_s28 = smov %s1383_s9 }
 0x664   :  { %19 = sbr.rel (!%p17_p8) target bundleno = 3 (0x3), region = 94 }
 0x669   :  { %872 = vsyncpa [#allocation5], 1 }
 0x66a   :  { %874 = vsyncpa [#allocation5 + $0x1], 1 }
 0x66b   :  { %875 = vsyncpa [#allocation7], 1 }

// kernel: decoder_layer_forward.4
= control target key start
LH: loop header
LB: loop body
LE: loop exit
PB: predicated region body
PF: predicated region fallthrough
CT: control target
= control target key end

     0   :  { %s1627_s0 = inlined_call_operand.hbm [shape: f32[2,8,128], index: 0, kind: input, shape index: {}, may-alias: {0,1}]   ;;  %s1628_s1 = inlined_call_operand.hbm [shape: f32[2,8,128], index: 1, kind: input, shape index: {}, may-alias: {0,1}]   ;;  %s1629_s2 = inlined_call_operand.hbm [shape: f32[128,384], index: 2, kind: input, shape index: {}]   ;;  %s1630_s3 = inlined_call_operand.vmem [shape: f32[1,384], index: 3, kind: input, shape index: {}]   ;;  %s1631_s4 = inlined_call_operand.hbm [shape: f32[128,128], index: 4, kind: input, shape index: {}]   ;;  %s1632_s5 = inlined_call_operand.vmem [shape: f32[1,128], index: 5, kind: input, shape index: {}]   ;;  %s1633_s6 = inlined_call_operand.vmem [shape: f32[1,128], index: 6, kind: input, shape index: {}]   ;;  %s1634_s7 = inlined_call_operand.vmem [shape: f32[1,128], index: 7, kind: input, shape index: {}]   ;;  %s1635_s8 = inlined_call_operand.vmem [shape: f32[2,8,128], index: 8, kind: output, shape index: {}]  }
   0x1   :  { %1639 = sst [smem:[#allocation19_spill]] %s1629_s2 }
   0x2   :  { %1640 = sst [smem:[#allocation20_spill]] %s1631_s4 }
   0x3   :  { %1641 = sst [smem:[#allocation21_spill]] %s1635_s8 }
   0x4   :  { %13 = vsyncpa [#allocation6], 0 }
   0x5   :  { %15 = vsyncpa [#allocation6 + $0x1], 0 }
   0x6   :  { %16 = vsyncpa [#allocation8], 0 }
   0x7   :  { %18 = vsyncpa [#allocation8 + $0x1], 0 }
   0x8   :  { %19 = vsyncpa [#allocation11], 0  ;;  %s1434_s27 = smov 0   ;;  %s1436_s28 = smov 0  }
   0x9   :  { %s1438_s29 = smov 0   ;;  %s1440_s30 = smov 0  }
   0xa   :  { %s1442_s9 = smov 0   ;;  %s1444_s10 = smov 0  }
   0xb LB: > { %1642 = sst [smem:[#allocation16_spill]] %s1373_s9  ;;  %s1636_s11 = sadd.s32 4294967295, %s1377_s10   ;;  %s1377_s10 = sphi %s1444_s10, %s25_s10   ;;  %s1373_s9 = sphi %s1442_s9, %s1659_s9   ;;  %s1369_s30 = sphi %s1440_s30, %s1654_s30   ;;  %s1365_s29 = sphi %s1438_s29, %s1658_s29   ;;  %s1361_s28 = sphi %s1436_s28, %s1657_s28   ;;  %s1357_s27 = sphi %s1434_s27, %s1656_s27  }
   0xc   : > { %p1054_p0 = scmp.ge.s32.totalorder %s1377_s10, 1  ;;  %p1468_p1 = scmp.eq.s32.totalorder %s1636_s11, 0 }
   0xd   : > { %p250_p2 = scmp.lt.s32.totalorder %s1377_s10, 3  ;;  %s1644_s2 = sld [smem:[#allocation19_spill]] }
   0xe   : > { %s1379_s17 = smov [#allocation9]   ;;  %s1646_s4 = sld [smem:[#allocation20_spill]] }
   0xf   : > { %p1476_p3 = pnand %p1054_p0, %p250_p2  ;;  %s263_s18 = sshll.u32 %s1379_s17, 4  ;;  %s264_s18 = int_to_ptr.vmem [resolvable:$true] %s263_s18 }
  0x10   : > { %s1380_s22 = smov 384   ;;  %s1381_s23 = smov 24  }
  0x11   : > { %p1094_p4 = pneg %p1476_p3  ;;  %s1382_s24 = smov [#allocation10]  }
  0x12   : > { %s280_s25 = sshll.u32 %s1382_s24, 4  ;;  %s1383_s26 = smov 128   ;;  %s281_s25 = int_to_ptr.vmem [resolvable:$true] %s280_s25 }
  0x13   : > { %s261_s15 = sshll.u32 %s1644_s2, 4  ;;  %p1095_p5 = pnand %p1094_p4, %p1468_p1  ;;  %s262_s15 = int_to_ptr.hbm [resolvable:$true] %s261_s15 }
  0x14   : > { %s278_s21 = sshll.u32 %s1646_s4, 4  ;;  %s1384_s13 = smov 8   ;;  %s279_s21 = int_to_ptr.hbm [resolvable:$true] %s278_s21 }
  0x15   : > { %1097 = dma.hbm_to_vmem [thread:$0]  (!%p1095_p5), %s262_s15, 6144, %s264_s18, [#allocation8], %s1380_s22, %s1380_s22, %s1381_s23  }
  0x16   : > { %1100 = dma.hbm_to_vmem [thread:$0]  (!%p1095_p5), %s279_s21, 2048, %s281_s25, [#allocation11], %s1383_s26, %s1383_s26, %s1384_s13  }
  0x17   : > { %s37_s14 = sadd.s32 1, %s1373_s9  ;;  %s46_s17 = sadd.s32 1, %s1365_s29 }
  0x18   : > { %p39_p6 = scmp.ge.s32.totalorder %s37_s14, 2  ;;  %p53_p7 = scmp.ne.s32.totalorder %s1365_s29, %s1361_s28 }
  0x19   : > { %p54_p8 = scmp.eq.s32.totalorder %s1377_s10, 0  ;;  %p59_p9 = scmp.ne.s32.totalorder %s1361_s28, %s1357_s27 }
  0x1a   : > { %s1661_s14 = smov (%p39_p6, %s37_s14), 0  ;;  %p1110_p12 = scmp.lt.s32.totalorder %s1377_s10, 2 }
  0x1b   : > { %1647 = sst [smem:[#allocation17_spill]] %s1661_s14  ;;  %p1496_p10 = por %p54_p8, %p53_p7 }
  0x1c   : > { %p1502_p11 = por %p1468_p1, %p59_p9  ;;  %s41_s19 = ssub.s32 %s1373_s9, %s1661_s14 }
  0x1d   : > { %p44_p13 = scmp.eq.s32.totalorder %s41_s19, 0  ;;  %s303_s20 = sand.u32 1, %s1365_s29  }
  0x1e   : > { %s1058_s21 = sshll.u32 %s303_s20, 3  ;;  %s1059_s22 = sshll.u32 %s1373_s9, 3 }
  0x1f   : > { %s1511_s27 = scalar_select %p44_p13, %s1365_s29, %s46_s17  }
  0x20   : > { %s312_s25 = scalar_lea.hbm %s1627_s0, %s1059_s22  ;;  %s307_s26 = scalar_lea.vmem [#allocation5], %s1058_s21 }
  0x21   : > { %1650 = sst [smem:[#allocation18_spill]] %s1511_s27  ;;  %s316_s13 = sshll.u32 %s307_s26, 4  ;;  %s317_s13 = int_to_ptr.vmem [resolvable:$true] %s316_s13 }
  0x22   : > { %s314_s11 = sshll.u32 %s312_s25, 4  ;;  %p1102_p0 = pnand %p1110_p12, %p1496_p10  ;;  %s315_s11 = int_to_ptr.hbm [resolvable:$true] %s314_s11 }
  0x23   : > { %s331_s19 = scalar_lea.hbm %s1628_s1, %s1059_s22  ;;  %s323_s14 = sand.u32 1, %s1377_s10  }
  0x24   : > { %s304_s8 = scalar_lea.sflag [#allocation6], %s303_s20  ;;  %s333_s17 = sshll.u32 %s331_s19, 4  ;;  %s334_s17 = int_to_ptr.hbm [resolvable:$true] %s333_s17 }
  0x25   : > { %1104 = dma.hbm_to_vmem [thread:$0]  (!%p1102_p0), %s315_s11, 128, %s317_s13, %s304_s8  }
  0x26   : > { %s327_s9 = scalar_lea.vmem [#allocation7], %s1058_s21  ;;  %s324_s23 = scalar_lea.sflag [#allocation8], %s323_s14 }
  0x27   : > { %s335_s27 = sshll.u32 %s327_s9, 4  ;;  %344 = sbr.rel (%p1476_p3) target bundleno = 1579 (0x62b), region = 52  ;;  %s336_s27 = int_to_ptr.vmem [resolvable:$true] %s335_s27 }
  0x28   : > { %1107 = dma.hbm_to_vmem [thread:$0]  (!%p1102_p0), %s334_s17, 128, %s336_s27, %s324_s23  }
  0x29   : > { %s346_s15 = sand.u32 (!%p1476_p3), 1, %s1361_s28  }
  0x2a   : > { %s1526_s24 = sshll.u32 (!%p1476_p3), %s346_s15, 3  ;;  %s347_s2 = scalar_lea.sflag (!%p1476_p3), [#allocation6], %s346_s15 }
  0x2b   : > { %s350_s4 = scalar_lea.vmem (!%p1476_p3), [#allocation5], %s1526_s24 }
  0x2c   : > { %1340 = dma.done.wait (%p1502_p11), %s347_s2, 128  }
  0x2d   : > { %1342 = vsyncadd (%p1502_p11), %s347_s2, 4294967168  ;;  %s1651_s8 = sadd.s32 4294967295, %s1377_s10   ;;  %s360_s16 = scalar_lea.vmem [#allocation7], %s1526_s24 }
  0x2e   : > { %s356_s9 = sand.u32 1, %s1651_s8  }
  0x2f   : > { %s357_s11 = scalar_lea.sflag [#allocation8], %s356_s9 }
  0x30   : > { %1344 = dma.done.wait (%p1502_p11), %s357_s11, 128  }
  0x31   : > { %1346 = vsyncadd (%p1502_p11), %s357_s11, 4294967168 }
  0x32   : > { %1348 = dma.done.wait (%p1468_p1), [#allocation8], 6144  }
  0x33   : > { %1350 = vsyncadd (%p1468_p1), [#allocation8], 4294961152 }
  0x34   : > { %1352 = dma.done.wait (%p1468_p1), [#allocation11], 2048  }
  0x35   : > { %1354 = vsyncadd (%p1468_p1), [#allocation11], 4294965248  ;;  %v453_v0 = vld [vmem:[#allocation9 + $0x170] sm:$0xff]  ;;  %v519_v1 = vld [vmem:[#allocation9 + $0x168] sm:$0xff]  ;;  %vm549_vm0 = vcmask 261120   ;;  %s1385_s18 = smov 64  }
  0x36   : > { %v451_v2 = vld [vmem:[#allocation9 + $0x158] sm:$0xff]  ;;  %461 = vmatpush.msra.mxu0 %v453_v0  ;;  %524 = vmatpush.msra.mxu2 %v519_v1  ;;  %v518_v3 = vld [vmem:[#allocation9 + $0x150] sm:$0xff]  ;;  %v449_v4 = vld [vmem:[#allocation9 + $0x140] sm:$0xff]  ;;  %s1386_s20 = smov 96   ;;  %s1387_s22 = smov 32   ;;  %vm576_vm1 = vcmask 64512  }
  0x37   : > { %v517_v5 = vld [vmem:[#allocation9 + $0x138] sm:$0xff]  ;;  %v447_v6 = vld [vmem:[#allocation9 + $0x128] sm:$0xff]  ;;  %v516_v7 = vld [vmem:[#allocation9 + $0x120] sm:$0xff]  ;;  %vm688_vm2 = vcmask 523520   ;;  %vm766_vm3 = vcmask 785920   ;;  %vm844_vm4 = vcmask 1048320  }
  0x38   : > { %462 = vmatpush.msra.mxu0 %v451_v2  ;;  %525 = vmatpush.msra.mxu2 %v518_v3  ;;  %v445_v8 = vld [vmem:[#allocation9 + $0x110] sm:$0xff]  ;;  %v515_v9 = vld [vmem:[#allocation9 + $0x108] sm:$0xff]  ;;  %v443_v10 = vld [vmem:[#allocation9 + $0xf8] sm:$0xff]  ;;  %p411_p1 = scmp.lt.s32.totalorder %s1369_s30, 1 }
  0x39   : > { %v514_v11 = vld [vmem:[#allocation9 + $0xf0] sm:$0xff]  ;;  %v441_v12 = vld [vmem:[#allocation9 + $0xe0] sm:$0xff]  ;;  %v513_v13 = vld [vmem:[#allocation9 + $0xd8] sm:$0xff] }
  0x3a   : > { %463 = vmatpush.msra.mxu0 %v449_v4  ;;  %526 = vmatpush.msra.mxu2 %v517_v5  ;;  %v439_v14 = vld [vmem:[#allocation9 + $0xc8] sm:$0xff]  ;;  %v512_v15 = vld [vmem:[#allocation9 + $0xc0] sm:$0xff]  ;;  %v437_v16 = vld [vmem:[#allocation9 + $0xb0] sm:$0xff]  ;;  %s1663_s30 = smov (!%p411_p1, %s1369_s30), 1 }
  0x3b   : > { %v511_v17 = vld [vmem:[#allocation9 + $0xa8] sm:$0xff]  ;;  %v435_v18 = vld [vmem:[#allocation9 + $0x98] sm:$0xff]  ;;  %v510_v19 = vld [vmem:[#allocation9 + $0x90] sm:$0xff]  ;;  %s1067_s17 = sshll.u32 %s1663_s30, 3 }
  0x3c   : > { %464 = vmatpush.msra.mxu0 %v447_v6  ;;  %527 = vmatpush.msra.mxu2 %v516_v7  ;;  %v433_v20 = vld [vmem:[#allocation9 + $0x80] sm:$0xff]  ;;  %v509_v21 = vld [vmem:[#allocation9 + $0x78] sm:$0xff]  ;;  %v431_v22 = vld [vmem:[#allocation9 + $0x68] sm:$0xff] }
  0x3d   : > { %v508_v23 = vld [vmem:[#allocation9 + $0x60] sm:$0xff]  ;;  %v429_v24 = vld [vmem:[#allocation9 + $0x50] sm:$0xff]  ;;  %v507_v25 = vld [vmem:[#allocation9 + $0x48] sm:$0xff] }
  0x3e   : > { %465 = vmatpush.msra.mxu0 %v445_v8  ;;  %528 = vmatpush.msra.mxu2 %v515_v9  ;;  %v427_v26 = vld [vmem:[#allocation9 + $0x38] sm:$0xff]  ;;  %v506_v27 = vld [vmem:[#allocation9 + $0x30] sm:$0xff]  ;;  %v425_v28 = vld [vmem:[#allocation9 + $0x20] sm:$0xff] }
  0x3f   : > { %v505_v29 = vld [vmem:[#allocation9 + $0x18] sm:$0xff]  ;;  %v423_v30 = vld [vmem:[#allocation9 + $0x8] sm:$0xff]  ;;  %v504_v31 = vld [vmem:[#allocation9] sm:$0xff] }
  0x40   : > { %466 = vmatpush.msra.mxu0 %v443_v10  ;;  %529 = vmatpush.msra.mxu2 %v514_v11  ;;  %v422_v32 = vld [vmem:[%s360_s16] sm:$0xff]  ;;  %v1552_v33 = vld [vmem:[%s350_s4] sm:$0xff]  ;;  %s1652_s4 = sld [smem:[#allocation21_spill]] }
  0x41   : > { %v454_v34 = vld [vmem:[#allocation9 + $0x178] sm:$0xff]  ;;  %v452_v35 = vld [vmem:[#allocation9 + $0x160] sm:$0xff]  ;;  %v450_v36 = vld [vmem:[#allocation9 + $0x148] sm:$0xff] }
  0x42   : > { %467 = vmatpush.msra.mxu0 %v441_v12  ;;  %530 = vmatpush.msra.mxu2 %v513_v13  ;;  %v448_v37 = vld [vmem:[#allocation9 + $0x130] sm:$0xff]  ;;  %v455_v38 = vld [vmem:[%s1630_s3 + $0x1] sm:$0x3]  ;;  %v1171_v42 = vld [vmem:[%s1630_s3] ss:$0 sm:$0xff] }
  0x43   : > { %481 = vmatpush.msra.mxu1 %v454_v34  ;;  %v457_v39 = vperm.slane %v455_v38, 0  ;;  %v446_v46 = vld [vmem:[#allocation9 + $0x118] sm:$0xff]  ;;  %v444_v47 = vld [vmem:[#allocation9 + $0x100] sm:$0xff]  ;;  %v442_v48 = vld [vmem:[#allocation9 + $0xe8] sm:$0xff]  ;;  %v458_v1 = vperm.slane %v455_v38, 1 }
  0x44   : > { %468 = vmatpush.msra.mxu0 %v439_v14  ;;  %531 = vmatpush.msra.mxu2 %v512_v15  ;;  %v440_v49 = vld [vmem:[#allocation9 + $0xd0] sm:$0xff]  ;;  %v438_v50 = vld [vmem:[#allocation9 + $0xb8] sm:$0xff]  ;;  %v436_v51 = vld [vmem:[#allocation9 + $0xa0] sm:$0xff] }
  0x45   : > { %482 = vmatpush.msra.mxu1 %v452_v35  ;;  %v434_v52 = vld [vmem:[#allocation9 + $0x88] sm:$0xff]  ;;  %v432_v53 = vld [vmem:[#allocation9 + $0x70] sm:$0xff]  ;;  %v430_v54 = vld [vmem:[#allocation9 + $0x58] sm:$0xff] }
  0x46   : > { %469 = vmatpush.msra.mxu0 %v437_v16  ;;  %532 = vmatpush.msra.mxu2 %v511_v17  ;;  %v428_v55 = vld [vmem:[#allocation9 + $0x40] sm:$0xff]  ;;  %v426_v56 = vld [vmem:[#allocation9 + $0x28] sm:$0xff]  ;;  %v424_v57 = vld [vmem:[#allocation9 + $0x10] sm:$0xff]  ;;  %s417_s8 = scalar_lea.vmem %s1652_s4, %s1067_s17 }
  0x47   : > { %483 = vmatpush.msra.mxu1 %v450_v36 }
  0x48   : > { %470 = vmatpush.msra.mxu0 %v435_v18  ;;  %533 = vmatpush.msra.mxu2 %v510_v19 }
  0x49   : > { %484 = vmatpush.msra.mxu1 %v448_v37 }
  0x4a   : > { %471 = vmatpush.msra.mxu0 %v433_v20  ;;  %534 = vmatpush.msra.mxu2 %v509_v21 }
  0x4b   : > { %485 = vmatpush.msra.mxu1 %v446_v46  ;;  %v860_v46 = vld [vmem:[#allocation10 + $0x68] sm:$0xff] }
  0x4c   : > { %472 = vmatpush.msra.mxu0 %v431_v22  ;;  %535 = vmatpush.msra.mxu2 %v508_v23 }
  0x4d   : > { %486 = vmatpush.msra.mxu1 %v444_v47  ;;  %v859_v47 = vld [vmem:[#allocation10 + $0x60] sm:$0xff] }
  0x4e   : > { %473 = vmatpush.msra.mxu0 %v429_v24  ;;  %536 = vmatpush.msra.mxu2 %v507_v25 }
  0x4f   : > { %487 = vmatpush.msra.mxu1 %v442_v48  ;;  %v858_v48 = vld [vmem:[#allocation10 + $0x58] sm:$0xff] }
  0x50   : > { %474 = vmatpush.msra.mxu0 %v427_v26  ;;  %537 = vmatpush.msra.mxu2 %v506_v27 }
  0x51   : > { %488 = vmatpush.msra.mxu1 %v440_v49  ;;  %v857_v49 = vld [vmem:[#allocation10 + $0x50] sm:$0xff] }
  0x52   : > { %475 = vmatpush.msra.mxu0 %v425_v28  ;;  %538 = vmatpush.msra.mxu2 %v505_v29 }
  0x53   : > { %489 = vmatpush.msra.mxu1 %v438_v50  ;;  %v856_v50 = vld [vmem:[#allocation10 + $0x48] sm:$0xff] }
  0x54   : > { %476 = vmatpush.msra.mxu0 %v423_v30  ;;  %539 = vmatpush.msra.mxu2 %v504_v31 }
  0x55   : > { %477 = vmatmul.f32.vlgmr.msra.gmra.mxu0 %v422_v32  ;;  %540 = vmatmul.f32.vlgmr.msra.gmra.mxu2 %v1552_v33 }
  0x56   : > { %490 = vmatpush.msra.mxu1 %v436_v51  ;;  %v855_v51 = vld [vmem:[#allocation10 + $0x40] sm:$0xff] }
  0x58   : > { %491 = vmatpush.msra.mxu1 %v434_v52 }
  0x5a   : > { %492 = vmatpush.msra.mxu1 %v432_v53 }
  0x5c   : > { %493 = vmatpush.msra.mxu1 %v430_v54 }
  0x5e   : > { %494 = vmatpush.msra.mxu1 %v428_v55 }
  0x60   : > { %495 = vmatpush.msra.mxu1 %v426_v56 }
  0x62   : > { %496 = vmatpush.msra.mxu1 %v424_v57 }
  0x63   : > { %497 = vmatmul.f32.vlgmr.msra.gmra.mxu1 %v422_v32 }
  0xd2   : > { %v478_v40 = vpop.f32.mrf.mxu0 }
  0xd3   : > { %v479_v41 = vadd.f32 %v478_v40, %v457_v39 }
  0xd5   : > { %698 = vrot.lane.b32.xlu2 %v479_v41, %s1385_s18  ;;  %620 = vrot.lane.b32.xlu0 %v479_v41, %s1386_s20 }
  0xd6   : > { %1068 = vmatpush.xpose.msk.msrb.mxu0 %vm549_vm0, %v479_v41 }
  0xd8   : > { %v541_v43 = vpop.f32.mrf.mxu2 }
  0xd9   : > { %v542_v44 = vadd.f32 %v1171_v42, %v541_v43 }
  0xdb   : > { %v546_v45 = vmul.f32 0.17677669, %v542_v44  ;;  %v862_v44 = vld [vmem:[#allocation10 + $0x78] sm:$0xff] }
  0xdd   : > { %776 = vrot.lane.b32.xlu2 %v479_v41, %s1387_s22  ;;  %617 = vrot.lane.b32.xlu0 %v546_v45, %s1386_s20 }
  0xde   : > { %1069 = vmatmul.msk.f32.vlgmr.msrb.gmra.mxu0 %vm549_vm0, %v546_v45 }
  0xe0   : > { %v498_v2 = vpop.f32.mrf.mxu1 }
  0xe1   : > { %v499_v3 = vadd.f32 %v498_v2, %v458_v1  ;;  %v849_v1 = vld [vmem:[#allocation10 + $0x10] sm:$0xff]  ;;  %v848_v2 = vld [vmem:[#allocation10 + $0x8] sm:$0xff] }
  0xe3   : > { %605 = vmatpush.msrb.mxu2 %v499_v3 }
  0xe5   : > { %773 = vrot.lane.b32.xlu2 %v546_v45, %s1387_s22  ;;  %695 = vrot.lane.b32.xlu0 %v546_v45, %s1385_s18  ;;  %v861_v45 = vld [vmem:[#allocation10 + $0x70] sm:$0xff] }
 0x12f   : > { %v699_v58 = vpop.permute.xlu2 %698 }
 0x137   : > { %v777_v60 = vpop.permute.xlu2 %776 }
 0x13f   : > { %v774_v62 = vpop.permute.xlu2 %773 }
 0x147   : > { %v621_v59 = vpop.permute.xlu0 %620 }
 0x148   : > { %1071 = vmatpush.xpose.msk.msrb.mxu1 %vm549_vm0, %v621_v59 }
 0x14c   : > { %1077 = vmatpush.xpose.msk.msra.mxu1 %vm549_vm0, %v777_v60  ;;  %v854_v60 = vld [vmem:[#allocation10 + $0x38] sm:$0xff] }
 0x14f   : > { %v618_v61 = vpop.permute.xlu0 %617 }
 0x150   : > { %1072 = vmatmul.msk.f32.vlgmr.msrb.gmra.mxu1 %vm549_vm0, %v618_v61  ;;  %v853_v61 = vld [vmem:[#allocation10 + $0x30] sm:$0xff] }
 0x157   : > { %v696_v4 = vpop.permute.xlu0 %695 }
 0x158   : > { %1078 = vmatmul.msk.f32.vlgmr.msra.gmra.mxu1 %vm549_vm0, %v774_v62  ;;  %v852_v62 = vld [vmem:[#allocation10 + $0x28] sm:$0xff] }
 0x15b   : > { %v573_v63 = vpop.f32.mrf.mxu0 }
 0x15c   : > { %v577_v0 = vsel %vm576_vm1, %v573_v63, -inf }
 0x15d   : > { %578 = vmax.xlane.f32.xlu0 %v577_v0  ;;  %v850_v0 = vld [vmem:[#allocation10 + $0x18] sm:$0xff] }
 0x171   : > { %735 = vrot.lane.b32.xlu0 %v499_v3, %s1385_s18 }
 0x1cd   : > { %v643_v5 = vpop.f32.mrf.mxu1 }
 0x1ce   : > { %v646_v6 = vsel %vm576_vm1, %v643_v5, -inf }
 0x1cf   : > { %647 = vmax.xlane.f32.xlu1 %v646_v6 }
 0x1d0   : > { %v579_v7 = vpop.xlane.xlu0 %578 }
 0x1d1   : > { %v580_v8 = vsub.f32 %v573_v63, %v579_v7  ;;  %v851_v63 = vld [vmem:[#allocation10 + $0x20] sm:$0xff]  ;;  %v1172_v7 = vld [vmem:[%s1632_s5] ss:$0 sm:$0xff] }
 0x1d3   : > { %v581_v9 = vmul.f32 1.442695, %v580_v8 }
 0x1d5   : > { %1175 = vpow2.f32 %v581_v9  ;;  %v799_v10 = vpop.f32.mrf.mxu1 }
 0x1d6   : > { %v802_v11 = vsel %vm576_vm1, %v799_v10, -inf }
 0x1d7   : > { %803 = vmax.xlane.f32.xlu2 %v802_v11  ;;  %v1388_v11 = vmov 128.0  }
 0x1db   : > { %v1176_v12 = vpop.eup %1175 }
 0x1dc   : > { %1070 = vmatmul.msk.f32.vlgmr.msrb.gmra.mxu2 %vm576_vm1, %v1176_v12  ;;  %v583_v13 = vsel %vm576_vm1, %v1176_v12, 0.0 }
 0x1e3   : > { %v736_v14 = vpop.permute.xlu0 %735 }
 0x1e4   : > { %756 = vmatpush.msra.mxu0 %v736_v14 }
 0x1e8   : > { %657 = vrot.lane.b32.xlu1 %v499_v3, %s1386_s20 }
 0x1ef   : > { %813 = vrot.lane.b32.xlu2 %v499_v3, %s1387_s22  ;;  %v847_v3 = vld [vmem:[#allocation10] sm:$0xff] }
 0x218   : > { %584 = vadd.xlane.f32.xlu2 %v583_v13 }
 0x242   : > { %v648_v15 = vpop.xlane.xlu1 %647 }
 0x243   : > { %v649_v18 = vsub.f32 %v643_v5, %v648_v15 }
 0x245   : > { %v650_v20 = vmul.f32 1.442695, %v649_v18 }
 0x24a   : > { %v804_v16 = vpop.xlane.xlu2 %803 }
 0x24b   : > { %v805_v17 = vsub.f32 %v799_v10, %v804_v16 }
 0x24d   : > { %v806_v19 = vmul.f32 1.442695, %v805_v17 }
 0x24f   : > { %1177 = vpow2.f32 %v806_v19 }
 0x250   : > { %1179 = vpow2.f32 %v650_v20 }
 0x252   : > { %v814_v21 = vpop.permute.xlu2 %813 }
 0x253   : > { %834 = vmatpush.msra.mxu2 %v814_v21 }
 0x255   : > { %v1178_v22 = vpop.eup %1177 }
 0x256   : > { %1079 = vmatmul.msk.f32.vlgmr.msra.gmra.mxu2 %vm576_vm1, %v1178_v22  ;;  %v808_v23 = vsel %vm576_vm1, %v1178_v22, 0.0  ;;  %v1180_v25 = vpop.eup %1179 }
 0x257   : > { %809 = vadd.xlane.f32.xlu0 %v808_v23  ;;  %v652_v34 = vsel %vm576_vm1, %v1180_v25, 0.0 }
 0x25a   : > { %v658_v24 = vpop.permute.xlu1 %657 }
 0x25b   : > { %678 = vmatpush.msra.mxu3 %v658_v24 }
 0x25c   : > { %1073 = vmatmul.msk.f32.vlgmr.msra.gmra.mxu3 %vm576_vm1, %v1180_v25 }
 0x25d   : > { %1074 = vmatpush.xpose.msk.msrb.mxu3 %vm549_vm0, %v699_v58 }
 0x25f   : > { %v607_v28 = vpop.f32.mrf.mxu2 }
 0x261   : > { %867 = vmatpush.msra.mxu3 %v862_v44 }
 0x263   : > { %868 = vmatpush.msra.mxu3 %v861_v45 }
 0x264   : > { %1075 = vmatmul.msk.f32.vlgmr.msrb.gmra.mxu3 %vm549_vm0, %v696_v4 }
 0x265   : > { %869 = vmatpush.msra.mxu3 %v860_v46 }
 0x267   : > { %870 = vmatpush.msra.mxu3 %v859_v47 }
 0x269   : > { %871 = vmatpush.msra.mxu3 %v858_v48 }
 0x26b   : > { %872 = vmatpush.msra.mxu3 %v857_v49 }
 0x26d   : > { %873 = vmatpush.msra.mxu3 %v856_v50 }
 0x26f   : > { %874 = vmatpush.msra.mxu3 %v855_v51 }
 0x271   : > { %875 = vmatpush.msra.mxu3 %v854_v60 }
 0x273   : > { %876 = vmatpush.msra.mxu3 %v853_v61 }
 0x275   : > { %877 = vmatpush.msra.mxu3 %v852_v62 }
 0x277   : > { %878 = vmatpush.msra.mxu3 %v851_v63 }
 0x279   : > { %879 = vmatpush.msra.mxu3 %v850_v0 }
 0x27b   : > { %880 = vmatpush.msra.mxu3 %v849_v1 }
 0x27d   : > { %881 = vmatpush.msra.mxu3 %v848_v2 }
 0x27f   : > { %882 = vmatpush.msra.mxu3 %v847_v3 }
 0x28b   : > { %v585_v26 = vpop.xlane.xlu2 %584 }
 0x28c   : > { %1181 = vrcp.f32 %v585_v26 }
 0x292   : > { %v1182_v27 = vpop.eup %1181 }
 0x293   : > { %v610_v29 = vmul.f32 %v1182_v27, %v607_v28 }
 0x295   : > { %611 = vst.msk [vmem:[#allocation4] sm:$0xff] %vm549_vm0, %v610_v29 }
 0x2ca   : > { %v810_v53 = vpop.xlane.xlu0 %809 }
 0x2d9   : > { %v836_v57 = vpop.f32.mrf.mxu2 }
 0x2df   : > { %v680_v30 = vpop.f32.mrf.mxu3 }
 0x2e7   : > { %v721_v31 = vpop.f32.mrf.mxu3 }
 0x2e8   : > { %v724_v32 = vsel %vm576_vm1, %v721_v31, -inf }
 0x2e9   : > { %725 = vmax.xlane.f32.xlu1 %v724_v32  ;;  %v1174_v32 = vld [vmem:[%s1634_s7] ss:$0 sm:$0xff] }
 0x2f1   : > { %653 = vadd.xlane.f32.xlu1 %v652_v34 }
 0x35c   : > { %v726_v35 = vpop.xlane.xlu1 %725 }
 0x35d   : > { %v727_v36 = vsub.f32 %v721_v31, %v726_v35 }
 0x35f   : > { %v728_v37 = vmul.f32 1.442695, %v727_v36 }
 0x361   : > { %1183 = vpow2.f32 %v728_v37 }
 0x364   : > { %v654_v38 = vpop.xlane.xlu1 %653 }
 0x365   : > { %1185 = vrcp.f32 %v654_v38 }
 0x367   : > { %v1184_v39 = vpop.eup %1183 }
 0x368   : > { %1076 = vmatmul.msk.f32.vlgmr.msra.gmra.mxu0 %vm576_vm1, %v1184_v39  ;;  %v730_v42 = vsel %vm576_vm1, %v1184_v39, 0.0 }
 0x36b   : > { %v1186_v40 = vpop.eup %1185 }
 0x36c   : > { %v683_v41 = vmul.f32 %v1186_v40, %v680_v30  ;;  %v1173_v30 = vld [vmem:[%s1633_s6] ss:$0 sm:$0xff] }
 0x36e   : > { %685 = vrot.lane.b32.xlu1 %v683_v41, %s1387_s22 }
 0x398   : > { %731 = vadd.xlane.f32.xlu1 %v730_v42 }
 0x3e0   : > { %v686_v43 = vpop.permute.xlu1 %685 }
 0x3e1   : > { %689 = vst.msk [vmem:[#allocation4] sm:$0xff] %vm688_vm2, %v686_v43 }
 0x3e5   : > { %v758_v55 = vpop.f32.mrf.mxu0 }
 0x40b   : > { %v732_v52 = vpop.xlane.xlu1 %731 }
 0x40c   : > { %1187 = vrcp.f32 %v732_v52 }
 0x40d   : > { %1189 = vrcp.f32 %v810_v53 }
 0x40e   : > { %1191 = vrcp.f32 %v1388_v11 }
 0x412   : > { %v1188_v54 = vpop.eup %1187 }
 0x413   : > { %v761_v56 = vmul.f32 %v1188_v54, %v758_v55  ;;  %v1190_v58 = vpop.eup %1189 }
 0x414   : > { %v839_v59 = vmul.f32 %v1190_v58, %v836_v57  ;;  %v1192_v12 = vpop.eup %1191 }
 0x415   : > { %763 = vrot.lane.b32.xlu1 %v761_v56, %s1385_s18  ;;  %v893_v13 = vmul.f32 128.0, %v1192_v12  ;;  %vm897_vm5 = vweird.f32 %v1192_v12 }
 0x417   : > { %v894_v14 = vsub.f32 1.0, %v893_v13 }
 0x419   : > { %v895_v15 = vmul.f32 %v1192_v12, %v894_v14 }
 0x41b   : > { %v896_v16 = vadd.f32 %v1192_v12, %v895_v15 }
 0x41d   : > { %841 = vrot.lane.b32.xlu1 %v839_v59, %s1386_s20  ;;  %v898_v17 = vsel %vm897_vm5, %v1192_v12, %v896_v16 }
 0x487   : > { %v764_v4 = vpop.permute.xlu1 %763 }
 0x488   : > { %767 = vst.msk [vmem:[#allocation4] sm:$0xff] %vm766_vm3, %v764_v4 }
 0x48f   : > { %v842_v5 = vpop.permute.xlu1 %841 }
 0x490   : > { %845 = vst.msk [vmem:[#allocation4] sm:$0xff] %vm844_vm4, %v842_v5 }
 0x497   : > { %v846_v6 = vld [vmem:[#allocation4] sm:$0xff] }
 0x498   : > { %883 = vmatmul.f32.vlgmr.msra.gmra.mxu3 %v846_v6 }
 0x51b   : > { %v884_v8 = vpop.f32.mrf.mxu3 }
 0x51c   : > { %v885_v9 = vadd.f32 %v1172_v7, %v884_v8 }
 0x51e   : > { %v887_v10 = vadd.f32 %v885_v9, %v1552_v33 }
 0x520   : > { %890 = vadd.xlane.f32.xlu0 %v887_v10 }
 0x593   : > { %v891_v18 = vpop.xlane.xlu0 %890 }
 0x594   : > { %v899_v19 = vmul.f32 %v898_v17, %v891_v18 }
 0x596   : > { %v900_v20 = vsub.f32 %v887_v10, %v899_v19 }
 0x598   : > { %v901_v21 = vmul.f32 %v900_v20, %v900_v20 }
 0x59a   : > { %902 = vadd.xlane.f32.xlu2 %v901_v21 }
 0x60d   : > { %v903_v22 = vpop.xlane.xlu2 %902 }
 0x60e   : > { %v904_v23 = vmul.f32 %v903_v22, %v898_v17 }
 0x610   : > { %v905_v33 = vadd.f32 1e-05, %v904_v23 }
 0x612   : > { %1193 = vrsqrt.f32 %v905_v33  ;;  %vm912_vm7 = vweird.f32 %v905_v33 }
 0x618   : > { %v1194_v24 = vpop.eup %1193 }
 0x619   : > { %v907_v25 = vmul.f32 %v1194_v24, %v905_v33  ;;  %vm913_vm6 = vweird.f32 %v1194_v24 }
 0x61a   : > { %vm914_vm8 = vmor %vm912_vm7, %vm913_vm6 }
 0x61b   : > { %v908_v26 = vmul.f32 %v1194_v24, %v907_v25 }
 0x61d   : > { %v909_v27 = vmul.f32 0.5, %v908_v26 }
 0x61f   : > { %v910_v28 = vsub.f32 1.5, %v909_v27 }
 0x621   : > { %v911_v29 = vmul.f32 %v1194_v24, %v910_v28 }
 0x623   : > { %v915_v31 = vsel %vm914_vm8, %v1194_v24, %v911_v29 }
 0x624   : > { %v916_v34 = vmul.f32 %v915_v31, %v900_v20 }
 0x626   : > { %v920_v35 = vmul.f32 %v1173_v30, %v916_v34 }
 0x628   : > { %v924_v36 = vadd.f32 %v1174_v32, %v920_v35 }
 0x62a   : > { %925 = vst [vmem:[%s417_s8] sm:$0xff] %v924_v36 }
 0x62b PF: > { %s25_s10 = sadd.s32 1, %s1377_s10   ;;  %s1653_s9 = sld [smem:[#allocation18_spill]] }
 0x62c   : > { %p22_p2 = scmp.ge.s32.totalorder %s25_s10, 4   ;;  %s1654_s30 = sld [smem:[#allocation16_spill]] }
 0x62d   : > { %s1655_s11 = sld [smem:[#allocation17_spill]]  ;;  %s1656_s27 = smov %s1361_s28 }
 0x62e   : > { %s1657_s28 = smov %s1365_s29 }
 0x62f   :  { %24 = sbr.rel (!%p22_p2) target bundleno = 11 (0xb), region = 117 }
 0x631   : > { %s1658_s29 = smov %s1653_s9 }
 0x633   : > { %s1659_s9 = smov %s1655_s11 }
 0x634   :  { %951 = vsyncpa [#allocation6], 1 }
 0x635   :  { %953 = vsyncpa [#allocation6 + $0x1], 1 }
 0x636   :  { %954 = vsyncpa [#allocation8], 1 }
 0x637   :  { %956 = vsyncpa [#allocation8 + $0x1], 1 }
 0x638   :  { %957 = vsyncpa [#allocation11], 1 }

</bundles_post_ra>
